<compile_context>
chip_gen: v5e
topology: v5e:2x2
jax: 0.10.0
libtpu: 0.0.40
codegen_flags: <defaults>
</compile_context>

<pallas_src>
import jax
import jax.numpy as jnp
from jax.experimental import pallas as pl
from jax.experimental.pallas import tpu as pltpu


def _round_up(x, m):
    return (x + m - 1) // m * m


def _cdiv(a, b):
    return (a + b - 1) // b


def _vmem_capacity_bytes():
    try:
        info = pltpu.get_tpu_info()
        cap = getattr(info, "vmem_capacity_bytes", None)
        if cap:
            return int(cap)
    except Exception:
        pass
    return 64 * 1024 * 1024        # conservative (v7x-sized) fallback


def _self_attn_classifier_kernel(x_ref, w1_ref, b1_ref, w2_ref, b2_ref,
                                 w3_ref, b3_ref, logp_ref, attn_ref):
    f32 = jnp.float32
    TB, S, Dp = x_ref.shape
    R = w2_ref.shape[0]

    x = x_ref[...]                                    # (TB, S, Dp), input dtype
    xf = x.reshape(TB * S, Dp)                        # free reshape: merge leading dims

    # --- first projection: ONE big MXU matmul over all TB*S rows ----------------------
    h = jnp.tanh(jnp.dot(xf, w1_ref[...], preferred_element_type=f32)
                 + b1_ref[...])                       # (TB*S, da_p) f32
    h3 = h.reshape(TB, S, h.shape[-1])                # free reshape: split leading dim

    w2 = w2_ref[...].astype(f32)                      # (R, da_p)
    b2 = b2_ref[...].astype(f32)                      # (R, 1)
    xw = x.astype(f32)                                # exact f32 pooling math

    logits = b3_ref[...].astype(f32)                  # (1, T_p); broadcasts on first add

    for r in range(R):                                # r == 3, static unroll
        # attention scores for head r: VPU broadcast-multiply + lane reduction
        w2_row = w2[r:r + 1, :][None]                 # (1, 1, da_p)
        s_r = jnp.sum(h3 * w2_row, axis=-1) + b2[r:r + 1, :]        # (TB, S)

        # exact softmax over the sequence
        m = jnp.max(s_r, axis=-1, keepdims=True)
        e = jnp.exp(s_r - m)
        a_r = e / jnp.sum(e, axis=-1, keepdims=True)                # (TB, S)
        attn_ref[r, :, :] = a_r.astype(attn_ref.dtype)

        # attention pooling for head r (same math as the PyTorch forward)
        p_r = jnp.sum(xw * a_r[:, :, None], axis=1)                 # (TB, Dp) f32

        # classifier contribution of head r: K = D_p MXU matmul, f32 accumulation
        logits = logits + jnp.dot(p_r, w3_ref[r], preferred_element_type=f32)

    # --- exact log-softmax over tags (padded tag columns carry a -1e30 bias) ----------
    lmax = jnp.max(logits, axis=-1, keepdims=True)
    lse = jnp.log(jnp.sum(jnp.exp(logits - lmax), axis=-1, keepdims=True)) + lmax
    logp_ref[...] = (logits - lse).astype(logp_ref.dtype)


def self_attention_classifier(x, params):
    """x: (B, S, D=2*lstm_dim). Returns (log_probs (B, T), attention (B, S, r))."""
    B, S, D = x.shape
    w1, b1, w2, b2, w3, b3 = params
    da, R, T = w1.shape[1], w2.shape[1], w3.shape[1]
    assert w3.shape[0] == R * D

    f32 = jnp.float32
    x_itemsize = jnp.dtype(x.dtype).itemsize

    # --- lane padding: da, tagset, and (only when needed) D ---------------------------
    da_p = _round_up(da, 128)
    T_p = _round_up(T, 128)
    D_p = D if D % 128 == 0 else _round_up(D, 128)

    w1_p = jnp.zeros((D_p, da_p), f32).at[:D, :da].set(w1.astype(f32))
    b1_p = jnp.zeros((1, da_p), f32).at[0, :da].set(b1.astype(f32))
    w2_p = jnp.zeros((R, da_p), f32).at[:, :da].set(w2.T.astype(f32))       # (r, da_p)
    b2_p = b2.astype(f32).reshape(R, 1)
    w3_p = jnp.zeros((R, D_p, T_p), f32).at[:, :D, :T].set(w3.astype(f32).reshape(R, D, T))
    b3_p = jnp.full((1, T_p), -1e30, f32).at[0, :T].set(b3.astype(f32))     # kill padded tags

    # --- generation-aware batch-tile sizing --------------------------------------------
    vmem_cap = _vmem_capacity_bytes()
    ceiling = vmem_cap - vmem_cap // 8          # ~112 MiB on v5e/v6e, ~56 MiB on v7x

    row_bytes = S * D_p * x_itemsize
    weight_bytes = 4 * (D_p * da_p + da_p + R * da_p + R + R * D_p * T_p + T_p)

    def est_need(tb):
        x_tile = tb * row_bytes                                    # double-buffered below
        out_tile = tb * T_p * 4 + R * tb * S * x_itemsize          # double-buffered below
        work = 4 * tb * S * (2 * da_p + 2 * D_p) + 4 * tb * (T_p + D_p + 4 * S)
        return 2 * x_tile + 2 * out_tile + 2 * weight_bytes + work

    target = max(8 * row_bytes, vmem_cap // 12)                    # per-buffer x target
    TB = _round_up(max(1, target // row_bytes), 8)
    TB = min(TB, _round_up(max(1, _cdiv(B, 2)), 8))                # keep >= 2 grid steps
    TB = max(TB, 8)
    while TB > 8 and est_need(TB) + est_need(TB) // 2 > ceiling:   # fit under the cap
        TB = max(8, _round_up(TB // 2, 8))

    steps = max(2, _cdiv(B, TB))
    steps += steps % 2                                             # even steps for 2-TC parts
    B_pad = steps * TB
    grid = (steps,)

    vmem_limit = int(min(ceiling, max(16 * 1024 * 1024,
                                      est_need(TB) + est_need(TB) // 2)))

    # --- zero-pad x (batch and, if needed, feature dim) --------------------------------
    if B_pad != B or D_p != D:
        x = jnp.pad(x, ((0, B_pad - B), (0, 0), (0, D_p - D)))

    cost = pl.CostEstimate(
        flops=2 * B_pad * (S * D_p * da_p + S * da_p * R + S * D_p * R + R * D_p * T_p),
        transcendentals=B_pad * (S * da_p + S * R + T_p),
        bytes_accessed=(B_pad * S * D_p * x_itemsize + weight_bytes
                        + B_pad * T_p * 4 + R * B_pad * S * x_itemsize))

    out_shape = (jax.ShapeDtypeStruct((B_pad, T_p), f32),
                 jax.ShapeDtypeStruct((R, B_pad, S), x.dtype))

    def build(single_buffer_weights):
        wkw = {"pipeline_mode": pl.Buffered(1)} if single_buffer_weights else {}

        def wspec(shape):
            zero = (lambda b: (0, 0)) if len(shape) == 2 else (lambda b: (0, 0, 0))
            return pl.BlockSpec(shape, zero, **wkw)

        return pl.pallas_call(
            _self_attn_classifier_kernel,
            out_shape=out_shape,
            grid_spec=pltpu.PrefetchScalarGridSpec(
                num_scalar_prefetch=0,
                grid=grid,
                in_specs=[
                    pl.BlockSpec((TB, S, D_p), lambda b: (b, 0, 0)),   # x: batch-tiled stream
                    wspec((D_p, da_p)),                                 # weights: resident
                    wspec((1, da_p)),
                    wspec((R, da_p)),
                    wspec((R, 1)),
                    wspec((R, D_p, T_p)),
                    wspec((1, T_p)),
                ],
                out_specs=(
                    pl.BlockSpec((TB, T_p), lambda b: (b, 0)),          # lane-dense logp
                    pl.BlockSpec((R, TB, S), lambda b: (0, b, 0)),      # attention, x.dtype
                )),
            compiler_params=pltpu.CompilerParams(
                dimension_semantics=("parallel",),
                vmem_limit_bytes=vmem_limit),
            cost_estimate=cost,
        )

    args = (x, w1_p, b1_p, w2_p, b2_p, w3_p, b3_p)
    try:
        logp_pad, attn_rbs = jax.block_until_ready(build(True)(*args))
    except Exception:
        # pl.Buffered(1) not supported by this JAX build -> default (double) buffering;
        # the VMEM estimate already counts the weights twice, so the limit still holds.
        logp_pad, attn_rbs = jax.block_until_ready(build(False)(*args))

    log_probs = logp_pad[:B, :T]
    attention = jnp.transpose(attn_rbs[:, :B, :], (1, 2, 0))   # -> PyTorch (B, S, r) layout
    return log_probs, attention


def init_params(key, lstm_dim, da, r, tagset_size):
    """Deterministic synthetic parameters with the nn.Module's shapes, stored as (in, out)."""
    D = 2 * lstm_dim
    ks = jax.random.split(key, 6)

    def u(k, shape, fan_in):
        bound = 1.0 / jnp.sqrt(fan_in)
        return jax.random.uniform(k, shape, jnp.float32, -bound, bound)

    w1 = u(ks[0], (D, da), D)                      # Linear(2*lstm_dim, da), transposed
    b1 = u(ks[1], (da,), D)
    w2 = u(ks[2], (da, r), da)                     # Linear(da, r), transposed
    b2 = u(ks[3], (r,), da)
    w3 = u(ks[4], (3 * D, tagset_size), 3 * D)     # Linear(6*lstm_dim, tagset), transposed
    b3 = u(ks[5], (tagset_size,), 3 * D)
    return (w1, b1, w2, b2, w3, b3)


def reference(x, params):
    """Pure-JAX reference mirroring the PyTorch forward pass exactly."""
    w1, b1, w2, b2, w3, b3 = params
    h = jnp.tanh(x @ w1 + b1)
    attn = jax.nn.softmax(h @ w2 + b2, axis=1)
    ms = [jnp.sum(x * attn[:, :, i:i + 1], axis=1) for i in range(w2.shape[1])]
    feats = jnp.concatenate(ms, axis=1)
    logits = feats @ w3 + b3
    return jax.nn.log_softmax(logits, axis=-1), attn


if __name__ == "__main__":
    B, S = 2, 8
    lstm_dim, da, r, tagset_size = 32, 16, 3, 5
    D = 2 * lstm_dim

    key = jax.random.PRNGKey(0)
    kx, kp = jax.random.split(key)
    x = jax.random.normal(kx, (B, S, D), jnp.float32)
    params = init_params(kp, lstm_dim, da, r, tagset_size)

    logp, attn = self_attention_classifier(x, params)
    logp = jax.block_until_ready(logp)
    attn = jax.block_until_ready(attn)

    logp_ref, attn_ref = reference(x, params)
    assert logp.shape == (B, tagset_size) and attn.shape == (B, S, r)
    assert jnp.allclose(attn, attn_ref, rtol=2e-3, atol=2e-3), \
        float(jnp.max(jnp.abs(attn - attn_ref)))
    assert jnp.allclose(logp, logp_ref, rtol=2e-3, atol=2e-3), \
        float(jnp.max(jnp.abs(logp - logp_ref)))
    print("KERNEL_OK")
</pallas_src>

<mosaic_0001>
module attributes {stable_mosaic.version = 11 : i64} {
  func.func @_self_attn_classifier_kernel(%arg0: i32, %arg1: memref<8x8x128xf32, #tpu.memory_space<vmem>>, %arg2: memref<128x128xf32, #tpu.memory_space<vmem>>, %arg3: memref<1x128xf32, #tpu.memory_space<vmem>>, %arg4: memref<3x128xf32, #tpu.memory_space<vmem>>, %arg5: memref<3x1xf32, #tpu.memory_space<vmem>>, %arg6: memref<3x128x128xf32, #tpu.memory_space<vmem>>, %arg7: memref<1x128xf32, #tpu.memory_space<vmem>>, %arg8: memref<8x128xf32, #tpu.memory_space<vmem>>, %arg9: memref<3x8x8xf32, #tpu.memory_space<vmem>>) attributes {dimension_semantics = [#tpu.dimension_semantics<parallel>], iteration_bounds = array<i64: 2>, scalar_prefetch = 0 : i64, scratch_operands = 0 : i64, tpu.core_type = #tpu.core_type<tc>, window_params = [{transform_indices = @transform_0, window_bounds = array<i64: 8, 8, 128>}, {pipeline_mode = #tpu.pipeline_mode<synchronous>, transform_indices = @transform_1, window_bounds = array<i64: 128, 128>}, {pipeline_mode = #tpu.pipeline_mode<synchronous>, transform_indices = @transform_2, window_bounds = array<i64: 1, 128>}, {pipeline_mode = #tpu.pipeline_mode<synchronous>, transform_indices = @transform_3, window_bounds = array<i64: 3, 128>}, {pipeline_mode = #tpu.pipeline_mode<synchronous>, transform_indices = @transform_4, window_bounds = array<i64: 3, 1>}, {pipeline_mode = #tpu.pipeline_mode<synchronous>, transform_indices = @transform_5, window_bounds = array<i64: 3, 128, 128>}, {pipeline_mode = #tpu.pipeline_mode<synchronous>, transform_indices = @transform_6, window_bounds = array<i64: 1, 128>}, {transform_indices = @transform_7, window_bounds = array<i64: 8, 128>}, {transform_indices = @transform_8, window_bounds = array<i64: 3, 8, 8>}]} {
    %c0 = arith.constant 0 : index
    %c0_0 = arith.constant 0 : index
    %c0_1 = arith.constant 0 : index
    %0 = vector.load %arg1[%c0, %c0_0, %c0_1] : memref<8x8x128xf32, #tpu.memory_space<vmem>>, vector<8x8x128xf32>
    %1 = vector.shape_cast %0 : vector<8x8x128xf32> to vector<64x128xf32>
    %c0_2 = arith.constant 0 : index
    %c0_3 = arith.constant 0 : index
    %2 = vector.load %arg2[%c0_2, %c0_3] : memref<128x128xf32, #tpu.memory_space<vmem>>, vector<128x128xf32>
    %cst = arith.constant dense<0.000000e+00> : vector<64x128xf32>
    %3 = tpu.matmul %1, %2, %cst {dimension_numbers = #tpu.dot_dimension_numbers<[1], [0], [0], [1], [0, 0, 1, 1], [], []>} : vector<64x128xf32>, vector<128x128xf32>, vector<64x128xf32> -> vector<64x128xf32>
    %c0_4 = arith.constant 0 : index
    %c0_5 = arith.constant 0 : index
    %4 = vector.load %arg3[%c0_4, %c0_5] : memref<1x128xf32, #tpu.memory_space<vmem>>, vector<1x128xf32>
    %5 = vector.broadcast %4 : vector<1x128xf32> to vector<64x128xf32>
    %6 = arith.addf %3, %5 : vector<64x128xf32>
    %7 = math.tanh %6 : vector<64x128xf32>
    %8 = vector.shape_cast %7 : vector<64x128xf32> to vector<8x8x128xf32>
    %c0_6 = arith.constant 0 : index
    %c0_7 = arith.constant 0 : index
    %9 = vector.load %arg4[%c0_6, %c0_7] : memref<3x128xf32, #tpu.memory_space<vmem>>, vector<3x128xf32>
    %c0_8 = arith.constant 0 : index
    %c0_9 = arith.constant 0 : index
    %10 = vector.load %arg5[%c0_8, %c0_9] : memref<3x1xf32, #tpu.memory_space<vmem>>, vector<3x1xf32>
    %c0_10 = arith.constant 0 : index
    %c0_11 = arith.constant 0 : index
    %11 = vector.load %arg7[%c0_10, %c0_11] : memref<1x128xf32, #tpu.memory_space<vmem>>, vector<1x128xf32>
    %12 = vector.extract_strided_slice %9 {offsets = [0, 0], sizes = [1, 128], strides = [1, 1]} : vector<3x128xf32> to vector<1x128xf32>
    %13 = vector.shape_cast %12 : vector<1x128xf32> to vector<1x1x128xf32>
    %14 = vector.broadcast %13 : vector<1x1x128xf32> to vector<8x8x128xf32>
    %15 = arith.mulf %8, %14 : vector<8x8x128xf32>
    %cst_12 = arith.constant dense<0.000000e+00> : vector<8x8xf32>
    %16 = vector.multi_reduction <add>, %15, %cst_12 [2] : vector<8x8x128xf32> to vector<8x8xf32>
    %17 = vector.extract_strided_slice %10 {offsets = [0, 0], sizes = [1, 1], strides = [1, 1]} : vector<3x1xf32> to vector<1x1xf32>
    %18 = vector.broadcast %17 : vector<1x1xf32> to vector<8x8xf32>
    %19 = arith.addf %16, %18 : vector<8x8xf32>
    %cst_13 = arith.constant dense<0xFF800000> : vector<8xf32>
    %20 = vector.multi_reduction <maximumf>, %19, %cst_13 [1] : vector<8x8xf32> to vector<8xf32>
    %21 = vector.shape_cast %20 : vector<8xf32> to vector<8x1xf32>
    %22 = vector.broadcast %21 : vector<8x1xf32> to vector<8x8xf32>
    %23 = arith.subf %19, %22 : vector<8x8xf32>
    %24 = math.exp %23 : vector<8x8xf32>
    %cst_14 = arith.constant dense<0.000000e+00> : vector<8xf32>
    %25 = vector.multi_reduction <add>, %24, %cst_14 [1] : vector<8x8xf32> to vector<8xf32>
    %26 = vector.shape_cast %25 : vector<8xf32> to vector<8x1xf32>
    %27 = vector.broadcast %26 : vector<8x1xf32> to vector<8x8xf32>
    %28 = arith.divf %24, %27 : vector<8x8xf32>
    %c0_15 = arith.constant 0 : index
    %c0_16 = arith.constant 0 : index
    %c0_17 = arith.constant 0 : index
    %29 = vector.load %arg9[%c0_15, %c0_16, %c0_17] : memref<3x8x8xf32, #tpu.memory_space<vmem>>, vector<1x8x8xf32>
    %30 = vector.shape_cast %29 : vector<1x8x8xf32> to vector<8x8xf32>
    %31 = vector.shape_cast %28 : vector<8x8xf32> to vector<1x8x8xf32>
    tpu.vector_store %arg9[%c0_15, %c0_16, %c0_17], %31 {strides = array<i32>} : memref<3x8x8xf32, #tpu.memory_space<vmem>>, vector<1x8x8xf32>,
    %32 = vector.shape_cast %28 : vector<8x8xf32> to vector<8x8x1xf32>
    %33 = vector.broadcast %32 : vector<8x8x1xf32> to vector<8x8x128xf32>
    %34 = arith.mulf %0, %33 : vector<8x8x128xf32>
    %cst_18 = arith.constant dense<0.000000e+00> : vector<8x128xf32>
    %35 = vector.multi_reduction <add>, %34, %cst_18 [1] : vector<8x8x128xf32> to vector<8x128xf32>
    %c0_19 = arith.constant 0 : index
    %c0_20 = arith.constant 0 : index
    %c0_21 = arith.constant 0 : index
    %36 = vector.load %arg6[%c0_19, %c0_20, %c0_21] : memref<3x128x128xf32, #tpu.memory_space<vmem>>, vector<1x128x128xf32>
    %37 = vector.shape_cast %36 : vector<1x128x128xf32> to vector<128x128xf32>
    %cst_22 = arith.constant dense<0.000000e+00> : vector<8x128xf32>
    %38 = tpu.matmul %35, %37, %cst_22 {dimension_numbers = #tpu.dot_dimension_numbers<[1], [0], [0], [1], [0, 0, 1, 1], [], []>} : vector<8x128xf32>, vector<128x128xf32>, vector<8x128xf32> -> vector<8x128xf32>
    %39 = vector.broadcast %11 : vector<1x128xf32> to vector<8x128xf32>
    %40 = arith.addf %39, %38 : vector<8x128xf32>
    %41 = vector.extract_strided_slice %9 {offsets = [1, 0], sizes = [1, 128], strides = [1, 1]} : vector<3x128xf32> to vector<1x128xf32>
    %42 = vector.shape_cast %41 : vector<1x128xf32> to vector<1x1x128xf32>
    %43 = vector.broadcast %42 : vector<1x1x128xf32> to vector<8x8x128xf32>
    %44 = arith.mulf %8, %43 : vector<8x8x128xf32>
    %cst_23 = arith.constant dense<0.000000e+00> : vector<8x8xf32>
    %45 = vector.multi_reduction <add>, %44, %cst_23 [2] : vector<8x8x128xf32> to vector<8x8xf32>
    %46 = vector.extract_strided_slice %10 {offsets = [1, 0], sizes = [1, 1], strides = [1, 1]} : vector<3x1xf32> to vector<1x1xf32>
    %47 = vector.broadcast %46 : vector<1x1xf32> to vector<8x8xf32>
    %48 = arith.addf %45, %47 : vector<8x8xf32>
    %cst_24 = arith.constant dense<0xFF800000> : vector<8xf32>
    %49 = vector.multi_reduction <maximumf>, %48, %cst_24 [1] : vector<8x8xf32> to vector<8xf32>
    %50 = vector.shape_cast %49 : vector<8xf32> to vector<8x1xf32>
    %51 = vector.broadcast %50 : vector<8x1xf32> to vector<8x8xf32>
    %52 = arith.subf %48, %51 : vector<8x8xf32>
    %53 = math.exp %52 : vector<8x8xf32>
    %cst_25 = arith.constant dense<0.000000e+00> : vector<8xf32>
    %54 = vector.multi_reduction <add>, %53, %cst_25 [1] : vector<8x8xf32> to vector<8xf32>
    %55 = vector.shape_cast %54 : vector<8xf32> to vector<8x1xf32>
    %56 = vector.broadcast %55 : vector<8x1xf32> to vector<8x8xf32>
    %57 = arith.divf %53, %56 : vector<8x8xf32>
    %c1 = arith.constant 1 : index
    %c0_26 = arith.constant 0 : index
    %c0_27 = arith.constant 0 : index
    %58 = vector.load %arg9[%c1, %c0_26, %c0_27] : memref<3x8x8xf32, #tpu.memory_space<vmem>>, vector<1x8x8xf32>
    %59 = vector.shape_cast %58 : vector<1x8x8xf32> to vector<8x8xf32>
    %60 = vector.shape_cast %57 : vector<8x8xf32> to vector<1x8x8xf32>
    tpu.vector_store %arg9[%c1, %c0_26, %c0_27], %60 {strides = array<i32>} : memref<3x8x8xf32, #tpu.memory_space<vmem>>, vector<1x8x8xf32>,
    %61 = vector.shape_cast %57 : vector<8x8xf32> to vector<8x8x1xf32>
    %62 = vector.broadcast %61 : vector<8x8x1xf32> to vector<8x8x128xf32>
    %63 = arith.mulf %0, %62 : vector<8x8x128xf32>
    %cst_28 = arith.constant dense<0.000000e+00> : vector<8x128xf32>
    %64 = vector.multi_reduction <add>, %63, %cst_28 [1] : vector<8x8x128xf32> to vector<8x128xf32>
    %c1_29 = arith.constant 1 : index
    %c0_30 = arith.constant 0 : index
    %c0_31 = arith.constant 0 : index
    %65 = vector.load %arg6[%c1_29, %c0_30, %c0_31] : memref<3x128x128xf32, #tpu.memory_space<vmem>>, vector<1x128x128xf32>
    %66 = vector.shape_cast %65 : vector<1x128x128xf32> to vector<128x128xf32>
    %cst_32 = arith.constant dense<0.000000e+00> : vector<8x128xf32>
    %67 = tpu.matmul %64, %66, %cst_32 {dimension_numbers = #tpu.dot_dimension_numbers<[1], [0], [0], [1], [0, 0, 1, 1], [], []>} : vector<8x128xf32>, vector<128x128xf32>, vector<8x128xf32> -> vector<8x128xf32>
    %68 = arith.addf %40, %67 : vector<8x128xf32>
    %69 = vector.extract_strided_slice %9 {offsets = [2, 0], sizes = [1, 128], strides = [1, 1]} : vector<3x128xf32> to vector<1x128xf32>
    %70 = vector.shape_cast %69 : vector<1x128xf32> to vector<1x1x128xf32>
    %71 = vector.broadcast %70 : vector<1x1x128xf32> to vector<8x8x128xf32>
    %72 = arith.mulf %8, %71 : vector<8x8x128xf32>
    %cst_33 = arith.constant dense<0.000000e+00> : vector<8x8xf32>
    %73 = vector.multi_reduction <add>, %72, %cst_33 [2] : vector<8x8x128xf32> to vector<8x8xf32>
    %74 = vector.extract_strided_slice %10 {offsets = [2, 0], sizes = [1, 1], strides = [1, 1]} : vector<3x1xf32> to vector<1x1xf32>
    %75 = vector.broadcast %74 : vector<1x1xf32> to vector<8x8xf32>
    %76 = arith.addf %73, %75 : vector<8x8xf32>
    %cst_34 = arith.constant dense<0xFF800000> : vector<8xf32>
    %77 = vector.multi_reduction <maximumf>, %76, %cst_34 [1] : vector<8x8xf32> to vector<8xf32>
    %78 = vector.shape_cast %77 : vector<8xf32> to vector<8x1xf32>
    %79 = vector.broadcast %78 : vector<8x1xf32> to vector<8x8xf32>
    %80 = arith.subf %76, %79 : vector<8x8xf32>
    %81 = math.exp %80 : vector<8x8xf32>
    %cst_35 = arith.constant dense<0.000000e+00> : vector<8xf32>
    %82 = vector.multi_reduction <add>, %81, %cst_35 [1] : vector<8x8xf32> to vector<8xf32>
    %83 = vector.shape_cast %82 : vector<8xf32> to vector<8x1xf32>
    %84 = vector.broadcast %83 : vector<8x1xf32> to vector<8x8xf32>
    %85 = arith.divf %81, %84 : vector<8x8xf32>
    %c2 = arith.constant 2 : index
    %c0_36 = arith.constant 0 : index
    %c0_37 = arith.constant 0 : index
    %86 = vector.load %arg9[%c2, %c0_36, %c0_37] : memref<3x8x8xf32, #tpu.memory_space<vmem>>, vector<1x8x8xf32>
    %87 = vector.shape_cast %86 : vector<1x8x8xf32> to vector<8x8xf32>
    %88 = vector.shape_cast %85 : vector<8x8xf32> to vector<1x8x8xf32>
    tpu.vector_store %arg9[%c2, %c0_36, %c0_37], %88 {strides = array<i32>} : memref<3x8x8xf32, #tpu.memory_space<vmem>>, vector<1x8x8xf32>,
    %89 = vector.shape_cast %85 : vector<8x8xf32> to vector<8x8x1xf32>
    %90 = vector.broadcast %89 : vector<8x8x1xf32> to vector<8x8x128xf32>
    %91 = arith.mulf %0, %90 : vector<8x8x128xf32>
    %cst_38 = arith.constant dense<0.000000e+00> : vector<8x128xf32>
    %92 = vector.multi_reduction <add>, %91, %cst_38 [1] : vector<8x8x128xf32> to vector<8x128xf32>
    %c2_39 = arith.constant 2 : index
    %c0_40 = arith.constant 0 : index
    %c0_41 = arith.constant 0 : index
    %93 = vector.load %arg6[%c2_39, %c0_40, %c0_41] : memref<3x128x128xf32, #tpu.memory_space<vmem>>, vector<1x128x128xf32>
    %94 = vector.shape_cast %93 : vector<1x128x128xf32> to vector<128x128xf32>
    %cst_42 = arith.constant dense<0.000000e+00> : vector<8x128xf32>
    %95 = tpu.matmul %92, %94, %cst_42 {dimension_numbers = #tpu.dot_dimension_numbers<[1], [0], [0], [1], [0, 0, 1, 1], [], []>} : vector<8x128xf32>, vector<128x128xf32>, vector<8x128xf32> -> vector<8x128xf32>
    %96 = arith.addf %68, %95 : vector<8x128xf32>
    %cst_43 = arith.constant dense<0xFF800000> : vector<8xf32>
    %97 = vector.multi_reduction <maximumf>, %96, %cst_43 [1] : vector<8x128xf32> to vector<8xf32>
    %98 = vector.shape_cast %97 : vector<8xf32> to vector<8x1xf32>
    %99 = vector.broadcast %98 : vector<8x1xf32> to vector<8x128xf32>
    %100 = arith.subf %96, %99 : vector<8x128xf32>
    %101 = math.exp %100 : vector<8x128xf32>
    %cst_44 = arith.constant dense<0.000000e+00> : vector<8xf32>
    %102 = vector.multi_reduction <add>, %101, %cst_44 [1] : vector<8x128xf32> to vector<8xf32>
    %103 = vector.shape_cast %102 : vector<8xf32> to vector<8x1xf32>
    %104 = math.log %103 : vector<8x1xf32>
    %105 = arith.addf %104, %98 : vector<8x1xf32>
    %106 = vector.broadcast %105 : vector<8x1xf32> to vector<8x128xf32>
    %107 = arith.subf %96, %106 : vector<8x128xf32>
    %c0_45 = arith.constant 0 : index
    %c0_46 = arith.constant 0 : index
    %108 = vector.load %arg8[%c0_45, %c0_46] : memref<8x128xf32, #tpu.memory_space<vmem>>, vector<8x128xf32>
    tpu.vector_store %arg8[%c0_45, %c0_46], %107 {strides = array<i32>} : memref<8x128xf32, #tpu.memory_space<vmem>>, vector<8x128xf32>,
    return
  }
  func.func @transform_0(%arg0: i32) -> (i32, i32, i32) {
    %c0_i32 = arith.constant 0 : i32
    %c0_i32_0 = arith.constant 0 : i32
    %c0_i32_1 = arith.constant 0 : i32
    return %arg0, %c0_i32, %c0_i32_0 : i32, i32, i32
  }
  func.func @transform_1(%arg0: i32) -> (i32, i32) {
    %c0_i32 = arith.constant 0 : i32
    %c0_i32_0 = arith.constant 0 : i32
    %c0_i32_1 = arith.constant 0 : i32
    return %c0_i32, %c0_i32_0 : i32, i32
  }
  func.func @transform_2(%arg0: i32) -> (i32, i32) {
    %c0_i32 = arith.constant 0 : i32
    %c0_i32_0 = arith.constant 0 : i32
    %c0_i32_1 = arith.constant 0 : i32
    return %c0_i32, %c0_i32_0 : i32, i32
  }
  func.func @transform_3(%arg0: i32) -> (i32, i32) {
    %c0_i32 = arith.constant 0 : i32
    %c0_i32_0 = arith.constant 0 : i32
    %c0_i32_1 = arith.constant 0 : i32
    return %c0_i32, %c0_i32_0 : i32, i32
  }
  func.func @transform_4(%arg0: i32) -> (i32, i32) {
    %c0_i32 = arith.constant 0 : i32
    %c0_i32_0 = arith.constant 0 : i32
    %c0_i32_1 = arith.constant 0 : i32
    return %c0_i32, %c0_i32_0 : i32, i32
  }
  func.func @transform_5(%arg0: i32) -> (i32, i32, i32) {
    %c0_i32 = arith.constant 0 : i32
    %c0_i32_0 = arith.constant 0 : i32
    %c0_i32_1 = arith.constant 0 : i32
    %c0_i32_2 = arith.constant 0 : i32
    return %c0_i32, %c0_i32_0, %c0_i32_1 : i32, i32, i32
  }
  func.func @transform_6(%arg0: i32) -> (i32, i32) {
    %c0_i32 = arith.constant 0 : i32
    %c0_i32_0 = arith.constant 0 : i32
    %c0_i32_1 = arith.constant 0 : i32
    return %c0_i32, %c0_i32_0 : i32, i32
  }
  func.func @transform_7(%arg0: i32) -> (i32, i32) {
    %c0_i32 = arith.constant 0 : i32
    %c0_i32_0 = arith.constant 0 : i32
    return %arg0, %c0_i32 : i32, i32
  }
  func.func @transform_8(%arg0: i32) -> (i32, i32, i32) {
    %c0_i32 = arith.constant 0 : i32
    %c0_i32_0 = arith.constant 0 : i32
    %c0_i32_1 = arith.constant 0 : i32
    return %c0_i32, %arg0, %c0_i32_0 : i32, i32, i32
  }
}

module attributes {stable_mosaic.version = 11 : i64} {
  func.func @_self_attn_classifier_kernel(%arg0: i32, %arg1: memref<8x8x128xf32, #tpu.memory_space<vmem>>, %arg2: memref<128x128xf32, #tpu.memory_space<vmem>>, %arg3: memref<1x128xf32, #tpu.memory_space<vmem>>, %arg4: memref<3x128xf32, #tpu.memory_space<vmem>>, %arg5: memref<3x1xf32, #tpu.memory_space<vmem>>, %arg6: memref<3x128x128xf32, #tpu.memory_space<vmem>>, %arg7: memref<1x128xf32, #tpu.memory_space<vmem>>, %arg8: memref<8x128xf32, #tpu.memory_space<vmem>>, %arg9: memref<3x8x8xf32, #tpu.memory_space<vmem>>) attributes {dimension_semantics = [#tpu.dimension_semantics<parallel>], iteration_bounds = array<i64: 2>, scalar_prefetch = 0 : i64, scratch_operands = 0 : i64, tpu.core_type = #tpu.core_type<tc>, window_params = [{transform_indices = @transform_0, window_bounds = array<i64: 8, 8, 128>}, {pipeline_mode = #tpu.pipeline_mode<synchronous>, transform_indices = @transform_1, window_bounds = array<i64: 128, 128>}, {pipeline_mode = #tpu.pipeline_mode<synchronous>, transform_indices = @transform_2, window_bounds = array<i64: 1, 128>}, {pipeline_mode = #tpu.pipeline_mode<synchronous>, transform_indices = @transform_3, window_bounds = array<i64: 3, 128>}, {pipeline_mode = #tpu.pipeline_mode<synchronous>, transform_indices = @transform_4, window_bounds = array<i64: 3, 1>}, {pipeline_mode = #tpu.pipeline_mode<synchronous>, transform_indices = @transform_5, window_bounds = array<i64: 3, 128, 128>}, {pipeline_mode = #tpu.pipeline_mode<synchronous>, transform_indices = @transform_6, window_bounds = array<i64: 1, 128>}, {transform_indices = @transform_7, window_bounds = array<i64: 8, 128>}, {transform_indices = @transform_8, window_bounds = array<i64: 3, 8, 8>}]} {
    %c0 = arith.constant 0 : index
    %c0_0 = arith.constant 0 : index
    %c0_1 = arith.constant 0 : index
    %0 = vector.load %arg1[%c0, %c0_0, %c0_1] : memref<8x8x128xf32, #tpu.memory_space<vmem>>, vector<8x8x128xf32>
    %1 = vector.shape_cast %0 : vector<8x8x128xf32> to vector<64x128xf32>
    %c0_2 = arith.constant 0 : index
    %c0_3 = arith.constant 0 : index
    %2 = vector.load %arg2[%c0_2, %c0_3] : memref<128x128xf32, #tpu.memory_space<vmem>>, vector<128x128xf32>
    %cst = arith.constant dense<0.000000e+00> : vector<64x128xf32>
    %3 = tpu.matmul %1, %2, %cst {dimension_numbers = #tpu.dot_dimension_numbers<[1], [0], [0], [1], [0, 0, 1, 1], [], []>} : vector<64x128xf32>, vector<128x128xf32>, vector<64x128xf32> -> vector<64x128xf32>
    %c0_4 = arith.constant 0 : index
    %c0_5 = arith.constant 0 : index
    %4 = vector.load %arg3[%c0_4, %c0_5] : memref<1x128xf32, #tpu.memory_space<vmem>>, vector<1x128xf32>
    %5 = vector.broadcast %4 : vector<1x128xf32> to vector<64x128xf32>
    %6 = arith.addf %3, %5 : vector<64x128xf32>
    %7 = math.tanh %6 : vector<64x128xf32>
    %8 = vector.shape_cast %7 : vector<64x128xf32> to vector<8x8x128xf32>
    %c0_6 = arith.constant 0 : index
    %c0_7 = arith.constant 0 : index
    %9 = vector.load %arg4[%c0_6, %c0_7] : memref<3x128xf32, #tpu.memory_space<vmem>>, vector<3x128xf32>
    %c0_8 = arith.constant 0 : index
    %c0_9 = arith.constant 0 : index
    %10 = vector.load %arg5[%c0_8, %c0_9] : memref<3x1xf32, #tpu.memory_space<vmem>>, vector<3x1xf32>
    %c0_10 = arith.constant 0 : index
    %c0_11 = arith.constant 0 : index
    %11 = vector.load %arg7[%c0_10, %c0_11] : memref<1x128xf32, #tpu.memory_space<vmem>>, vector<1x128xf32>
    %12 = vector.extract_strided_slice %9 {offsets = [0, 0], sizes = [1, 128], strides = [1, 1]} : vector<3x128xf32> to vector<1x128xf32>
    %13 = vector.shape_cast %12 : vector<1x128xf32> to vector<1x1x128xf32>
    %14 = vector.broadcast %13 : vector<1x1x128xf32> to vector<8x8x128xf32>
    %15 = arith.mulf %8, %14 : vector<8x8x128xf32>
    %cst_12 = arith.constant dense<0.000000e+00> : vector<8x8xf32>
    %16 = vector.multi_reduction <add>, %15, %cst_12 [2] : vector<8x8x128xf32> to vector<8x8xf32>
    %17 = vector.extract_strided_slice %10 {offsets = [0, 0], sizes = [1, 1], strides = [1, 1]} : vector<3x1xf32> to vector<1x1xf32>
    %18 = vector.broadcast %17 : vector<1x1xf32> to vector<8x8xf32>
    %19 = arith.addf %16, %18 : vector<8x8xf32>
    %cst_13 = arith.constant dense<0xFF800000> : vector<8xf32>
    %20 = vector.multi_reduction <maximumf>, %19, %cst_13 [1] : vector<8x8xf32> to vector<8xf32>
    %21 = vector.shape_cast %20 : vector<8xf32> to vector<8x1xf32>
    %22 = vector.broadcast %21 : vector<8x1xf32> to vector<8x8xf32>
    %23 = arith.subf %19, %22 : vector<8x8xf32>
    %24 = math.exp %23 : vector<8x8xf32>
    %cst_14 = arith.constant dense<0.000000e+00> : vector<8xf32>
    %25 = vector.multi_reduction <add>, %24, %cst_14 [1] : vector<8x8xf32> to vector<8xf32>
    %26 = vector.shape_cast %25 : vector<8xf32> to vector<8x1xf32>
    %27 = vector.broadcast %26 : vector<8x1xf32> to vector<8x8xf32>
    %28 = arith.divf %24, %27 : vector<8x8xf32>
    %c0_15 = arith.constant 0 : index
    %c0_16 = arith.constant 0 : index
    %c0_17 = arith.constant 0 : index
    %29 = vector.load %arg9[%c0_15, %c0_16, %c0_17] : memref<3x8x8xf32, #tpu.memory_space<vmem>>, vector<1x8x8xf32>
    %30 = vector.shape_cast %29 : vector<1x8x8xf32> to vector<8x8xf32>
    %31 = vector.shape_cast %28 : vector<8x8xf32> to vector<1x8x8xf32>
    tpu.vector_store %arg9[%c0_15, %c0_16, %c0_17], %31 {strides = array<i32>} : memref<3x8x8xf32, #tpu.memory_space<vmem>>, vector<1x8x8xf32>,
    %32 = vector.shape_cast %28 : vector<8x8xf32> to vector<8x8x1xf32>
    %33 = vector.broadcast %32 : vector<8x8x1xf32> to vector<8x8x128xf32>
    %34 = arith.mulf %0, %33 : vector<8x8x128xf32>
    %cst_18 = arith.constant dense<0.000000e+00> : vector<8x128xf32>
    %35 = vector.multi_reduction <add>, %34, %cst_18 [1] : vector<8x8x128xf32> to vector<8x128xf32>
    %c0_19 = arith.constant 0 : index
    %c0_20 = arith.constant 0 : index
    %c0_21 = arith.constant 0 : index
    %36 = vector.load %arg6[%c0_19, %c0_20, %c0_21] : memref<3x128x128xf32, #tpu.memory_space<vmem>>, vector<1x128x128xf32>
    %37 = vector.shape_cast %36 : vector<1x128x128xf32> to vector<128x128xf32>
    %cst_22 = arith.constant dense<0.000000e+00> : vector<8x128xf32>
    %38 = tpu.matmul %35, %37, %cst_22 {dimension_numbers = #tpu.dot_dimension_numbers<[1], [0], [0], [1], [0, 0, 1, 1], [], []>} : vector<8x128xf32>, vector<128x128xf32>, vector<8x128xf32> -> vector<8x128xf32>
    %39 = vector.broadcast %11 : vector<1x128xf32> to vector<8x128xf32>
    %40 = arith.addf %39, %38 : vector<8x128xf32>
    %41 = vector.extract_strided_slice %9 {offsets = [1, 0], sizes = [1, 128], strides = [1, 1]} : vector<3x128xf32> to vector<1x128xf32>
    %42 = vector.shape_cast %41 : vector<1x128xf32> to vector<1x1x128xf32>
    %43 = vector.broadcast %42 : vector<1x1x128xf32> to vector<8x8x128xf32>
    %44 = arith.mulf %8, %43 : vector<8x8x128xf32>
    %cst_23 = arith.constant dense<0.000000e+00> : vector<8x8xf32>
    %45 = vector.multi_reduction <add>, %44, %cst_23 [2] : vector<8x8x128xf32> to vector<8x8xf32>
    %46 = vector.extract_strided_slice %10 {offsets = [1, 0], sizes = [1, 1], strides = [1, 1]} : vector<3x1xf32> to vector<1x1xf32>
    %47 = vector.broadcast %46 : vector<1x1xf32> to vector<8x8xf32>
    %48 = arith.addf %45, %47 : vector<8x8xf32>
    %cst_24 = arith.constant dense<0xFF800000> : vector<8xf32>
    %49 = vector.multi_reduction <maximumf>, %48, %cst_24 [1] : vector<8x8xf32> to vector<8xf32>
    %50 = vector.shape_cast %49 : vector<8xf32> to vector<8x1xf32>
    %51 = vector.broadcast %50 : vector<8x1xf32> to vector<8x8xf32>
    %52 = arith.subf %48, %51 : vector<8x8xf32>
    %53 = math.exp %52 : vector<8x8xf32>
    %cst_25 = arith.constant dense<0.000000e+00> : vector<8xf32>
    %54 = vector.multi_reduction <add>, %53, %cst_25 [1] : vector<8x8xf32> to vector<8xf32>
    %55 = vector.shape_cast %54 : vector<8xf32> to vector<8x1xf32>
    %56 = vector.broadcast %55 : vector<8x1xf32> to vector<8x8xf32>
    %57 = arith.divf %53, %56 : vector<8x8xf32>
    %c1 = arith.constant 1 : index
    %c0_26 = arith.constant 0 : index
    %c0_27 = arith.constant 0 : index
    %58 = vector.load %arg9[%c1, %c0_26, %c0_27] : memref<3x8x8xf32, #tpu.memory_space<vmem>>, vector<1x8x8xf32>
    %59 = vector.shape_cast %58 : vector<1x8x8xf32> to vector<8x8xf32>
    %60 = vector.shape_cast %57 : vector<8x8xf32> to vector<1x8x8xf32>
    tpu.vector_store %arg9[%c1, %c0_26, %c0_27], %60 {strides = array<i32>} : memref<3x8x8xf32, #tpu.memory_space<vmem>>, vector<1x8x8xf32>,
    %61 = vector.shape_cast %57 : vector<8x8xf32> to vector<8x8x1xf32>
    %62 = vector.broadcast %61 : vector<8x8x1xf32> to vector<8x8x128xf32>
    %63 = arith.mulf %0, %62 : vector<8x8x128xf32>
    %cst_28 = arith.constant dense<0.000000e+00> : vector<8x128xf32>
    %64 = vector.multi_reduction <add>, %63, %cst_28 [1] : vector<8x8x128xf32> to vector<8x128xf32>
    %c1_29 = arith.constant 1 : index
    %c0_30 = arith.constant 0 : index
    %c0_31 = arith.constant 0 : index
    %65 = vector.load %arg6[%c1_29, %c0_30, %c0_31] : memref<3x128x128xf32, #tpu.memory_space<vmem>>, vector<1x128x128xf32>
    %66 = vector.shape_cast %65 : vector<1x128x128xf32> to vector<128x128xf32>
    %cst_32 = arith.constant dense<0.000000e+00> : vector<8x128xf32>
    %67 = tpu.matmul %64, %66, %cst_32 {dimension_numbers = #tpu.dot_dimension_numbers<[1], [0], [0], [1], [0, 0, 1, 1], [], []>} : vector<8x128xf32>, vector<128x128xf32>, vector<8x128xf32> -> vector<8x128xf32>
    %68 = arith.addf %40, %67 : vector<8x128xf32>
    %69 = vector.extract_strided_slice %9 {offsets = [2, 0], sizes = [1, 128], strides = [1, 1]} : vector<3x128xf32> to vector<1x128xf32>
    %70 = vector.shape_cast %69 : vector<1x128xf32> to vector<1x1x128xf32>
    %71 = vector.broadcast %70 : vector<1x1x128xf32> to vector<8x8x128xf32>
    %72 = arith.mulf %8, %71 : vector<8x8x128xf32>
    %cst_33 = arith.constant dense<0.000000e+00> : vector<8x8xf32>
    %73 = vector.multi_reduction <add>, %72, %cst_33 [2] : vector<8x8x128xf32> to vector<8x8xf32>
    %74 = vector.extract_strided_slice %10 {offsets = [2, 0], sizes = [1, 1], strides = [1, 1]} : vector<3x1xf32> to vector<1x1xf32>
    %75 = vector.broadcast %74 : vector<1x1xf32> to vector<8x8xf32>
    %76 = arith.addf %73, %75 : vector<8x8xf32>
    %cst_34 = arith.constant dense<0xFF800000> : vector<8xf32>
    %77 = vector.multi_reduction <maximumf>, %76, %cst_34 [1] : vector<8x8xf32> to vector<8xf32>
    %78 = vector.shape_cast %77 : vector<8xf32> to vector<8x1xf32>
    %79 = vector.broadcast %78 : vector<8x1xf32> to vector<8x8xf32>
    %80 = arith.subf %76, %79 : vector<8x8xf32>
    %81 = math.exp %80 : vector<8x8xf32>
    %cst_35 = arith.constant dense<0.000000e+00> : vector<8xf32>
    %82 = vector.multi_reduction <add>, %81, %cst_35 [1] : vector<8x8xf32> to vector<8xf32>
    %83 = vector.shape_cast %82 : vector<8xf32> to vector<8x1xf32>
    %84 = vector.broadcast %83 : vector<8x1xf32> to vector<8x8xf32>
    %85 = arith.divf %81, %84 : vector<8x8xf32>
    %c2 = arith.constant 2 : index
    %c0_36 = arith.constant 0 : index
    %c0_37 = arith.constant 0 : index
    %86 = vector.load %arg9[%c2, %c0_36, %c0_37] : memref<3x8x8xf32, #tpu.memory_space<vmem>>, vector<1x8x8xf32>
    %87 = vector.shape_cast %86 : vector<1x8x8xf32> to vector<8x8xf32>
    %88 = vector.shape_cast %85 : vector<8x8xf32> to vector<1x8x8xf32>
    tpu.vector_store %arg9[%c2, %c0_36, %c0_37], %88 {strides = array<i32>} : memref<3x8x8xf32, #tpu.memory_space<vmem>>, vector<1x8x8xf32>,
    %89 = vector.shape_cast %85 : vector<8x8xf32> to vector<8x8x1xf32>
    %90 = vector.broadcast %89 : vector<8x8x1xf32> to vector<8x8x128xf32>
    %91 = arith.mulf %0, %90 : vector<8x8x128xf32>
    %cst_38 = arith.constant dense<0.000000e+00> : vector<8x128xf32>
    %92 = vector.multi_reduction <add>, %91, %cst_38 [1] : vector<8x8x128xf32> to vector<8x128xf32>
    %c2_39 = arith.constant 2 : index
    %c0_40 = arith.constant 0 : index
    %c0_41 = arith.constant 0 : index
    %93 = vector.load %arg6[%c2_39, %c0_40, %c0_41] : memref<3x128x128xf32, #tpu.memory_space<vmem>>, vector<1x128x128xf32>
    %94 = vector.shape_cast %93 : vector<1x128x128xf32> to vector<128x128xf32>
    %cst_42 = arith.constant dense<0.000000e+00> : vector<8x128xf32>
    %95 = tpu.matmul %92, %94, %cst_42 {dimension_numbers = #tpu.dot_dimension_numbers<[1], [0], [0], [1], [0, 0, 1, 1], [], []>} : vector<8x128xf32>, vector<128x128xf32>, vector<8x128xf32> -> vector<8x128xf32>
    %96 = arith.addf %68, %95 : vector<8x128xf32>
    %cst_43 = arith.constant dense<0xFF800000> : vector<8xf32>
    %97 = vector.multi_reduction <maximumf>, %96, %cst_43 [1] : vector<8x128xf32> to vector<8xf32>
    %98 = vector.shape_cast %97 : vector<8xf32> to vector<8x1xf32>
    %99 = vector.broadcast %98 : vector<8x1xf32> to vector<8x128xf32>
    %100 = arith.subf %96, %99 : vector<8x128xf32>
    %101 = math.exp %100 : vector<8x128xf32>
    %cst_44 = arith.constant dense<0.000000e+00> : vector<8xf32>
    %102 = vector.multi_reduction <add>, %101, %cst_44 [1] : vector<8x128xf32> to vector<8xf32>
    %103 = vector.shape_cast %102 : vector<8xf32> to vector<8x1xf32>
    %104 = math.log %103 : vector<8x1xf32>
    %105 = arith.addf %104, %98 : vector<8x1xf32>
    %106 = vector.broadcast %105 : vector<8x1xf32> to vector<8x128xf32>
    %107 = arith.subf %96, %106 : vector<8x128xf32>
    %c0_45 = arith.constant 0 : index
    %c0_46 = arith.constant 0 : index
    %108 = vector.load %arg8[%c0_45, %c0_46] : memref<8x128xf32, #tpu.memory_space<vmem>>, vector<8x128xf32>
    tpu.vector_store %arg8[%c0_45, %c0_46], %107 {strides = array<i32>} : memref<8x128xf32, #tpu.memory_space<vmem>>, vector<8x128xf32>,
    return
  }
  func.func @transform_0(%arg0: i32) -> (i32, i32, i32) {
    %c0_i32 = arith.constant 0 : i32
    %c0_i32_0 = arith.constant 0 : i32
    %c0_i32_1 = arith.constant 0 : i32
    return %arg0, %c0_i32, %c0_i32_0 : i32, i32, i32
  }
  func.func @transform_1(%arg0: i32) -> (i32, i32) {
    %c0_i32 = arith.constant 0 : i32
    %c0_i32_0 = arith.constant 0 : i32
    %c0_i32_1 = arith.constant 0 : i32
    return %c0_i32, %c0_i32_0 : i32, i32
  }
  func.func @transform_2(%arg0: i32) -> (i32, i32) {
    %c0_i32 = arith.constant 0 : i32
    %c0_i32_0 = arith.constant 0 : i32
    %c0_i32_1 = arith.constant 0 : i32
    return %c0_i32, %c0_i32_0 : i32, i32
  }
  func.func @transform_3(%arg0: i32) -> (i32, i32) {
    %c0_i32 = arith.constant 0 : i32
    %c0_i32_0 = arith.constant 0 : i32
    %c0_i32_1 = arith.constant 0 : i32
    return %c0_i32, %c0_i32_0 : i32, i32
  }
  func.func @transform_4(%arg0: i32) -> (i32, i32) {
    %c0_i32 = arith.constant 0 : i32
    %c0_i32_0 = arith.constant 0 : i32
    %c0_i32_1 = arith.constant 0 : i32
    return %c0_i32, %c0_i32_0 : i32, i32
  }
  func.func @transform_5(%arg0: i32) -> (i32, i32, i32) {
    %c0_i32 = arith.constant 0 : i32
    %c0_i32_0 = arith.constant 0 : i32
    %c0_i32_1 = arith.constant 0 : i32
    %c0_i32_2 = arith.constant 0 : i32
    return %c0_i32, %c0_i32_0, %c0_i32_1 : i32, i32, i32
  }
  func.func @transform_6(%arg0: i32) -> (i32, i32) {
    %c0_i32 = arith.constant 0 : i32
    %c0_i32_0 = arith.constant 0 : i32
    %c0_i32_1 = arith.constant 0 : i32
    return %c0_i32, %c0_i32_0 : i32, i32
  }
  func.func @transform_7(%arg0: i32) -> (i32, i32) {
    %c0_i32 = arith.constant 0 : i32
    %c0_i32_0 = arith.constant 0 : i32
    return %arg0, %c0_i32 : i32, i32
  }
  func.func @transform_8(%arg0: i32) -> (i32, i32, i32) {
    %c0_i32 = arith.constant 0 : i32
    %c0_i32_0 = arith.constant 0 : i32
    %c0_i32_1 = arith.constant 0 : i32
    return %c0_i32, %arg0, %c0_i32_0 : i32, i32, i32
  }
}

</mosaic_0001>

<bundles_post_ra>
// kernel: tpu_custom_call.1
= control target key start
LH: loop header
LB: loop body
LE: loop exit
PB: predicated region body
PF: predicated region fallthrough
CT: control target
= control target key end

     0   :  { %s3770_s0 = inlined_call_operand.hbm [shape: f32[16,8,128], index: 0, kind: input, shape index: {}]   ;;  %s3771_s1 = inlined_call_operand.hbm [shape: f32[128,128], index: 1, kind: input, shape index: {}]   ;;  %s3772_s2 = inlined_call_operand.vmem [shape: f32[1,128], index: 2, kind: input, shape index: {}]   ;;  %s3773_s3 = inlined_call_operand.vmem [shape: f32[3,128], index: 3, kind: input, shape index: {}]   ;;  %s3774_s4 = inlined_call_operand.vmem [shape: f32[3,1], index: 4, kind: input, shape index: {}]   ;;  %s3775_s5 = inlined_call_operand.hbm [shape: f32[3,128,128], index: 5, kind: input, shape index: {}]   ;;  %s3776_s6 = inlined_call_operand.vmem [shape: f32[1,128], index: 6, kind: input, shape index: {}]   ;;  %s3777_s7 = inlined_call_operand.hbm [shape: f32[16,128], index: 7, kind: output, shape index: {0}]   ;;  %s3778_s8 = inlined_call_operand.vmem [shape: f32[3,16,8], index: 8, kind: output, shape index: {1}]  }
   0x1   :  { %3806 = sst [smem:[#allocation28_spill]] %s3771_s1 }
   0x2   :  { %3807 = sst [smem:[#allocation29_spill]] %s3775_s5 }
   0x3   :  { %14 = vsyncpa [#allocation3], 0 }
   0x4   :  { %16 = vsyncpa [#allocation3 + $0x1], 0 }
   0x5   :  { %17 = vsyncpa [#allocation6], 0 }
   0x6   :  { %18 = vsyncpa [#allocation4], 0 }
   0x7   :  { %20 = vsyncpa [#allocation4 + $0x1], 0  ;;  %s2507_s27 = smov 0   ;;  %s2509_s28 = smov 0  }
   0x8   :  { %s2511_s29 = smov 0   ;;  %s2513_s30 = smov 0  }
   0x9 LB: > { %s2528_s9 = sadd.s32 4294967295, %s2455_s30   ;;  %s2036_s10 = sadd.s32 4294967294, %s2455_s30   ;;  %s2455_s30 = sphi %s2513_s30, %s3908_s30   ;;  %s2451_s29 = sphi %s2511_s29, %s3907_s29   ;;  %s2447_s28 = sphi %s2509_s28, %s3906_s28   ;;  %s2443_s27 = sphi %s2507_s27, %s3905_s27  }
   0xa   : > { %p46_p0 = scmp.ne.s32.totalorder %s2447_s28, %s2443_s27  ;;  %p47_p1 = scmp.eq.s32.totalorder %s2528_s9, 0 }
   0xb   : > { %p196_p2 = scmp.eq.s32.totalorder %s2528_s9, 1  ;;  %p202_p3 = scmp.eq.s32.totalorder %s2036_s10, 1 }
   0xc   : > { %p2537_p4 = por %p47_p1, %p46_p0  ;;  %p2037_p5 = scmp.ge.s32.totalorder %s2455_s30, 1 }
   0xd   : > { %p2542_p6 = por %p202_p3, %p46_p0  ;;  %p235_p7 = scmp.lt.s32.totalorder %s2455_s30, 3 }
   0xe   : > { %s3810_s1 = sld [smem:[#allocation28_spill]]  ;;  %s2457_s17 = smov [#allocation5]  }
   0xf   : > { %p2550_p8 = pnand %p2037_p5, %p235_p7  ;;  %s248_s18 = sshll.u32 %s2457_s17, 4  ;;  %s249_s18 = int_to_ptr.vmem [resolvable:$true] %s248_s18 }
  0x10   : > { %s3812_s5 = sld [smem:[#allocation29_spill]]  ;;  %s3779_s22 = smov 128  }
  0x11   : > { %p2108_p9 = pneg %p2550_p8  ;;  %s3780_s23 = smov 8  }
  0x12   : > { %s2460_s24 = smov [#allocation7]   ;;  %s2569_s26 = sadd.s32 1, %s2455_s30  }
  0x13   : > { %p2109_p10 = pnand %p2108_p9, %p47_p1  ;;  %s271_s25 = sshll.u32 %s2460_s24, 4  ;;  %s272_s25 = int_to_ptr.vmem [resolvable:$true] %s271_s25 }
  0x14   : > { %s246_s15 = sshll.u32 %s3810_s1, 4  ;;  %s33_s10 = sadd.s32 1, %s2451_s29  ;;  %s247_s15 = int_to_ptr.hbm [resolvable:$true] %s246_s15 }
  0x15   : > { %2111 = dma.hbm_to_vmem [thread:$0]  (!%p2109_p10), %s247_s15, 2048, %s249_s18, [#allocation6], %s3779_s22, %s3779_s22, %s3780_s23  }
  0x16   : > { %s269_s21 = sshll.u32 %s3812_s5, 4  ;;  %s30_s13 = ssub.s32 %s2455_s30, %s2569_s26  ;;  %s270_s21 = int_to_ptr.hbm [resolvable:$true] %s269_s21 }
  0x17   : > { %2114 = dma.hbm_to_vmem [thread:$0]  (!%p2109_p10), %s270_s21, 6144, %s272_s25, [#allocation6], %s3779_s22, %s3779_s22, %s3780_s23  }
  0x18   : > { %p40_p12 = scmp.ne.s32.totalorder %s2451_s29, %s2447_s28  ;;  %p31_p13 = scmp.eq.s32.totalorder %s30_s13, 0 }
  0x19   : > { %p41_p0 = scmp.eq.s32.totalorder %s2455_s30, 0  ;;  %p2125_p5 = scmp.lt.s32.totalorder %s2455_s30, 2 }
  0x1a   : > { %p2579_p3 = por %p196_p2, %p40_p12  ;;  %s288_s17 = sand.u32 1, %s2451_s29  }
  0x1b   : > { %s2585_s15 = scalar_select %p31_p13, %s2451_s29, %s33_s10  }
  0x1c   : > { %p42_p7 = por %p41_p0, %p40_p12  ;;  %s2041_s18 = sshll.u32 %s288_s17, 6 }
  0x1d   : > { %s2056_s19 = sshll.u32 %s2455_s30, 6  ;;  %s292_s25 = scalar_lea.vmem [#allocation2], %s2041_s18 }
  0x1e   : > { %s297_s24 = scalar_lea.hbm %s3770_s0, %s2056_s19  ;;  %s300_s22 = sshll.u32 %s292_s25, 4  ;;  %s301_s22 = int_to_ptr.vmem [resolvable:$true] %s300_s22 }
  0x1f   : > { %s298_s13 = sshll.u32 %s297_s24, 4  ;;  %p2592_p2 = pnand %p2125_p5, %p42_p7  ;;  %s299_s13 = int_to_ptr.hbm [resolvable:$true] %s298_s13 }
  0x20   : > { %s289_s10 = scalar_lea.sflag [#allocation3], %s288_s17  ;;  %s2355_s1 = sshra.s32 %s299_s13, 4  ;;  %s2356_s1 = int_to_ptr.hbm [resolvable:$true] %s2355_s1 }
  0x21   : > { %s2357_s5 = scalar_lea.hbm %s2356_s1, 64  ;;  %p2359_p10 = pneg %p2592_p2 }
  0x22   : > { %p2358_p9 = scmp.ne.s32.totalorder %s2356_s1, %s2357_s5  ;;  %s2362_s20 = scalar_lea.hbm %s3770_s0, 128 }
  0x23   : > { %p2363_p0 = scmp.lt.s32.totalorder %s2356_s1, %s3770_s0  ;;  %p2364_p5 = scmp.lt.s32.totalorder %s2362_s20, %s2357_s5 }
  0x24   : > { %p2360_p12 = pnand %p2359_p10, %p2358_p9 }
  0x25   : > { %p2365_p7 = por %p2364_p5, %p2363_p0 }
  0x26   : > { %p2361_p13 = pneg %p2360_p12 }
  0x28   : > { %p2366_p11 = pnand %p2365_p7, %p2361_p13 }
  0x2a   : > { %2369 = shalt.err (!%p2366_p11)
}
  0x2b   : > { %s3815_s17 = smov 8   ;;  %s3816_s25 = smov 128  }
  0x2c   : > { %2118 = dma.hbm_to_vmem [thread:$0]  (!%p2592_p2), %s299_s13, 1024, %s301_s22, %s289_s10, %s3816_s25, %s3816_s25, %s3815_s17  }
  0x2d   : > { %312 = sbr.rel (%p2550_p8) target bundleno = 1420 (0x58c), region = 48 }
  0x32   : > { %s2612_s19 = sand.u32 1, %s2447_s28  }
  0x33   : > { %s2045_s1 = sshll.u32 %s2612_s19, 6  ;;  %s315_s5 = scalar_lea.sflag [#allocation3], %s2612_s19 }
  0x34   : > { %s2616_s18 = scalar_lea.vmem [#allocation2], %s2045_s1 }
  0x35   : > { %2430 = dma.done.wait (%p2537_p4), %s315_s5, 1024  }
  0x36   : > { %2432 = vsyncadd (%p2537_p4), %s315_s5, 4294966272 }
  0x37   : > { %2434 = dma.done.wait (%p47_p1), [#allocation6], 8192  }
  0x38   : > { %2436 = vsyncadd (%p47_p1), [#allocation6], 4294959104  ;;  %v390_v0 = vld [vmem:[#allocation5 + $0x78] sm:$0xff]  ;;  %v389_v1 = vld [vmem:[#allocation5 + $0x70] sm:$0xff]  ;;  %vm502_vm0 = vcmask 1041409   ;;  %vm504_vm1 = vcmask 1042434  }
  0x39   : > { %395 = vmatpush.msra.mxu0 %v390_v0  ;;  %2057 = vmatpush.msra.mxu1 %v390_v0  ;;  %v388_v2 = vld [vmem:[#allocation5 + $0x68] sm:$0xff]  ;;  %v387_v3 = vld [vmem:[#allocation5 + $0x60] sm:$0xff]  ;;  %v386_v4 = vld [vmem:[#allocation5 + $0x58] sm:$0xff]  ;;  %vm3801_vm2 = vcmask 1043459   ;;  %vm3797_vm3 = vcmask 1044484   ;;  %vm3789_vm4 = vcmask 1045509  }
  0x3a   : > { %2058 = vmatpush.msra.mxu2 %v390_v0  ;;  %v385_v5 = vld [vmem:[#allocation5 + $0x50] sm:$0xff]  ;;  %v384_v6 = vld [vmem:[#allocation5 + $0x48] sm:$0xff]  ;;  %v383_v7 = vld [vmem:[#allocation5 + $0x40] sm:$0xff]  ;;  %vm3787_vm5 = vcmask 1046534   ;;  %vm3786_vm6 = vcmask 1047559   ;;  %vm3784_vm7 = vcmask 64512  }
  0x3b   : > { %396 = vmatpush.msra.mxu0 %v389_v1  ;;  %2059 = vmatpush.msra.mxu1 %v389_v1  ;;  %v382_v8 = vld [vmem:[#allocation5 + $0x38] sm:$0xff]  ;;  %v381_v9 = vld [vmem:[#allocation5 + $0x30] sm:$0xff]  ;;  %v380_v10 = vld [vmem:[#allocation5 + $0x28] sm:$0xff]  ;;  %s2089_s17 = smul.u32 24, %s2612_s19  ;;  %s2052_s11 = sshll.u32 %s2528_s9, 3 }
  0x3c   : > { %2060 = vmatpush.msra.mxu2 %v389_v1  ;;  %v379_v11 = vld [vmem:[#allocation5 + $0x20] sm:$0xff]  ;;  %v378_v12 = vld [vmem:[#allocation5 + $0x18] sm:$0xff]  ;;  %v377_v13 = vld [vmem:[#allocation5 + $0x10] sm:$0xff]  ;;  %s1868_s23 = scalar_lea.hbm %s3777_s7, %s2052_s11  ;;  %s2405_s5 = scalar_lea.hbm %s3777_s7, 16 }
  0x3d   : > { %397 = vmatpush.msra.mxu0 %v388_v2  ;;  %2061 = vmatpush.msra.mxu1 %v388_v2  ;;  %v376_v14 = vld [vmem:[#allocation5 + $0x8] sm:$0xff]  ;;  %v375_v15 = vld [vmem:[#allocation5] sm:$0xff]  ;;  %v370_v17 = vld [vmem:[%s2616_s18 + $0x18] sm:$0xff]  ;;  %s3636_s25 = scalar_lea.vmem [#allocation9], %s2089_s17 }
  0x3e   : > { %2062 = vmatpush.msra.mxu2 %v388_v2  ;;  %v367_v16 = vld [vmem:[%s2616_s18] sm:$0xff]  ;;  %v374_v18 = vld [vmem:[%s2616_s18 + $0x38] sm:$0xff]  ;;  %v368_v19 = vld [vmem:[%s2616_s18 + $0x8] sm:$0xff] }
  0x3f   : > { %398 = vmatpush.msra.mxu0 %v387_v3  ;;  %2063 = vmatpush.msra.mxu1 %v387_v3  ;;  %v371_v20 = vld [vmem:[%s2616_s18 + $0x20] sm:$0xff]  ;;  %v369_v21 = vld [vmem:[%s2616_s18 + $0x10] sm:$0xff]  ;;  %v372_v22 = vld [vmem:[%s2616_s18 + $0x28] sm:$0xff] }
  0x40   : > { %2064 = vmatpush.msra.mxu2 %v387_v3  ;;  %v373_v23 = vld [vmem:[%s2616_s18 + $0x30] sm:$0xff]  ;;  %v2169_v24 = vld [vmem:[%s3772_s2] ss:$0 sm:$0xff] }
  0x41   : > { %399 = vmatpush.msra.mxu0 %v386_v4  ;;  %2065 = vmatpush.msra.mxu1 %v386_v4  ;;  %v444_v29 = vld [vmem:[%s3773_s3] sm:$0x7] }
  0x42   : > { %2066 = vmatpush.msra.mxu2 %v386_v4  ;;  %v2640_v30 = vperm.slane %v444_v29, 1  ;;  %v2642_v31 = vperm.slane %v444_v29, 2  ;;  %v2647_v42 = vperm.slane %v444_v29, 0  ;;  %v445_v63 = vld [vmem:[%s3774_s4] sm:$0x7] }
  0x43   : > { %400 = vmatpush.msra.mxu0 %v385_v5  ;;  %2067 = vmatpush.msra.mxu1 %v385_v5  ;;  %2090 = vpush %v445_v63  ;;  %v944_v1 = vrot.slane %v445_v63, 1  ;;  %v1405_v2 = vrot.slane %v445_v63, 2 }
  0x44   : > { %2068 = vmatpush.msra.mxu2 %v385_v5 }
  0x45   : > { %401 = vmatpush.msra.mxu0 %v384_v6  ;;  %2069 = vmatpush.msra.mxu1 %v384_v6  ;;  %2092 = vpush %v944_v1 }
  0x46   : > { %2070 = vmatpush.msra.mxu2 %v384_v6  ;;  %2094 = vpush %v1405_v2 }
  0x47   : > { %402 = vmatpush.msra.mxu0 %v383_v7  ;;  %2071 = vmatpush.msra.mxu1 %v383_v7 }
  0x48   : > { %2072 = vmatpush.msra.mxu2 %v383_v7 }
  0x49   : > { %403 = vmatpush.msra.mxu0 %v382_v8  ;;  %2073 = vmatpush.msra.mxu1 %v382_v8 }
  0x4a   : > { %2074 = vmatpush.msra.mxu2 %v382_v8 }
  0x4b   : > { %404 = vmatpush.msra.mxu0 %v381_v9  ;;  %2075 = vmatpush.msra.mxu1 %v381_v9 }
  0x4c   : > { %2076 = vmatpush.msra.mxu2 %v381_v9 }
  0x4d   : > { %405 = vmatpush.msra.mxu0 %v380_v10  ;;  %2077 = vmatpush.msra.mxu1 %v380_v10 }
  0x4e   : > { %2078 = vmatpush.msra.mxu2 %v380_v10 }
  0x4f   : > { %406 = vmatpush.msra.mxu0 %v379_v11  ;;  %2079 = vmatpush.msra.mxu1 %v379_v11 }
  0x50   : > { %2080 = vmatpush.msra.mxu2 %v379_v11 }
  0x51   : > { %407 = vmatpush.msra.mxu0 %v378_v12  ;;  %2081 = vmatpush.msra.mxu1 %v378_v12 }
  0x52   : > { %2082 = vmatpush.msra.mxu2 %v378_v12 }
  0x53   : > { %408 = vmatpush.msra.mxu0 %v377_v13  ;;  %2083 = vmatpush.msra.mxu1 %v377_v13 }
  0x54   : > { %2084 = vmatpush.msra.mxu2 %v377_v13 }
  0x55   : > { %409 = vmatpush.msra.mxu0 %v376_v14  ;;  %2085 = vmatpush.msra.mxu1 %v376_v14 }
  0x56   : > { %2086 = vmatpush.msra.mxu2 %v376_v14 }
  0x57   : > { %410 = vmatpush.msra.mxu0 %v375_v15  ;;  %2087 = vmatpush.msra.mxu1 %v375_v15 }
  0x58   : > { %411 = vmatmul.f32.vlgmr.msra.gmra.mxu0 %v367_v16  ;;  %420 = vmatmul.f32.vlgmr.msra.gmra.mxu1 %v370_v17 }
  0x59   : > { %2088 = vmatpush.msra.mxu2 %v375_v15 }
  0x5a   : > { %432 = vmatmul.f32.vlgmr.msra.gmra.mxu2 %v374_v18 }
  0x60   : > { %414 = vmatmul.f32.gmra.mxu0 %v368_v19  ;;  %423 = vmatmul.f32.gmra.mxu1 %v371_v20 }
  0x68   : > { %417 = vmatmul.f32.gmra.mxu0 %v369_v21  ;;  %426 = vmatmul.f32.gmra.mxu1 %v372_v22 }
  0x70   : > { %429 = vmatmul.f32.gmra.mxu1 %v373_v23 }
  0x74   : > { %s2675_s20 = spop %2090 }
  0x76   : > { %s2093_s21 = spop %2092 }
  0x77   : > { %v946_v29 = vstv %s2093_s21  ;;  %s2095_s24 = spop %2094  ;;  %s1854_s21 = scalar_lea.sflag [#allocation4], %s2612_s19 }
  0xd5   : > { %v412_v25 = vpop.f32.mrf.mxu0  ;;  %v421_v26 = vpop.f32.mrf.mxu1 }
  0xd6   : > { %v413_v27 = vadd.f32 %v2169_v24, %v412_v25  ;;  %v422_v28 = vadd.f32 %v2169_v24, %v421_v26 }
  0xd8   : > { %2171 = vtanh.f32 %v413_v27 }
  0xd9   : > { %2173 = vtanh.f32 %v422_v28  ;;  %v492_v28 = vlaneseq }
  0xdd   : > { %v415_v32 = vpop.f32.mrf.mxu0  ;;  %v433_v33 = vpop.f32.mrf.mxu2 }
  0xde   : > { %v2172_v34 = vpop.eup %2171  ;;  %v434_v35 = vadd.f32 %v2169_v24, %v433_v33  ;;  %v416_v40 = vadd.f32 %v2169_v24, %v415_v32  ;;  %v424_v41 = vpop.f32.mrf.mxu1 }
  0xdf   : > { %v2174_v36 = vpop.eup %2173  ;;  %v1381_v37 = vmul.f32 %v2172_v34, %v2642_v31  ;;  %v920_v38 = vmul.f32 %v2172_v34, %v2640_v30  ;;  %v448_v47 = vmul.f32 %v2172_v34, %v2647_v42  ;;  %v425_v49 = vadd.f32 %v2169_v24, %v424_v41 }
  0xe0   : > { %v923_v39 = vmul.f32 %v2174_v36, %v2640_v30  ;;  %2175 = vtanh.f32 %v434_v35  ;;  %v451_v46 = vmul.f32 %v2174_v36, %v2647_v42  ;;  %v1384_v55 = vmul.f32 %v2174_v36, %v2642_v31 }
  0xe1   : > { %1389 = vadd.xlane.f32.xlu2 %v1381_v37  ;;  %928 = vadd.xlane.f32.xlu0 %v920_v38  ;;  %2177 = vtanh.f32 %v416_v40 }
  0xe2   : > { %934 = vadd.xlane.f32.xlu1 %v923_v39 }
  0xe5   : > { %v418_v43 = vpop.f32.mrf.mxu0 }
  0xe6   : > { %v419_v44 = vadd.f32 %v2169_v24, %v418_v43  ;;  %v2176_v45 = vpop.eup %2175  ;;  %v427_v51 = vpop.f32.mrf.mxu1 }
  0xe7   : > { %v927_v48 = vmul.f32 %v2176_v45, %v2640_v30  ;;  %v2178_v50 = vpop.eup %2177  ;;  %v428_v56 = vadd.f32 %v2169_v24, %v427_v51  ;;  %v455_v9 = vmul.f32 %v2176_v45, %v2647_v42  ;;  %v1388_v13 = vmul.f32 %v2176_v45, %v2642_v31 }
  0xe8   : > { %2179 = vtanh.f32 %v419_v44  ;;  %v921_v54 = vmul.f32 %v2178_v50, %v2640_v30  ;;  %v1382_v60 = vmul.f32 %v2178_v50, %v2642_v31  ;;  %v449_v4 = vmul.f32 %v2178_v50, %v2647_v42 }
  0xe9   : > { %462 = vadd.xlane.f32.xlu0 %v451_v46  ;;  %456 = vadd.xlane.f32.xlu2 %v448_v47  ;;  %2181 = vtanh.f32 %v425_v49  ;;  %v1407_v45 = vstv %s2095_s24 }
  0xea   : > { %942 = vadd.xlane.f32.xlu1 %v927_v48  ;;  %2183 = vtanh.f32 %v428_v56 }
  0xee   : > { %v2180_v52 = vpop.eup %2179  ;;  %v430_v59 = vpop.f32.mrf.mxu1 }
  0xef   : > { %v922_v53 = vmul.f32 %v2180_v52, %v2640_v30  ;;  %v2182_v57 = vpop.eup %2181  ;;  %v1383_v61 = vmul.f32 %v2180_v52, %v2642_v31  ;;  %v431_v62 = vadd.f32 %v2169_v24, %v430_v59  ;;  %v450_v10 = vmul.f32 %v2180_v52, %v2647_v42 }
  0xf0   : > { %v924_v58 = vmul.f32 %v2182_v57, %v2640_v30  ;;  %v2184_v0 = vpop.eup %2183  ;;  %v1385_v5 = vmul.f32 %v2182_v57, %v2642_v31  ;;  %v452_v8 = vmul.f32 %v2182_v57, %v2647_v42 }
  0xf1   : > { %930 = vadd.xlane.f32.xlu0 %v921_v54  ;;  %1395 = vadd.xlane.f32.xlu2 %v1384_v55  ;;  %2185 = vtanh.f32 %v431_v62  ;;  %v925_v3 = vmul.f32 %v2184_v0, %v2640_v30  ;;  %v1386_v11 = vmul.f32 %v2184_v0, %v2642_v31  ;;  %v453_v14 = vmul.f32 %v2184_v0, %v2647_v42 }
  0xf2   : > { %932 = vadd.xlane.f32.xlu1 %v922_v53  ;;  %v474_v54 = vstv %s2675_s20  ;;  %s1872_s20 = sshll.u32 %s1868_s23, 4  ;;  %s1873_s20 = int_to_ptr.hbm [resolvable:$true] %s1872_s20 }
  0xf3   : > { %s2399_s24 = sshra.s32 %s1873_s20, 4  ;;  %s2400_s24 = int_to_ptr.hbm [resolvable:$true] %s2399_s24 }
  0xf4   : > { %s2401_s17 = scalar_lea.hbm %s2400_s24, 8  ;;  %p2406_p11 = scmp.lt.s32.totalorder %s2400_s24, %s3777_s7 }
  0xf5   : > { %p2402_p1 = scmp.ne.s32.totalorder %s2400_s24, %s2401_s17  ;;  %p2407_p2 = scmp.lt.s32.totalorder %s2405_s5, %s2401_s17 }
  0xf7   : > { %v2186_v6 = vpop.eup %2185  ;;  %p2403_p4 = pnand %p2402_p1, %p2579_p3  ;;  %p2408_p9 = por %p2407_p2, %p2406_p11 }
  0xf8   : > { %v926_v7 = vmul.f32 %v2186_v6, %v2640_v30  ;;  %v1387_v12 = vmul.f32 %v2186_v6, %v2642_v31  ;;  %v454_v15 = vmul.f32 %v2186_v6, %v2647_v42  ;;  %v2679_v31 = vand.u32 127, %v492_v28 }
  0xf9   : > { %936 = vadd.xlane.f32.xlu0 %v924_v58  ;;  %1391 = vadd.xlane.f32.xlu2 %v1382_v60  ;;  %p2404_p8 = pneg %p2403_p4 }
  0xfa   : > { %1393 = vadd.xlane.f32.xlu1 %v1383_v61  ;;  %3817 = vst [vmem:[#allocation13_spill] sm:$0xff] %v2679_v31 }
  0xfb   : > { %p2409_p10 = pnand %p2408_p9, %p2404_p8 }
 0x101   : > { %458 = vadd.xlane.f32.xlu0 %v449_v4  ;;  %1397 = vadd.xlane.f32.xlu2 %v1385_v5 }
 0x102   : > { %938 = vadd.xlane.f32.xlu1 %v925_v3 }
 0x109   : > { %464 = vadd.xlane.f32.xlu0 %v452_v8  ;;  %470 = vadd.xlane.f32.xlu2 %v455_v9 }
 0x10a   : > { %940 = vadd.xlane.f32.xlu1 %v926_v7 }
 0x111   : > { %460 = vadd.xlane.f32.xlu0 %v450_v10  ;;  %1399 = vadd.xlane.f32.xlu2 %v1386_v11 }
 0x112   : > { %1401 = vadd.xlane.f32.xlu1 %v1387_v12 }
 0x119   : > { %1403 = vadd.xlane.f32.xlu0 %v1388_v13  ;;  %466 = vadd.xlane.f32.xlu2 %v453_v14 }
 0x11a   : > { %468 = vadd.xlane.f32.xlu1 %v454_v15 }
 0x154   : > { %v1390_v16 = vpop.xlane.xlu2 %1389  ;;  %v929_v17 = vpop.xlane.xlu0 %928 }
 0x155   : > { %v935_v18 = vpop.xlane.xlu1 %934  ;;  %v2681_v32 = vadd.f32 %v946_v29, %v929_v17  ;;  %v2712_v56 = vadd.f32 %v1407_v45, %v1390_v16 }
 0x156   : > { %v2693_v41 = vadd.f32 %v946_v29, %v935_v18 }
 0x157   : > { %v964_v38 = vperm.slane %v2681_v32, %v2679_v31  ;;  %v1425_v2 = vperm.slane %v2712_v56, %v2679_v31 }
 0x158   : > { %v967_v50 = vperm.slane %v2693_v41, %v2679_v31 }
 0x15c   : > { %v2673_v19 = vpop.xlane.xlu0 %462  ;;  %v457_v20 = vpop.xlane.xlu2 %456 }
 0x15d   : > { %v943_v21 = vpop.xlane.xlu1 %942  ;;  %v2730_v3 = vadd.f32 %v474_v54, %v457_v20  ;;  %v2748_v16 = vadd.f32 %v474_v54, %v2673_v19 }
 0x15e   : > { %v2698_v44 = vadd.f32 %v946_v29, %v943_v21 }
 0x15f   : > { %v494_v17 = vperm.slane %v2730_v3, %v2679_v31 }
 0x160   : > { %v971_v57 = vperm.slane %v2698_v44, %v2679_v31 }
 0x164   : > { %v931_v22 = vpop.xlane.xlu0 %930  ;;  %v1396_v23 = vpop.xlane.xlu2 %1395 }
 0x165   : > { %v933_v24 = vpop.xlane.xlu1 %932  ;;  %v2677_v30 = vadd.f32 %v946_v29, %v931_v22  ;;  %v2733_v5 = vadd.f32 %v1407_v45, %v1396_v23 }
 0x166   : > { %v2683_v33 = vadd.f32 %v946_v29, %v933_v24 }
 0x167   : > { %v965_v36 = vperm.slane %v2677_v30, %v2679_v31  ;;  %v1428_v23 = vperm.slane %v2733_v5, %v2679_v31 }
 0x168   : > { %v966_v39 = vperm.slane %v2683_v33, %v2679_v31 }
 0x169   : > { %v972_v42 = vsel %vm502_vm0, %v965_v36, %v964_v38 }
 0x16a   : > { %v973_v46 = vsel %vm504_vm1, %v966_v39, %v972_v42 }
 0x16b   : > { %v974_v58 = vsel %vm3801_vm2, %v967_v50, %v973_v46 }
 0x16c   : > { %v937_v25 = vpop.xlane.xlu0 %936  ;;  %v1392_v26 = vpop.xlane.xlu2 %1391 }
 0x16d   : > { %v1394_v27 = vpop.xlane.xlu1 %1393  ;;  %v2691_v40 = vadd.f32 %v946_v29, %v937_v25  ;;  %v2705_v51 = vadd.f32 %v1407_v45, %v1392_v26 }
 0x16e   : > { %v2717_v59 = vadd.f32 %v1407_v45, %v1394_v27  ;;  %v497_v27 = vperm.slane %v2748_v16, %v2679_v31 }
 0x16f   : > { %v968_v47 = vperm.slane %v2691_v40, %v2679_v31  ;;  %v1426_v62 = vperm.slane %v2705_v51, %v2679_v31 }
 0x170   : > { %v1427_v6 = vperm.slane %v2717_v59, %v2679_v31 }
 0x171   : > { %v975_v60 = vsel %vm3797_vm3, %v968_v47, %v974_v58  ;;  %v1433_v11 = vsel %vm502_vm0, %v1426_v62, %v1425_v2  ;;  %v2461_v2 = vmov 0  }
 0x172   : > { %v1434_v20 = vsel %vm504_vm1, %v1427_v6, %v1433_v11  ;;  %2168 = vset.pattern.permute.xlu2 %v2461_v2  ;;  %2167 = vset.pattern.permute.xlu1 %v2461_v2 }
 0x173   : > { %v1435_v28 = vsel %vm3801_vm2, %v1428_v23, %v1434_v20  ;;  %2166 = vset.pattern.permute.xlu0 %v2461_v2 }
 0x174   : > { %v459_v34 = vpop.xlane.xlu0 %458  ;;  %v1398_v35 = vpop.xlane.xlu2 %1397 }
 0x175   : > { %v939_v37 = vpop.xlane.xlu1 %938  ;;  %v2724_v63 = vadd.f32 %v474_v54, %v459_v34  ;;  %v2737_v7 = vadd.f32 %v1407_v45, %v1398_v35 }
 0x176   : > { %v2696_v43 = vadd.f32 %v946_v29, %v939_v37 }
 0x177   : > { %v495_v12 = vperm.slane %v2724_v63, %v2679_v31  ;;  %v1429_v21 = vperm.slane %v2737_v7, %v2679_v31 }
 0x178   : > { %v969_v52 = vperm.slane %v2696_v43, %v2679_v31 }
 0x179   : > { %v503_v24 = vsel %vm502_vm0, %v495_v12, %v494_v17 }
 0x17a   : > { %v976_v0 = vsel %vm3789_vm4, %v969_v52, %v975_v60 }
 0x17c   : > { %v465_v48 = vpop.xlane.xlu0 %464  ;;  %v471_v49 = vpop.xlane.xlu2 %470 }
 0x17d   : > { %v941_v53 = vpop.xlane.xlu1 %940  ;;  %v2764_v25 = vadd.f32 %v474_v54, %v465_v48  ;;  %v2771_v34 = vadd.f32 %v474_v54, %v471_v49 }
 0x17e   : > { %v2710_v55 = vadd.f32 %v946_v29, %v941_v53  ;;  %v1436_v29 = vsel %vm3797_vm3, %v1429_v21, %v1435_v28 }
 0x17f   : > { %v498_v48 = vperm.slane %v2764_v25, %v2679_v31  ;;  %v501_v58 = vperm.slane %v2771_v34, %v2679_v31 }
 0x180   : > { %v970_v61 = vperm.slane %v2710_v55, %v2679_v31 }
 0x182   : > { %v977_v1 = vsel %vm3787_vm5, %v970_v61, %v976_v0 }
 0x183   : > { %v978_v4 = vsel %vm3786_vm6, %v971_v57, %v977_v1 }
 0x184   : > { %v980_v8 = vsel %vm3784_vm7, %v978_v4, -inf  ;;  %v461_v9 = vpop.xlane.xlu0 %460  ;;  %v1400_v10 = vpop.xlane.xlu2 %1399 }
 0x185   : > { %v1402_v13 = vpop.xlane.xlu1 %1401  ;;  %981 = vmax.xlane.f32.xlu0 %v980_v8  ;;  %v2743_v14 = vadd.f32 %v474_v54, %v461_v9  ;;  %v2745_v15 = vadd.f32 %v1407_v45, %v1400_v10 }
 0x186   : > { %v2757_v22 = vadd.f32 %v1407_v45, %v1402_v13 }
 0x187   : > { %v496_v18 = vperm.slane %v2743_v14, %v2679_v31  ;;  %v1430_v19 = vperm.slane %v2745_v15, %v2679_v31 }
 0x188   : > { %v1431_v35 = vperm.slane %v2757_v22, %v2679_v31 }
 0x189   : > { %v505_v26 = vsel %vm504_vm1, %v496_v18, %v503_v24  ;;  %v1437_v47 = vsel %vm3789_vm4, %v1430_v19, %v1436_v29 }
 0x18a   : > { %v507_v38 = vsel %vm3801_vm2, %v497_v27, %v505_v26 }
 0x18b   : > { %v509_v57 = vsel %vm3797_vm3, %v498_v48, %v507_v38 }
 0x18c   : > { %v1404_v36 = vpop.xlane.xlu0 %1403  ;;  %v467_v37 = vpop.xlane.xlu2 %466 }
 0x18d   : > { %v469_v39 = vpop.xlane.xlu1 %468  ;;  %v2776_v42 = vadd.f32 %v1407_v45, %v1404_v36  ;;  %v2778_v46 = vadd.f32 %v474_v54, %v467_v37  ;;  %v1438_v45 = vsel %vm3787_vm5, %v1431_v35, %v1437_v47 }
 0x18e   : > { %v2783_v50 = vadd.f32 %v474_v54, %v469_v39 }
 0x18f   : > { %v1432_v49 = vperm.slane %v2776_v42, %v2679_v31  ;;  %v499_v52 = vperm.slane %v2778_v46, %v2679_v31 }
 0x190   : > { %v500_v53 = vperm.slane %v2783_v50, %v2679_v31 }
 0x191   : > { %v1439_v60 = vsel %vm3786_vm6, %v1432_v49, %v1438_v45  ;;  %v511_v54 = vsel %vm3789_vm4, %v499_v52, %v509_v57 }
 0x192   : > { %v1441_v61 = vsel %vm3784_vm7, %v1439_v60, -inf  ;;  %v513_v62 = vsel %vm3787_vm5, %v500_v53, %v511_v54 }
 0x193   : > { %1442 = vmax.xlane.f32.xlu1 %v1441_v61  ;;  %v515_v0 = vsel %vm3786_vm6, %v501_v58, %v513_v62 }
 0x194   : > { %v518_v1 = vsel %vm3784_vm7, %v515_v0, -inf }
 0x195   : > { %519 = vmax.xlane.f32.xlu2 %v518_v1 }
 0x1f8   : > { %v2801_v4 = vpop.xlane.xlu0 %981 }
 0x1f9   : > { %v984_v6 = vperm.slane %v2801_v4, 0  ;;  %v985_v8 = vperm.slane %v2801_v4, 1  ;;  %v987_v11 = vperm.slane %v2801_v4, 3  ;;  %v986_v12 = vperm.slane %v2801_v4, 2 }
 0x1fa   : > { %v988_v29 = vperm.slane %v2801_v4, 4  ;;  %v989_v53 = vperm.slane %v2801_v4, 5  ;;  %v990_v1 = vperm.slane %v2801_v4, 6 }
 0x1fb   : > { %v1000_v9 = vsub.f32 %v2681_v32, %v984_v6  ;;  %v1001_v10 = vsub.f32 %v2677_v30, %v985_v8  ;;  %v1003_v18 = vsub.f32 %v2693_v41, %v987_v11  ;;  %v1002_v20 = vsub.f32 %v2683_v33, %v986_v12 }
 0x1fd   : > { %v1008_v13 = vmul.f32 1.442695, %v1000_v9  ;;  %v1010_v17 = vmul.f32 1.442695, %v1001_v10  ;;  %v1014_v21 = vmul.f32 1.442695, %v1003_v18 }
 0x1fe   : > { %v1012_v23 = vmul.f32 1.442695, %v1002_v20 }
 0x1ff   : > { %2187 = vpow2.f32 %v1008_v13 }
 0x200   : > { %2189 = vpow2.f32 %v1010_v17  ;;  %v991_v17 = vperm.slane %v2801_v4, 7 }
 0x201   : > { %2191 = vpow2.f32 %v1014_v21 }
 0x202   : > { %2193 = vpow2.f32 %v1012_v23 }
 0x205   : > { %v2811_v24 = vpop.eup %2187 }
 0x206   : > { %v2813_v19 = vpop.eup %2189  ;;  %1033 = vperm.xlu1 %2167, %v2811_v24   ;;  %v2816_v30 = vpop.xlane.xlu1 %1442 }
 0x207   : > { %1036 = vperm.xlu2 %2168, %v2813_v19   ;;  %v1446_v32 = vperm.slane %v2816_v30, 1  ;;  %v1445_v41 = vperm.slane %v2816_v30, 0  ;;  %v1447_v39 = vperm.slane %v2816_v30, 2  ;;  %v2830_v47 = vpop.eup %2191  ;;  %v1449_v10 = vperm.slane %v2816_v30, 4 }
 0x208   : > { %v2821_v26 = vpop.xlane.xlu2 %519  ;;  %v2832_v49 = vpop.eup %2193 }
 0x209   : > { %v1462_v33 = vsub.f32 %v2705_v51, %v1446_v32  ;;  %v1461_v27 = vsub.f32 %v2712_v56, %v1445_v41  ;;  %v522_v28 = vperm.slane %v2821_v26, 0  ;;  %v523_v38 = vperm.slane %v2821_v26, 1 }
 0x20a   : > { %v1004_v51 = vsub.f32 %v2691_v40, %v988_v29  ;;  %v524_v58 = vperm.slane %v2821_v26, 2  ;;  %v1448_v40 = vperm.slane %v2816_v30, 3  ;;  %v525_v6 = vperm.slane %v2821_v26, 3 }
 0x20b   : > { %v1471_v35 = vmul.f32 1.442695, %v1462_v33  ;;  %v1469_v36 = vmul.f32 1.442695, %v1461_v27  ;;  %v538_v37 = vsub.f32 %v2730_v3, %v522_v28  ;;  %v539_v56 = vsub.f32 %v2724_v63, %v523_v38 }
 0x20c   : > { %v1463_v3 = vsub.f32 %v2717_v59, %v1447_v39  ;;  %v1016_v52 = vmul.f32 1.442695, %v1004_v51  ;;  %v1005_v59 = vsub.f32 %v2696_v43, %v989_v53  ;;  %v540_v63 = vsub.f32 %v2743_v14, %v524_v58 }
 0x20d   : > { %2195 = vpow2.f32 %v1471_v35  ;;  %v546_v48 = vmul.f32 1.442695, %v538_v37  ;;  %v548_v57 = vmul.f32 1.442695, %v539_v56  ;;  %v1464_v62 = vsub.f32 %v2733_v5, %v1448_v40 }
 0x20e   : > { %1042 = vperm.xlu1 %2167, %v2830_v47   ;;  %2197 = vpow2.f32 %v1469_v36  ;;  %v1473_v54 = vmul.f32 1.442695, %v1463_v3  ;;  %v1018_v0 = vmul.f32 1.442695, %v1005_v59  ;;  %v550_v2 = vmul.f32 1.442695, %v540_v63 }
 0x20f   : > { %1039 = vperm.xlu2 %2168, %v2832_v49   ;;  %2199 = vpow2.f32 %v546_v48  ;;  %v1475_v9 = vmul.f32 1.442695, %v1464_v62  ;;  %v1006_v5 = vsub.f32 %v2710_v55, %v990_v1  ;;  %v541_v14 = vsub.f32 %v2748_v16, %v525_v6 }
 0x210   : > { %2201 = vpow2.f32 %v1016_v52  ;;  %v1465_v12 = vsub.f32 %v2737_v7, %v1449_v10  ;;  %v526_v20 = vperm.slane %v2821_v26, 4  ;;  %v1450_v32 = vperm.slane %v2816_v30, 5 }
 0x211   : > { %2203 = vpow2.f32 %v548_v57  ;;  %v1020_v13 = vmul.f32 1.442695, %v1006_v5  ;;  %v552_v18 = vmul.f32 1.442695, %v541_v14  ;;  %v1007_v7 = vsub.f32 %v2698_v44, %v991_v17 }
 0x212   : > { %2205 = vpow2.f32 %v1473_v54  ;;  %v1477_v23 = vmul.f32 1.442695, %v1465_v12  ;;  %v542_v16 = vsub.f32 %v2764_v25, %v526_v20  ;;  %v1466_v4 = vsub.f32 %v2745_v15, %v1450_v32 }
 0x213   : > { %v2840_v45 = vpop.eup %2195  ;;  %2207 = vpow2.f32 %v1018_v0  ;;  %v1022_v33 = vmul.f32 1.442695, %v1007_v7  ;;  %v1452_v27 = vperm.slane %v2816_v30, 7  ;;  %v1451_v29 = vperm.slane %v2816_v30, 6 }
 0x214   : > { %v2843_v60 = vpop.eup %2197  ;;  %2209 = vpow2.f32 %v550_v2  ;;  %v554_v28 = vmul.f32 1.442695, %v542_v16  ;;  %v1479_v36 = vmul.f32 1.442695, %v1466_v4  ;;  %v527_v37 = vperm.slane %v2821_v26, 5 }
 0x215   : > { %v2846_v61 = vpop.eup %2199  ;;  %2211 = vpow2.f32 %v1475_v9  ;;  %v1468_v15 = vsub.f32 %v2776_v42, %v1452_v27  ;;  %v1467_v25 = vsub.f32 %v2757_v22, %v1451_v29  ;;  %v528_v51 = vperm.slane %v2821_v26, 6 }
 0x216   : > { %1497 = vperm.xlu1 %2167, %v2840_v45   ;;  %571 = vperm.xlu0 %2166, %v2846_v61   ;;  %v2856_v8 = vpop.eup %2201  ;;  %2213 = vpow2.f32 %v1020_v13  ;;  %v543_v30 = vsub.f32 %v2778_v46, %v527_v37  ;;  %v529_v52 = vperm.slane %v2821_v26, 7 }
 0x217   : > { %1494 = vperm.xlu2 %2168, %v2843_v60   ;;  %v2859_v43 = vpop.eup %2203  ;;  %2215 = vpow2.f32 %v552_v18  ;;  %v1483_v39 = vmul.f32 1.442695, %v1468_v15  ;;  %v1481_v48 = vmul.f32 1.442695, %v1467_v25  ;;  %v544_v22 = vsub.f32 %v2783_v50, %v528_v51 }
 0x218   : > { %v2861_v11 = vpop.eup %2205  ;;  %2217 = vpow2.f32 %v1477_v23  ;;  %v556_v3 = vmul.f32 1.442695, %v543_v30  ;;  %v545_v46 = vsub.f32 %v2771_v34, %v529_v52 }
 0x219   : > { %v2871_v21 = vpop.eup %2207  ;;  %2219 = vpow2.f32 %v1022_v33  ;;  %v558_v57 = vmul.f32 1.442695, %v544_v22 }
 0x21a   : > { %v2874_v55 = vpop.eup %2209  ;;  %2221 = vpow2.f32 %v554_v28  ;;  %v560_v26 = vmul.f32 1.442695, %v545_v46 }
 0x21b   : > { %v2876_v41 = vpop.eup %2211  ;;  %2223 = vpow2.f32 %v1479_v36 }
 0x21c   : > { %v2886_v35 = vpop.eup %2213  ;;  %2225 = vpow2.f32 %v1483_v39 }
 0x21d   : > { %v2889_v44 = vpop.eup %2215  ;;  %2227 = vpow2.f32 %v1481_v48 }
 0x21e   : > { %574 = vperm.xlu1 %2167, %v2859_v43   ;;  %1045 = vperm.xlu0 %2166, %v2856_v8   ;;  %3818 = vst [vmem:[#allocation14_spill] sm:$0xff] %v2889_v44  ;;  %v2891_v38 = vpop.eup %2217  ;;  %2229 = vpow2.f32 %v556_v3 }
 0x21f   : > { %1500 = vperm.xlu2 %2168, %v2861_v11   ;;  %3819 = vst [vmem:[#allocation15_spill] sm:$0xff] %v2891_v38  ;;  %v2900_v56 = vpop.eup %2219  ;;  %2231 = vpow2.f32 %v558_v57 }
 0x220   : > { %3820 = vst [vmem:[#allocation16_spill] sm:$0xff] %v2900_v56  ;;  %v2903_v53 = vpop.eup %2221  ;;  %2233 = vpow2.f32 %v560_v26 }
 0x221   : > { %3821 = vst [vmem:[#allocation17_spill] sm:$0xff] %v2903_v53  ;;  %v2905_v42 = vpop.eup %2223 }
 0x222   : > { %3822 = vst [vmem:[#allocation18_spill] sm:$0xff] %v2905_v42  ;;  %v2912_v58 = vpop.eup %2225 }
 0x223   : > { %3823 = vst [vmem:[#allocation19_spill] sm:$0xff] %v2912_v58  ;;  %v2914_v54 = vpop.eup %2227 }
 0x224   : > { %3824 = vst [vmem:[#allocation20_spill] sm:$0xff] %v2914_v54  ;;  %v2916_v40 = vpop.eup %2229 }
 0x225   : > { %3825 = vst [vmem:[#allocation21_spill] sm:$0xff] %v2916_v40  ;;  %v2921_v50 = vpop.eup %2231 }
 0x226   : > { %577 = vperm.xlu1 %2167, %v2874_v55   ;;  %1048 = vperm.xlu0 %2166, %v2871_v21   ;;  %3826 = vst [vmem:[#allocation22_spill] sm:$0xff] %v2921_v50  ;;  %v2923_v59 = vpop.eup %2233 }
 0x227   : > { %1503 = vperm.xlu2 %2168, %v2876_v41   ;;  %3827 = vst [vmem:[#allocation23_spill] sm:$0xff] %v2923_v59 }
 0x22e   : > { %580 = vperm.xlu1 %2167, %v2889_v44   ;;  %1051 = vperm.xlu0 %2166, %v2886_v35  }
 0x22f   : > { %1506 = vperm.xlu2 %2168, %v2891_v38  }
 0x236   : > { %583 = vperm.xlu1 %2167, %v2903_v53   ;;  %1054 = vperm.xlu0 %2166, %v2900_v56  }
 0x237   : > { %1509 = vperm.xlu2 %2168, %v2905_v42  }
 0x23e   : > { %1515 = vperm.xlu1 %2167, %v2912_v58   ;;  %1512 = vperm.xlu0 %2166, %v2914_v54  }
 0x23f   : > { %586 = vperm.xlu2 %2168, %v2916_v40  }
 0x246   : > { %589 = vperm.xlu0 %2166, %v2921_v50  }
 0x247   : > { %592 = vperm.xlu2 %2168, %v2923_v59  }
 0x261   : > { %v1037_v34 = vpop.permute.xlu2 %1036 }
 0x262   : > { %v1057_v32 = vperm.slane %v1037_v34, %v2679_v31 }
 0x269   : > { %v1040_v63 = vpop.permute.xlu2 %1039 }
 0x26a   : > { %v1058_v33 = vperm.slane %v1040_v63, %v2679_v31 }
 0x271   : > { %v1495_v0 = vpop.permute.xlu2 %1494 }
 0x272   : > { %v1517_v36 = vperm.slane %v1495_v0, %v2679_v31 }
 0x278   : > { %v1034_v62 = vpop.permute.xlu1 %1033 }
 0x279   : > { %v1501_v2 = vpop.permute.xlu2 %1500  ;;  %v1056_v18 = vperm.slane %v1034_v62, %v2679_v31 }
 0x27a   : > { %v1519_v3 = vperm.slane %v1501_v2, %v2679_v31 }
 0x27b   : > { %v1064_v7 = vsel %vm502_vm0, %v1057_v32, %v1056_v18 }
 0x27c   : > { %v1065_v37 = vsel %vm504_vm1, %v1058_v33, %v1064_v7 }
 0x280   : > { %v1043_v1 = vpop.permute.xlu1 %1042 }
 0x281   : > { %v1504_v10 = vpop.permute.xlu2 %1503  ;;  %v1059_v16 = vperm.slane %v1043_v1, %v2679_v31 }
 0x282   : > { %v1520_v34 = vperm.slane %v1504_v10, %v2679_v31 }
 0x283   : > { %v1066_v25 = vsel %vm3801_vm2, %v1059_v16, %v1065_v37 }
 0x288   : > { %v1498_v6 = vpop.permute.xlu1 %1497  ;;  %v572_v9 = vpop.permute.xlu0 %571 }
 0x289   : > { %v1507_v17 = vpop.permute.xlu2 %1506  ;;  %v1518_v27 = vperm.slane %v1498_v6, %v2679_v31  ;;  %v594_v32 = vperm.slane %v572_v9, %v2679_v31 }
 0x28a   : > { %v1521_v2 = vperm.slane %v1507_v17, %v2679_v31 }
 0x28b   : > { %v1525_v30 = vsel %vm502_vm0, %v1518_v27, %v1517_v36 }
 0x28c   : > { %v1526_v57 = vsel %vm504_vm1, %v1519_v3, %v1525_v30 }
 0x28d   : > { %v1527_v0 = vsel %vm3801_vm2, %v1520_v34, %v1526_v57 }
 0x28e   : > { %v1528_v18 = vsel %vm3797_vm3, %v1521_v2, %v1527_v0 }
 0x290   : > { %v575_v5 = vpop.permute.xlu1 %574  ;;  %v1046_v14 = vpop.permute.xlu0 %1045 }
 0x291   : > { %v1510_v4 = vpop.permute.xlu2 %1509  ;;  %v1060_v28 = vperm.slane %v1046_v14, %v2679_v31  ;;  %v595_v6 = vperm.slane %v575_v5, %v2679_v31 }
 0x292   : > { %v1522_v1 = vperm.slane %v1510_v4, %v2679_v31 }
 0x293   : > { %v1067_v39 = vsel %vm3797_vm3, %v1060_v28, %v1066_v25  ;;  %v602_v33 = vsel %vm502_vm0, %v595_v6, %v594_v32 }
 0x294   : > { %v1529_v7 = vsel %vm3789_vm4, %v1522_v1, %v1528_v18 }
 0x298   : > { %v578_v12 = vpop.permute.xlu1 %577  ;;  %v1049_v13 = vpop.permute.xlu0 %1048 }
 0x299   : > { %v1061_v29 = vperm.slane %v1049_v13, %v2679_v31  ;;  %v587_v62 = vpop.permute.xlu2 %586 }
 0x29a   : > { %v599_v36 = vperm.slane %v587_v62, %v2679_v31 }
 0x29b   : > { %v1068_v52 = vsel %vm3789_vm4, %v1061_v29, %v1067_v39 }
 0x2a0   : > { %v581_v20 = vpop.permute.xlu1 %580  ;;  %v1052_v23 = vpop.permute.xlu0 %1051 }
 0x2a1   : > { %v1062_v15 = vperm.slane %v1052_v23, %v2679_v31  ;;  %v596_v23 = vperm.slane %v578_v12, %v2679_v31  ;;  %v597_v16 = vperm.slane %v581_v20, %v2679_v31  ;;  %v593_v29 = vpop.permute.xlu2 %592 }
 0x2a2   : > { %v601_v25 = vperm.slane %v593_v29, %v2679_v31 }
 0x2a3   : > { %v1069_v46 = vsel %vm3787_vm5, %v1062_v15, %v1068_v52  ;;  %v603_v12 = vsel %vm504_vm1, %v596_v23, %v602_v33 }
 0x2a4   : > { %v604_v9 = vsel %vm3801_vm2, %v597_v16, %v603_v12 }
 0x2a8   : > { %v584_v48 = vpop.permute.xlu1 %583  ;;  %v1055_v51 = vpop.permute.xlu0 %1054 }
 0x2a9   : > { %v1063_v22 = vperm.slane %v1055_v51, %v2679_v31  ;;  %v598_v17 = vperm.slane %v584_v48, %v2679_v31 }
 0x2ab   : > { %v1070_v26 = vsel %vm3786_vm6, %v1063_v22, %v1069_v46  ;;  %v605_v20 = vsel %vm3797_vm3, %v598_v17, %v604_v9 }
 0x2ac   : > { %v1072_v63 = vsel %vm3784_vm7, %v1070_v26, 0.0  ;;  %v606_v30 = vsel %vm3789_vm4, %v599_v36, %v605_v20 }
 0x2ad   : > { %1073 = vadd.xlane.f32.xlu1 %v1072_v63 }
 0x2b0   : > { %v1516_v14 = vpop.permute.xlu1 %1515  ;;  %v1513_v13 = vpop.permute.xlu0 %1512 }
 0x2b1   : > { %v1523_v10 = vperm.slane %v1513_v13, %v2679_v31  ;;  %v1524_v4 = vperm.slane %v1516_v14, %v2679_v31 }
 0x2b3   : > { %v1530_v5 = vsel %vm3787_vm5, %v1523_v10, %v1529_v7 }
 0x2b4   : > { %v1531_v27 = vsel %vm3786_vm6, %v1524_v4, %v1530_v5 }
 0x2b5   : > { %v1533_v28 = vsel %vm3784_vm7, %v1531_v27, 0.0 }
 0x2b6   : > { %1534 = vadd.xlane.f32.xlu0 %v1533_v28 }
 0x2b8   : > { %v590_v37 = vpop.permute.xlu0 %589 }
 0x2b9   : > { %v600_v15 = vperm.slane %v590_v37, %v2679_v31 }
 0x2bb   : > { %v607_v39 = vsel %vm3787_vm5, %v600_v15, %v606_v30 }
 0x2bc   : > { %v608_v48 = vsel %vm3786_vm6, %v601_v25, %v607_v39 }
 0x2bd   : > { %v610_v51 = vsel %vm3784_vm7, %v608_v48, 0.0 }
 0x2be   : > { %611 = vadd.xlane.f32.xlu2 %v610_v51 }
 0x320   : > { %v1074_v3 = vpop.xlane.xlu1 %1073 }
 0x321   : > { %v2975_v52 = vperm.slane %v1074_v3, 0  ;;  %v2977_v22 = vperm.slane %v1074_v3, 1  ;;  %v2979_v46 = vperm.slane %v1074_v3, 2  ;;  %v2981_v57 = vperm.slane %v1074_v3, 3 }
 0x322   : > { %v2984_v26 = vperm.slane %v1074_v3, 4  ;;  %v2988_v63 = vperm.slane %v1074_v3, 5  ;;  %v2992_v0 = vperm.slane %v1074_v3, 6  ;;  %v2995_v1 = vperm.slane %v1074_v3, 7 }
 0x323   : > { %2235 = vrcp.f32 %v2975_v52  ;;  %v1103_v34 = vand.u32 2147483648, %v2975_v52  ;;  %v1133_v62 = vand.u32 2147483648, %v2979_v46  ;;  %v1118_v2 = vand.u32 2147483648, %v2977_v22 }
 0x324   : > { %2237 = vrcp.f32 %v2977_v22  ;;  %v1101_v6 = vand.u32 2147483647, %v2975_v52  ;;  %v1131_v13 = vand.u32 2147483647, %v2979_v46  ;;  %v1116_v32 = vand.u32 2147483647, %v2977_v22 }
 0x325   : > { %2239 = vrcp.f32 %v2979_v46  ;;  %v3000_v14 = vor.u32 1.1754944e-38, %v1103_v34  ;;  %v3006_v10 = vor.u32 1.1754944e-38, %v1133_v62  ;;  %v1146_v7 = vand.u32 2147483647, %v2981_v57 }
 0x326   : > { %2241 = vrcp.f32 %v2981_v57  ;;  %vm1097_vm8 = vweird.f32 %v2975_v52  ;;  %v3025_v12 = vor.u32 1.1754944e-38, %v1118_v2  ;;  %v1148_v28 = vand.u32 2147483648, %v2981_v57 }
 0x327   : > { %2243 = vrcp.f32 %v2984_v26  ;;  %vm1127_vm9 = vweird.f32 %v2979_v46  ;;  %vm1112_vm10 = vweird.f32 %v2977_v22  ;;  %vm3050_vm11 = vcmp.eq.f32.partialorder %v1101_v6, 8.507059e+37 }
 0x328   : > { %2245 = vrcp.f32 %v2988_v63  ;;  %vm3061_vm12 = vcmp.eq.f32.partialorder %v1131_v13, 8.507059e+37  ;;  %vm3065_vm13 = vcmp.eq.f32.partialorder %v1116_v32, 8.507059e+37  ;;  %vm1142_vm7 = vweird.f32 %v2981_v57 }
 0x329   : > { %v3003_v18 = vpop.eup %2235  ;;  %v1535_v23 = vpop.xlane.xlu0 %1534  ;;  %2247 = vrcp.f32 %v2992_v0  ;;  %vm3095_vm4 = vcmp.eq.f32.partialorder %v1146_v7, 8.507059e+37  ;;  %v1149_v40 = vor.u32 1.1754944e-38, %v1148_v28 }
 0x32a   : > { %v3010_v16 = vpop.eup %2237  ;;  %v3013_v4 = vperm.slane %v1535_v23, 0  ;;  %v3015_v17 = vperm.slane %v1535_v23, 1  ;;  %v3017_v5 = vperm.slane %v1535_v23, 2  ;;  %2249 = vrcp.f32 %v2995_v1 }
 0x32b   : > { %v3019_v33 = vpop.eup %2239  ;;  %v3022_v27 = vperm.slane %v1535_v23, 3  ;;  %v3030_v29 = vperm.slane %v1535_v23, 4  ;;  %v1093_v20 = vmul.f32 %v3003_v18, %v2975_v52  ;;  %v3037_v37 = vperm.slane %v1535_v23, 5 }
 0x32c   : > { %v3028_v9 = vpop.eup %2241  ;;  %2251 = vrcp.f32 %v3013_v4  ;;  %v1123_v15 = vmul.f32 %v3019_v33, %v2979_v46  ;;  %v1108_v25 = vmul.f32 %v3010_v16, %v2977_v22  ;;  %v3047_v39 = vperm.slane %v1535_v23, 6 }
 0x32d   : > { %3828 = vst [vmem:[#allocation24_spill] sm:$0xff] %v3037_v37  ;;  %2253 = vrcp.f32 %v3015_v17  ;;  %v3045_v30 = vpop.eup %2243  ;;  %v1094_v48 = vsub.f32 1.0, %v1093_v20  ;;  %v1138_v3 = vmul.f32 %v3028_v9, %v2981_v57  ;;  %v3058_v62 = vperm.slane %v1535_v23, 7 }
 0x32e   : > { %3829 = vst [vmem:[#allocation25_spill] sm:$0xff] %v3047_v39  ;;  %2255 = vrcp.f32 %v3017_v5  ;;  %v3056_v34 = vpop.eup %2245  ;;  %v1124_v2 = vsub.f32 1.0, %v1123_v15  ;;  %v1109_v31 = vsub.f32 1.0, %v1108_v25  ;;  %vm1098_vm14 = vweird.f32 %v3003_v18 }
 0x32f   : > { %3832 = vst [vmem:[#allocation26_spill] sm:$0xff] %v3058_v62  ;;  %2257 = vrcp.f32 %v3022_v27  ;;  %v3069_v20 = vpop.eup %2247  ;;  %v1095_v59 = vmul.f32 %v3003_v18, %v1094_v48  ;;  %vm1128_vm15 = vweird.f32 %v3019_v33  ;;  %v1139_v25 = vsub.f32 1.0, %v1138_v3  ;;  %vm3112_vm3 = vmor %vm1097_vm8, %vm1098_vm14 }
 0x330   : > { %2259 = vrcp.f32 %v3030_v29  ;;  %v3075_v23 = vpop.eup %2249  ;;  %v1125_v32 = vmul.f32 %v3019_v33, %v1124_v2  ;;  %v1110_v15 = vmul.f32 %v3010_v16, %v1109_v31  ;;  %vm1113_vm6 = vweird.f32 %v3010_v16  ;;  %vm3125_vm2 = vmor %vm1127_vm9, %vm1128_vm15 }
 0x331   : > { %3837 = vst [vmem:[#allocation27_spill] sm:$0xff] %v3075_v23  ;;  %2261 = vrcp.f32 %v3037_v37  ;;  %v612_v13 = vpop.xlane.xlu2 %611  ;;  %vm1143_vm5 = vweird.f32 %v3028_v9  ;;  %v1096_v56 = vadd.f32 %v3003_v18, %v1095_v59  ;;  %v1140_v37 = vmul.f32 %v3028_v9, %v1139_v25  ;;  %vm1114_vm8 = vmor %vm1112_vm10, %vm1113_vm6 }
 0x332   : > { %v3081_v50 = vpop.eup %2251  ;;  %2263 = vrcp.f32 %v3047_v39  ;;  %v3084_v48 = vperm.slane %v612_v13, 0  ;;  %v3091_v2 = vperm.slane %v612_v13, 1  ;;  %v3093_v31 = vperm.slane %v612_v13, 2 }
 0x333   : > { %v3088_v58 = vpop.eup %2253  ;;  %2265 = vrcp.f32 %v3058_v62  ;;  %v3101_v53 = vperm.slane %v612_v13, 3  ;;  %v3103_v42 = vperm.slane %v612_v13, 4  ;;  %v3105_v39 = vperm.slane %v612_v13, 5 }
 0x334   : > { %v3099_v54 = vpop.eup %2255  ;;  %v3118_v28 = vperm.slane %v612_v13, 6  ;;  %v1126_v44 = vadd.f32 %v3019_v33, %v1125_v32  ;;  %v1111_v52 = vadd.f32 %v3010_v16, %v1110_v15  ;;  %v3133_v23 = vperm.slane %v612_v13, 7 }
 0x335   : > { %v3116_v62 = vpop.eup %2257  ;;  %2267 = vrcp.f32 %v3084_v48  ;;  %v1100_v32 = vsel %vm3112_vm3, %v3003_v18, %v1096_v56  ;;  %v1554_v46 = vmul.f32 %v3081_v50, %v3013_v4  ;;  %vm1558_vm9 = vweird.f32 %v3013_v4 }
 0x336   : > { %v3131_v38 = vpop.eup %2259  ;;  %2269 = vrcp.f32 %v3091_v2  ;;  %v1105_v13 = vsel %vm3050_vm11, %v3000_v14, %v1100_v32  ;;  %v1130_v56 = vsel %vm3125_vm2, %v3019_v33, %v1126_v44  ;;  %v1115_v22 = vsel %vm1114_vm8, %v3010_v16, %v1111_v52  ;;  %vm1144_vm2 = vmor %vm1142_vm7, %vm1143_vm5 }
 0x337   : > { %v3146_v15 = vpop.eup %2261  ;;  %2271 = vrcp.f32 %v3093_v31  ;;  %v1106_v25 = vmul.f32 %v2811_v24, %v1105_v13  ;;  %v1135_v7 = vsel %vm3061_vm12, %v3006_v10, %v1130_v56  ;;  %v1120_v14 = vsel %vm3065_vm13, %v3025_v12, %v1115_v22 }
 0x338   : > { %v3156_v18 = vpop.eup %2263  ;;  %2273 = vrcp.f32 %v3101_v53  ;;  %v1136_v44 = vmul.f32 %v2832_v49, %v1135_v7  ;;  %v1121_v16 = vmul.f32 %v2813_v19, %v1120_v14  ;;  %v1141_v33 = vadd.f32 %v3028_v9, %v1140_v37 }
 0x339   : > { %v3166_v51 = vpop.eup %2265  ;;  %2275 = vrcp.f32 %v3103_v42  ;;  %1221 = vperm.xlu1 %2167, %v1106_v25   ;;  %v1555_v24 = vsub.f32 1.0, %v1554_v46  ;;  %v1562_v10 = vand.u32 2147483647, %v3013_v4  ;;  %v1564_v12 = vand.u32 2147483648, %v3013_v4 }
 0x33a   : > { %2277 = vrcp.f32 %v3105_v39  ;;  %1227 = vperm.xlu0 %2166, %v1136_v44   ;;  %1224 = vperm.xlu2 %2168, %v1121_v16   ;;  %v1145_v19 = vsel %vm1144_vm2, %v3028_v9, %v1141_v33  ;;  %vm1559_vm3 = vweird.f32 %v3081_v50  ;;  %v1569_v49 = vmul.f32 %v3088_v58, %v3015_v17 }
 0x33b   : > { %v3184_v36 = vpop.eup %2267  ;;  %2279 = vrcp.f32 %v3118_v28  ;;  %v1150_v57 = vsel %vm3095_vm4, %v1149_v40, %v1145_v19  ;;  %v1556_v37 = vmul.f32 %v3081_v50, %v1555_v24  ;;  %vm1573_vm5 = vweird.f32 %v3015_v17  ;;  %vm1560_vm4 = vmor %vm1558_vm9, %vm1559_vm3 }
 0x33c   : > { %vm1157_vm6 = vweird.f32 %v2984_v26  ;;  %v3192_v6 = vpop.eup %2269  ;;  %vm3194_vm7 = vcmp.eq.f32.partialorder %v1562_v10, 8.507059e+37  ;;  %v1565_v59 = vor.u32 1.1754944e-38, %v1564_v12  ;;  %v1570_v52 = vsub.f32 1.0, %v1569_v49 }
 0x33d   : > { %v1577_v32 = vand.u32 2147483647, %v3015_v17  ;;  %v3199_v46 = vpop.eup %2271  ;;  %v1151_v40 = vmul.f32 %v2830_v47, %v1150_v57  ;;  %v1557_v3 = vadd.f32 %v3081_v50, %v1556_v37  ;;  %v1579_v13 = vand.u32 2147483648, %v3015_v17 }
 0x33e   : > { %v1153_v56 = vmul.f32 %v3045_v30, %v2984_v26  ;;  %v3206_v22 = vpop.eup %2273  ;;  %v1571_v25 = vmul.f32 %v3088_v58, %v1570_v52  ;;  %vm1574_vm10 = vweird.f32 %v3088_v58  ;;  %vm1158_vm11 = vweird.f32 %v3045_v30 }
 0x33f   : > { %v1163_v47 = vand.u32 2147483648, %v2984_v26  ;;  %v3216_v7 = vpop.eup %2275  ;;  %v1561_v14 = vsel %vm1560_vm4, %v3081_v50, %v1557_v3  ;;  %vm3219_vm12 = vcmp.eq.f32.partialorder %v1577_v32, 8.507059e+37  ;;  %v1584_v4 = vmul.f32 %v3099_v54, %v3017_v5  ;;  %vm1575_vm14 = vmor %vm1573_vm5, %vm1574_vm10 }
 0x340   : > { %v1154_v16 = vsub.f32 1.0, %v1153_v56  ;;  %v3225_v33 = vpop.eup %2277  ;;  %v1566_v24 = vsel %vm3194_vm7, %v1565_v59, %v1561_v14  ;;  %v1572_v10 = vadd.f32 %v3088_v58, %v1571_v25  ;;  %v1580_v12 = vor.u32 1.1754944e-38, %v1579_v13  ;;  %vm1159_vm8 = vmor %vm1157_vm6, %vm1158_vm11 }
 0x341   : > { %v3848_v19 = vand.u32 2147483647, %v2984_v26  ;;  %v3236_v49 = vpop.eup %2279  ;;  %1230 = vperm.xlu1 %2167, %v1151_v40   ;;  %v1567_v57 = vmul.f32 %v2843_v60, %v1566_v24  ;;  %v1164_v9 = vor.u32 1.1754944e-38, %v1163_v47  ;;  %v1585_v59 = vsub.f32 1.0, %v1584_v4 }
 0x342   : > { %v1155_v37 = vmul.f32 %v3045_v30, %v1154_v16  ;;  %v1576_v52 = vsel %vm1575_vm14, %v3088_v58, %v1572_v10  ;;  %vm1589_vm15 = vweird.f32 %v3099_v54  ;;  %v1594_v32 = vand.u32 2147483648, %v3017_v5 }
 0x343   : > { %vm3232_vm13 = vcmp.eq.f32.partialorder %v3848_v19, 8.507059e+37  ;;  %v631_v40 = vmul.f32 %v3184_v36, %v3084_v48  ;;  %1682 = vperm.xlu0 %2166, %v1567_v57   ;;  %v1581_v60 = vsel %vm3219_vm12, %v1580_v12, %v1576_v52  ;;  %v1586_v3 = vmul.f32 %v3099_v54, %v1585_v59 }
 0x344   : > { %v1156_v17 = vadd.f32 %v3045_v30, %v1155_v37  ;;  %v1592_v13 = vand.u32 2147483647, %v3017_v5  ;;  %v1582_v56 = vmul.f32 %v2840_v45, %v1581_v60  ;;  %vm1588_vm9 = vweird.f32 %v3017_v5 }
 0x345   : > { %v1595_v58 = vor.u32 1.1754944e-38, %v1594_v32  ;;  %v632_v25 = vsub.f32 1.0, %v631_v40  ;;  %v1587_v14 = vadd.f32 %v3099_v54, %v1586_v3  ;;  %vm636_vm2 = vweird.f32 %v3184_v36  ;;  %vm1590_vm3 = vmor %vm1588_vm9, %vm1589_vm15 }
 0x346   : > { %v1160_v47 = vsel %vm1159_vm8, %v3045_v30, %v1156_v17  ;;  %v639_v44 = vand.u32 2147483647, %v3084_v48  ;;  %1685 = vperm.xlu2 %2168, %v1582_v56   ;;  %v641_v5 = vand.u32 2147483648, %v3084_v48  ;;  %v646_v30 = vmul.f32 %v3192_v6, %v3091_v2 }
 0x347   : > { %v1165_v45 = vsel %vm3232_vm13, %v1164_v9, %v1160_v47  ;;  %v633_v26 = vmul.f32 %v3184_v36, %v632_v25  ;;  %v1591_v4 = vsel %vm1590_vm3, %v3099_v54, %v1587_v14  ;;  %vm1593_vm5 = vcmp.eq.f32.partialorder %v1592_v13, 8.507059e+37 }
 0x348   : > { %v1166_v16 = vmul.f32 %v2856_v8, %v1165_v45  ;;  %vm635_vm6 = vweird.f32 %v3084_v48  ;;  %v1596_v24 = vsel %vm1593_vm5, %v1595_v58, %v1591_v4  ;;  %vm640_vm7 = vcmp.eq.f32.partialorder %v639_v44, 8.507059e+37 }
 0x349   : > { %v634_v10 = vadd.f32 %v3184_v36, %v633_v26  ;;  %v647_v12 = vsub.f32 1.0, %v646_v30  ;;  %v1597_v19 = vmul.f32 %v2861_v11, %v1596_v24  ;;  %vm637_vm4 = vmor %vm635_vm6, %vm636_vm2  ;;  %v642_v50 = vor.u32 1.1754944e-38, %v641_v5 }
 0x34a   : > { %1233 = vperm.xlu1 %2167, %v1166_v16   ;;  %v654_v57 = vand.u32 2147483647, %v3091_v2  ;;  %v656_v8 = vand.u32 2147483648, %v3091_v2  ;;  %vm651_vm10 = vweird.f32 %v3192_v6  ;;  %v1168_v37 = vmul.f32 %v3056_v34, %v2988_v63 }
 0x34b   : > { %v638_v54 = vsel %vm637_vm4, %v3184_v36, %v634_v10  ;;  %v648_v48 = vmul.f32 %v3192_v6, %v647_v12  ;;  %2281 = vrcp.f32 %v3133_v23  ;;  %1688 = vperm.xlu0 %2166, %v1597_v19   ;;  %vm650_vm11 = vweird.f32 %v3091_v2 }
 0x34c   : > { %v643_v11 = vsel %vm640_vm7, %v642_v50, %v638_v54  ;;  %vm1172_vm12 = vweird.f32 %v2988_v63  ;;  %vm655_vm13 = vcmp.eq.f32.partialorder %v654_v57, 8.507059e+37  ;;  %v1169_v36 = vsub.f32 1.0, %v1168_v37  ;;  %vm652_vm14 = vmor %vm650_vm11, %vm651_vm10 }
 0x34d   : > { %v644_v9 = vmul.f32 %v2846_v61, %v643_v11  ;;  %v649_v59 = vadd.f32 %v3192_v6, %v648_v48  ;;  %v657_v52 = vor.u32 1.1754944e-38, %v656_v8  ;;  %v1176_v32 = vand.u32 2147483647, %v2988_v63 }
 0x34e   : > { %v1178_v40 = vand.u32 2147483648, %v2988_v63  ;;  %v1599_v60 = vmul.f32 %v3116_v62, %v3022_v27  ;;  %v1170_v17 = vmul.f32 %v3056_v34, %v1169_v36  ;;  %vm1173_vm15 = vweird.f32 %v3056_v34 }
 0x34f   : > { %759 = vperm.xlu2 %2168, %v644_v9   ;;  %v653_v2 = vsel %vm652_vm14, %v3192_v6, %v649_v59  ;;  %v1607_v61 = vand.u32 2147483647, %v3022_v27  ;;  %vm1603_vm8 = vweird.f32 %v3022_v27  ;;  %v1609_v56 = vand.u32 2147483648, %v3022_v27  ;;  %vm1174_vm2 = vmor %vm1172_vm12, %vm1173_vm15 }
 0x350   : > { %v658_v3 = vsel %vm655_vm13, %v657_v52, %v653_v2  ;;  %v1600_v13 = vsub.f32 1.0, %v1599_v60  ;;  %v1171_v25 = vadd.f32 %v3056_v34, %v1170_v17  ;;  %vm1604_vm9 = vweird.f32 %v3116_v62 }
 0x351   : > { %v659_v58 = vmul.f32 %v2859_v43, %v658_v3  ;;  %v661_v6 = vmul.f32 %v3199_v46, %v3093_v31  ;;  %v3306_v47 = vpop.eup %2281  ;;  %vm1177_vm3 = vcmp.eq.f32.partialorder %v1176_v32, 8.507059e+37  ;;  %v1179_v14 = vor.u32 1.1754944e-38, %v1178_v40  ;;  %vm1605_vm7 = vmor %vm1603_vm8, %vm1604_vm9  ;;  %v3853_v3 = vld [vmem:[#allocation27_spill] sm:$0xff] }
 0x352   : > { %v1601_v44 = vmul.f32 %v3116_v62, %v1600_v13  ;;  %vm3311_vm5 = vcmp.eq.f32.partialorder %v1607_v61, 8.507059e+37  ;;  %v1175_v43 = vsel %vm1174_vm2, %v3056_v34, %v1171_v25  ;;  %v1610_v26 = vor.u32 1.1754944e-38, %v1609_v56 }
 0x353   : > { %762 = vperm.xlu1 %2167, %v659_v58   ;;  %v662_v5 = vsub.f32 1.0, %v661_v6  ;;  %v671_v30 = vand.u32 2147483648, %v3093_v31  ;;  %v1180_v16 = vsel %vm1177_vm3, %v1179_v14, %v1175_v43  ;;  %vm665_vm6 = vweird.f32 %v3093_v31  ;;  %v3854_v6 = vld [vmem:[#allocation15_spill] sm:$0xff]  ;;  %v3855_v43 = vld [vmem:[#allocation24_spill] sm:$0xff] }
 0x354   : > { %v1602_v4 = vadd.f32 %v3116_v62, %v1601_v44  ;;  %v1183_v63 = vmul.f32 %v3069_v20, %v2992_v0  ;;  %v1181_v24 = vmul.f32 %v2871_v21, %v1180_v16  ;;  %vm666_vm4 = vweird.f32 %v3199_v46 }
 0x355   : > { %v663_v34 = vmul.f32 %v3199_v46, %v662_v5  ;;  %v669_v10 = vand.u32 2147483647, %v3093_v31  ;;  %v672_v19 = vor.u32 1.1754944e-38, %v671_v30  ;;  %vm1187_vm10 = vweird.f32 %v2992_v0  ;;  %vm667_vm11 = vmor %vm665_vm6, %vm666_vm4 }
 0x356   : > { %v1606_v12 = vsel %vm1605_vm7, %v3116_v62, %v1602_v4  ;;  %v1184_v50 = vsub.f32 1.0, %v1183_v63  ;;  %1236 = vperm.xlu0 %2166, %v1181_v24   ;;  %v1193_v27 = vand.u32 2147483648, %v2992_v0  ;;  %v1614_v8 = vmul.f32 %v3131_v38, %v3030_v29 }
 0x357   : > { %v1611_v21 = vsel %vm3311_vm5, %v1610_v26, %v1606_v12  ;;  %v664_v57 = vadd.f32 %v3199_v46, %v663_v34  ;;  %vm1188_vm12 = vweird.f32 %v3069_v20  ;;  %v1191_v48 = vand.u32 2147483647, %v2992_v0 }
 0x358   : > { %v1612_v54 = vmul.f32 %v2876_v41, %v1611_v21  ;;  %v1185_v62 = vmul.f32 %v3069_v20, %v1184_v50  ;;  %vm670_vm13 = vcmp.eq.f32.partialorder %v669_v10, 8.507059e+37  ;;  %v1194_v11 = vor.u32 1.1754944e-38, %v1193_v27  ;;  %vm1189_vm15 = vmor %vm1187_vm10, %vm1188_vm12  ;;  %v3858_v10 = vld [vmem:[#allocation14_spill] sm:$0xff] }
 0x359   : > { %v668_v37 = vsel %vm667_vm11, %v3199_v46, %v664_v57  ;;  %v1615_v9 = vsub.f32 1.0, %v1614_v8  ;;  %vm1619_vm14 = vweird.f32 %v3131_v38  ;;  %v1624_v41 = vand.u32 2147483648, %v3030_v29 }
 0x35a   : > { %1691 = vperm.xlu2 %2168, %v1612_v54   ;;  %v673_v59 = vsel %vm670_vm13, %v672_v19, %v668_v37  ;;  %v1186_v36 = vadd.f32 %v3069_v20, %v1185_v62  ;;  %v1622_v46 = vand.u32 2147483647, %v3030_v29  ;;  %v676_v32 = vmul.f32 %v3206_v22, %v3101_v53  ;;  %v3859_v62 = vld [vmem:[#allocation16_spill] sm:$0xff] }
 0x35b   : > { %v674_v31 = vmul.f32 %v2874_v55, %v673_v59  ;;  %v1616_v52 = vmul.f32 %v3131_v38, %v1615_v9  ;;  %vm1192_vm8 = vcmp.eq.f32.partialorder %v1191_v48, 8.507059e+37  ;;  %vm1618_vm9 = vweird.f32 %v3030_v29  ;;  %v3860_v9 = vld [vmem:[#allocation25_spill] sm:$0xff] }
 0x35c   : > { %v1190_v40 = vsel %vm1189_vm15, %v3069_v20, %v1186_v36  ;;  %vm680_vm2 = vweird.f32 %v3101_v53  ;;  %v1625_v0 = vor.u32 1.1754944e-38, %v1624_v41  ;;  %v677_v2 = vsub.f32 1.0, %v676_v32  ;;  %vm1620_vm3 = vmor %vm1618_vm9, %vm1619_vm14  ;;  %v3861_v32 = vld [vmem:[#allocation18_spill] sm:$0xff] }
 0x35d   : > { %765 = vperm.xlu1 %2167, %v674_v31   ;;  %v1195_v60 = vsel %vm1192_vm8, %v1194_v11, %v1190_v40  ;;  %v1617_v55 = vadd.f32 %v3131_v38, %v1616_v52  ;;  %v684_v61 = vand.u32 2147483647, %v3101_v53  ;;  %v686_v20 = vand.u32 2147483648, %v3101_v53 }
 0x35e   : > { %v1196_v17 = vmul.f32 %v2886_v35, %v1195_v60  ;;  %v1198_v29 = vmul.f32 %v3853_v3, %v2995_v1  ;;  %vm1623_vm5 = vcmp.eq.f32.partialorder %v1622_v46, 8.507059e+37  ;;  %v678_v56 = vmul.f32 %v3206_v22, %v677_v2 }
 0x35f   : > { %v1621_v13 = vsel %vm1620_vm3, %v3131_v38, %v1617_v55  ;;  %vm681_vm6 = vweird.f32 %v3206_v22  ;;  %vm1202_vm7 = vweird.f32 %v2995_v1  ;;  %v1206_v25 = vand.u32 2147483647, %v2995_v1 }
 0x360   : > { %1239 = vperm.xlu0 %2166, %v1196_v17   ;;  %v1626_v58 = vsel %vm1623_vm5, %v1625_v0, %v1621_v13  ;;  %v1199_v35 = vsub.f32 1.0, %v1198_v29  ;;  %v679_v44 = vadd.f32 %v3206_v22, %v678_v56  ;;  %v1208_v45 = vand.u32 2147483648, %v2995_v1  ;;  %vm682_vm4 = vmor %vm680_vm2, %vm681_vm6  ;;  %v3863_v56 = vld [vmem:[#allocation26_spill] sm:$0xff] }
 0x361   : > { %v1627_v14 = vmul.f32 %v3854_v6, %v1626_v58  ;;  %v1629_v38 = vmul.f32 %v3146_v15, %v3855_v43  ;;  %vm685_vm10 = vcmp.eq.f32.partialorder %v684_v61, 8.507059e+37  ;;  %v687_v26 = vor.u32 1.1754944e-38, %v686_v20  ;;  %v3862_v20 = vld [vmem:[#allocation17_spill] sm:$0xff] }
 0x362   : > { %v1200_v5 = vmul.f32 %v3853_v3, %v1199_v35  ;;  %vm1203_vm11 = vweird.f32 %v3853_v3  ;;  %v683_v30 = vsel %vm682_vm4, %v3206_v22, %v679_v44  ;;  %vm3380_vm12 = vcmp.eq.f32.partialorder %v1206_v25, 8.507059e+37 }
 0x363   : > { %1694 = vperm.xlu2 %2168, %v1627_v14   ;;  %v1630_v4 = vsub.f32 1.0, %v1629_v38  ;;  %vm1634_vm13 = vweird.f32 %v3146_v15  ;;  %v688_v63 = vsel %vm685_vm10, %v687_v26, %v683_v30  ;;  %v1639_v24 = vand.u32 2147483648, %v3855_v43  ;;  %vm1204_vm14 = vmor %vm1202_vm7, %vm1203_vm11  ;;  %v3866_v26 = vld [vmem:[#allocation20_spill] sm:$0xff] }
 0x364   : > { %v1201_v53 = vadd.f32 %v3853_v3, %v1200_v5  ;;  %v691_v34 = vmul.f32 %v3216_v7, %v3103_v42  ;;  %v689_v12 = vmul.f32 %v3858_v10, %v688_v63  ;;  %v1209_v22 = vor.u32 1.1754944e-38, %v1208_v45 }
 0x365   : > { %v1631_v19 = vmul.f32 %v3146_v15, %v1630_v4  ;;  %v1637_v50 = vand.u32 2147483647, %v3855_v43  ;;  %vm1633_vm15 = vweird.f32 %v3855_v43  ;;  %v1640_v57 = vor.u32 1.1754944e-38, %v1639_v24 }
 0x366   : > { %v1205_v21 = vsel %vm1204_vm14, %v3853_v3, %v1201_v53  ;;  %v692_v27 = vsub.f32 1.0, %v691_v34  ;;  %768 = vperm.xlu1 %2167, %v689_v12   ;;  %vm696_vm8 = vweird.f32 %v3216_v7  ;;  %v701_v1 = vand.u32 2147483648, %v3103_v42  ;;  %vm1635_vm9 = vmor %vm1633_vm15, %vm1634_vm13  ;;  %v3867_v12 = vld [vmem:[#allocation21_spill] sm:$0xff] }
 0x367   : > { %v1210_v8 = vsel %vm3380_vm12, %v1209_v22, %v1205_v21  ;;  %v1632_v54 = vadd.f32 %v3146_v15, %v1631_v19  ;;  %v699_v11 = vand.u32 2147483647, %v3103_v42  ;;  %v1644_v59 = vmul.f32 %v3156_v18, %v3860_v9 }
 0x368   : > { %v1211_v48 = vmul.f32 %v3859_v62, %v1210_v8  ;;  %v693_v37 = vmul.f32 %v3216_v7, %v692_v27  ;;  %vm1638_vm2 = vcmp.eq.f32.partialorder %v1637_v50, 8.507059e+37  ;;  %vm695_vm3 = vweird.f32 %v3103_v42  ;;  %v3868_v8 = vld [vmem:[#allocation19_spill] sm:$0xff] }
 0x369   : > { %v1636_v36 = vsel %vm1635_vm9, %v3146_v15, %v1632_v54  ;;  %vm1648_vm5 = vweird.f32 %v3860_v9  ;;  %v702_v52 = vor.u32 1.1754944e-38, %v701_v1  ;;  %v1645_v46 = vsub.f32 1.0, %v1644_v59  ;;  %vm697_vm6 = vmor %vm695_vm3, %vm696_vm8 }
 0x36a   : > { %1242 = vperm.xlu0 %2166, %v1211_v48   ;;  %v1641_v41 = vsel %vm1638_vm2, %v1640_v57, %v1636_v36  ;;  %v694_v31 = vadd.f32 %v3216_v7, %v693_v37  ;;  %v1652_v60 = vand.u32 2147483647, %v3860_v9  ;;  %v1654_v15 = vand.u32 2147483648, %v3860_v9  ;;  %v3869_v9 = vld [vmem:[#allocation22_spill] sm:$0xff] }
 0x36b   : > { %v1642_v40 = vmul.f32 %v3861_v32, %v1641_v41  ;;  %v706_v42 = vmul.f32 %v3225_v33, %v3105_v39  ;;  %vm700_vm7 = vcmp.eq.f32.partialorder %v699_v11, 8.507059e+37  ;;  %v1646_v0 = vmul.f32 %v3156_v18, %v1645_v46 }
 0x36c   : > { %v698_v55 = vsel %vm697_vm6, %v3216_v7, %v694_v31  ;;  %vm1649_vm4 = vweird.f32 %v3156_v18  ;;  %vm710_vm10 = vweird.f32 %v3105_v39  ;;  %v714_v61 = vand.u32 2147483647, %v3105_v39  ;;  %v3870_v31 = vld [vmem:[#allocation23_spill] sm:$0xff] }
 0x36d   : > { %1697 = vperm.xlu2 %2168, %v1642_v40   ;;  %v703_v2 = vsel %vm700_vm7, %v702_v52, %v698_v55  ;;  %v707_v17 = vsub.f32 1.0, %v706_v42  ;;  %v1647_v29 = vadd.f32 %v3156_v18, %v1646_v0  ;;  %v716_v13 = vand.u32 2147483648, %v3105_v39  ;;  %vm1650_vm11 = vmor %vm1648_vm5, %vm1649_vm4 }
 0x36e   : > { %v704_v3 = vmul.f32 %v3862_v20, %v703_v2  ;;  %v1659_v7 = vmul.f32 %v3166_v51, %v3863_v56  ;;  %vm1653_vm12 = vcmp.eq.f32.partialorder %v1652_v60, 8.507059e+37  ;;  %v1655_v58 = vor.u32 1.1754944e-38, %v1654_v15  ;;  %v3487_v15 = vld [vmem:[%s2616_s18 + $0x8] sm:$0xff] }
 0x36f   : > { %v708_v35 = vmul.f32 %v3225_v33, %v707_v17  ;;  %vm711_vm13 = vweird.f32 %v3225_v33  ;;  %v1651_v25 = vsel %vm1650_vm11, %v3156_v18, %v1647_v29  ;;  %vm3434_vm14 = vcmp.eq.f32.partialorder %v714_v61, 8.507059e+37  ;;  %v2288_v17 = vld [vmem:[%s2616_s18] sm:$0xff] }
 0x370   : > { %771 = vperm.xlu1 %2167, %v704_v3   ;;  %v1660_v14 = vsub.f32 1.0, %v1659_v7  ;;  %vm1664_vm15 = vweird.f32 %v3166_v51  ;;  %v1656_v44 = vsel %vm1653_vm12, %v1655_v58, %v1651_v25  ;;  %v1669_v43 = vand.u32 2147483648, %v3863_v56  ;;  %vm712_vm8 = vmor %vm710_vm10, %vm711_vm13 }
 0x371   : > { %v709_v45 = vadd.f32 %v3225_v33, %v708_v35  ;;  %v721_v38 = vmul.f32 %v3236_v49, %v3118_v28  ;;  %v1657_v5 = vmul.f32 %v3866_v26, %v1656_v44  ;;  %v717_v18 = vor.u32 1.1754944e-38, %v716_v13  ;;  %v3502_v13 = vld [vmem:[%s2616_s18 + $0x10] sm:$0xff]  ;;  %v1342_v44 = vld [vmem:[#allocation7 + $0xf8] sm:$0xff] }
 0x372   : > { %v1661_v30 = vmul.f32 %v3166_v51, %v1660_v14  ;;  %v1667_v16 = vand.u32 2147483647, %v3863_v56  ;;  %vm1663_vm9 = vweird.f32 %v3863_v56  ;;  %v1670_v63 = vor.u32 1.1754944e-38, %v1669_v43  ;;  %1359 = vmatpush.msrb.mxu2 %v1342_v44 }
 0x373   : > { %v713_v4 = vsel %vm712_vm8, %v3225_v33, %v709_v45  ;;  %v722_v53 = vsub.f32 1.0, %v721_v38  ;;  %1700 = vperm.xlu0 %2166, %v1657_v5   ;;  %v729_v39 = vand.u32 2147483647, %v3118_v28  ;;  %v731_v10 = vand.u32 2147483648, %v3118_v28  ;;  %vm1665_vm2 = vmor %vm1663_vm9, %vm1664_vm15  ;;  %v1341_v45 = vld [vmem:[#allocation7 + $0xf0] sm:$0xff]  ;;  %v1340_v5 = vld [vmem:[#allocation7 + $0xe8] sm:$0xff] }
 0x374   : > { %v718_v24 = vsel %vm3434_vm14, %v717_v18, %v713_v4  ;;  %v1662_v34 = vadd.f32 %v3166_v51, %v1661_v30  ;;  %vm726_vm3 = vweird.f32 %v3236_v49  ;;  %v736_v19 = vmul.f32 %v3306_v47, %v3133_v23  ;;  %v3512_v30 = vld [vmem:[%s2616_s18 + $0x18] sm:$0xff]  ;;  %1360 = vmatpush.msrb.mxu2 %v1341_v45 }
 0x375   : > { %v719_v22 = vmul.f32 %v3867_v12, %v718_v24  ;;  %v723_v33 = vmul.f32 %v3236_v49, %v722_v53  ;;  %vm1668_vm5 = vcmp.eq.f32.partialorder %v1667_v16, 8.507059e+37  ;;  %vm725_vm6 = vweird.f32 %v3118_v28  ;;  %v1339_v24 = vld [vmem:[#allocation7 + $0xe0] sm:$0xff]  ;;  %v1334_v45 = vld [vmem:[#allocation7 + $0xb8] sm:$0xff] }
 0x376   : > { %v1666_v50 = vsel %vm1665_vm2, %v3166_v51, %v1662_v34  ;;  %v737_v27 = vsub.f32 1.0, %v736_v19  ;;  %vm727_vm7 = vmor %vm725_vm6, %vm726_vm3  ;;  %vm730_vm4 = vcmp.eq.f32.partialorder %v729_v39, 8.507059e+37  ;;  %v732_v1 = vor.u32 1.1754944e-38, %v731_v10  ;;  %1361 = vmatpush.msrb.mxu2 %v1340_v5 }
 0x377   : > { %774 = vperm.xlu2 %2168, %v719_v22   ;;  %v1671_v21 = vsel %vm1668_vm5, %v1670_v63, %v1666_v50  ;;  %v724_v57 = vadd.f32 %v3236_v49, %v723_v33  ;;  %v746_v62 = vand.u32 2147483648, %v3133_v23  ;;  %vm741_vm10 = vweird.f32 %v3306_v47 }
 0x378   : > { %v1672_v54 = vmul.f32 %v3868_v8, %v1671_v21  ;;  %v738_v37 = vmul.f32 %v3306_v47, %v737_v27  ;;  %v744_v51 = vand.u32 2147483647, %v3133_v23  ;;  %vm740_vm11 = vweird.f32 %v3133_v23  ;;  %1362 = vmatpush.msrb.mxu2 %v1339_v24  ;;  %v1338_v27 = vld [vmem:[#allocation7 + $0xd8] sm:$0xff]  ;;  %v1337_v8 = vld [vmem:[#allocation7 + $0xd0] sm:$0xff] }
 0x379   : > { %v728_v48 = vsel %vm727_vm7, %v3236_v49, %v724_v57  ;;  %vm742_vm12 = vmor %vm740_vm11, %vm741_vm10  ;;  %v747_v36 = vor.u32 1.1754944e-38, %v746_v62  ;;  %vm3872_vm14 = vcmask 1043459   ;;  %vm3874_vm8 = vcmask 1044484  }
 0x37a   : > { %1703 = vperm.xlu1 %2167, %v1672_v54   ;;  %v733_v11 = vsel %vm730_vm4, %v732_v1, %v728_v48  ;;  %v739_v59 = vadd.f32 %v3306_v47, %v738_v37  ;;  %vm745_vm13 = vcmp.eq.f32.partialorder %v744_v51, 8.507059e+37  ;;  %v3871_v54 = vld [vmem:[#allocation13_spill] sm:$0xff]  ;;  %1363 = vmatpush.msrb.mxu2 %v1338_v27  ;;  %v1803_v37 = vld [vmem:[#allocation7 + $0x178] sm:$0xff]  ;;  %vm3873_vm15 = vmmov %vm3872_vm14  ;;  %vm3876_vm2 = vcmask 1045509  }
 0x37b   : > { %v734_v28 = vmul.f32 %v3869_v9, %v733_v11  ;;  %v1336_v9 = vld [vmem:[#allocation7 + $0xc8] sm:$0xff]  ;;  %1820 = vmatpush.msra.mxu3 %v1803_v37  ;;  %vm3875_vm9 = vmmov %vm3874_vm8  ;;  %vm3877_vm3 = vcmask 1046534   ;;  %vm3878_vm5 = vcmask 1047559   ;;  %vm3879_vm6 = vcmask 64512  }
 0x37c   : > { %v743_v49 = vsel %vm742_vm12, %v3306_v47, %v739_v59  ;;  %v1802_v59 = vld [vmem:[#allocation7 + $0x170] sm:$0xff]  ;;  %1364 = vmatpush.msrb.mxu2 %v1337_v8  ;;  %vm3880_vm7 = vmmov %vm3876_vm2 }
 0x37d   : > { %777 = vperm.xlu0 %2166, %v734_v28   ;;  %v748_v41 = vsel %vm745_vm13, %v747_v36, %v743_v49  ;;  %v878_v28 = vld [vmem:[#allocation7 + $0x78] sm:$0xff]  ;;  %1821 = vmatpush.msra.mxu3 %v1802_v59  ;;  %vm3881_vm4 = vmmov %vm3872_vm14 }
 0x37e   : > { %v749_v52 = vmul.f32 %v3870_v31, %v748_v41  ;;  %v3530_v41 = vld [vmem:[%s2616_s18 + $0x20] sm:$0xff]  ;;  %895 = vmatpush.msrb.mxu1 %v878_v28  ;;  %1365 = vmatpush.msrb.mxu2 %v1336_v9  ;;  %v1798_v9 = vld [vmem:[#allocation7 + $0x150] sm:$0xff]  ;;  %vm3882_vm10 = vmmov %vm3874_vm8 }
 0x37f   : > { %vm3883_vm11 = vmmov %vm3876_vm2 }
 0x380   : > { %780 = vperm.xlu2 %2168, %v749_v52   ;;  %vm3884_vm12 = vmmov %vm3877_vm3 }
 0x381   : > { %vm3885_vm13 = vmmov %vm3881_vm4 }
 0x394   : > { %v3476_v46 = vpop.permute.xlu2 %1224 }
 0x395   : > { %v1271_v47 = vmul.f32 %v3487_v15, %v3476_v46  ;;  %v1245_v51 = vperm.slane %v3476_v46, %v3871_v54 }
 0x397   : > { %v1284_v0 = vrot.slane %v1271_v47, 4 }
 0x399   : > { %v1285_v3 = vadd.f32 %v1284_v0, %v1271_v47  ;;  %v1801_v47 = vld [vmem:[#allocation7 + $0x168] sm:$0xff] }
 0x39a   : > { %1822 = vmatpush.msra.mxu3 %v1801_v47  ;;  %v1797_v47 = vld [vmem:[#allocation7 + $0x148] sm:$0xff] }
 0x39b   : > { %v1286_v25 = vrot.slane %v1285_v3, 2 }
 0x39d   : > { %v1287_v18 = vadd.f32 %v1286_v25, %v1285_v3  ;;  %v1800_v25 = vld [vmem:[#allocation7 + $0x160] sm:$0xff] }
 0x39e   : > { %1823 = vmatpush.msra.mxu3 %v1800_v25  ;;  %v3582_v25 = vld [vmem:[%s2616_s18 + $0x30] sm:$0xff] }
 0x39f   : > { %v1288_v22 = vrot.slane %v1287_v18, 1 }
 0x3a0   : > { %v3478_v32 = vpop.permute.xlu2 %1685 }
 0x3a1   : > { %v1732_v42 = vmul.f32 %v3487_v15, %v3478_v32  ;;  %v3527_v36 = vadd.f32 %v1288_v22, %v1287_v18 }
 0x3a3   : > { %v1745_v20 = vrot.slane %v1732_v42, 4 }
 0x3a5   : > { %v1746_v58 = vadd.f32 %v1745_v20, %v1732_v42  ;;  %v876_v20 = vld [vmem:[#allocation7 + $0x68] sm:$0xff] }
 0x3a7   : > { %v1747_v26 = vrot.slane %v1746_v58, 2 }
 0x3a9   : > { %v3484_v23 = vpop.permute.xlu2 %759  ;;  %v1748_v12 = vadd.f32 %v1747_v26, %v1746_v58 }
 0x3aa   : > { %v807_v6 = vmul.f32 %v2288_v17, %v3484_v23 }
 0x3ab   : > { %v3480_v40 = vpop.permute.xlu1 %1221  ;;  %v1749_v11 = vrot.slane %v1748_v12, 1 }
 0x3ac   : > { %v3482_v60 = vpop.permute.xlu0 %1227  ;;  %v1270_v61 = vmul.f32 %v2288_v17, %v3480_v40  ;;  %v815_v4 = vrot.slane %v807_v6, 4  ;;  %v1244_v1 = vperm.slane %v3480_v40, %v3871_v54  ;;  %v877_v40 = vld [vmem:[#allocation7 + $0x70] sm:$0xff] }
 0x3ad   : > { %v1272_v56 = vmul.f32 %v3502_v13, %v3482_v60  ;;  %v1246_v42 = vperm.slane %v3482_v60, %v3871_v54  ;;  %896 = vmatpush.msrb.mxu1 %v877_v40  ;;  %v3543_v60 = vadd.f32 %v1749_v11, %v1748_v12  ;;  %v874_v11 = vld [vmem:[#allocation7 + $0x58] sm:$0xff] }
 0x3ae   : > { %v1278_v7 = vrot.slane %v1270_v61, 4  ;;  %v816_v50 = vadd.f32 %v815_v4, %v807_v6  ;;  %v1252_v3 = vsel %vm502_vm0, %v1245_v51, %v1244_v1  ;;  %v1706_v6 = vperm.slane %v3478_v32, %v3871_v54  ;;  %v3554_v4 = vld [vmem:[%s2616_s18 + $0x28] sm:$0xff] }
 0x3af   : > { %v1290_v14 = vrot.slane %v1272_v56, 4  ;;  %897 = vmatpush.msrb.mxu1 %v876_v20 }
 0x3b0   : > { %v1279_v43 = vadd.f32 %v1278_v7, %v1270_v61  ;;  %v817_v46 = vrot.slane %v816_v50, 2  ;;  %v1335_v61 = vld [vmem:[#allocation7 + $0xc0] sm:$0xff] }
 0x3b1   : > { %v1291_v63 = vadd.f32 %v1290_v14, %v1272_v56  ;;  %v782_v14 = vperm.slane %v3484_v23, %v3871_v54  ;;  %1366 = vmatpush.msrb.mxu2 %v1335_v61  ;;  %v866_v23 = vld [vmem:[#allocation7 + $0x18] sm:$0xff] }
 0x3b2   : > { %v1280_v34 = vrot.slane %v1279_v43, 2 }
 0x3b3   : > { %v3493_v55 = vpop.permute.xlu1 %1230  ;;  %v1292_v21 = vrot.slane %v1291_v63, 2  ;;  %1367 = vmatpush.msrb.mxu2 %v1334_v45 }
 0x3b4   : > { %v3499_v29 = vpop.permute.xlu2 %1691  ;;  %v1273_v53 = vmul.f32 %v3512_v30, %v3493_v55  ;;  %v1281_v62 = vadd.f32 %v1280_v34, %v1279_v43  ;;  %v875_v43 = vld [vmem:[#allocation7 + $0x60] sm:$0xff]  ;;  %v1247_v5 = vperm.slane %v3493_v55, %v3871_v54 }
 0x3b5   : > { %v3495_v2 = vpop.permute.xlu0 %1682  ;;  %v1734_v16 = vmul.f32 %v3512_v30, %v3499_v29  ;;  %v1293_v0 = vadd.f32 %v1292_v21, %v1291_v63  ;;  %v3558_v63 = vadd.f32 %v817_v46, %v816_v50  ;;  %898 = vmatpush.msrb.mxu1 %v875_v43  ;;  %v1708_v50 = vperm.slane %v3499_v29, %v3871_v54  ;;  %v1330_v43 = vld [vmem:[#allocation7 + $0x98] sm:$0xff] }
 0x3b6   : > { %v1731_v39 = vmul.f32 %v2288_v17, %v3495_v2  ;;  %v1296_v57 = vrot.slane %v1273_v53, 4  ;;  %v1282_v56 = vrot.slane %v1281_v62, 1  ;;  %v1705_v55 = vperm.slane %v3495_v2, %v3871_v54 }
 0x3b7   : > { %v1757_v33 = vrot.slane %v1734_v16, 4  ;;  %v1294_v24 = vrot.slane %v1293_v0, 1  ;;  %v819_v28 = vrot.slane %v3558_v63, 1  ;;  %899 = vmatpush.msrb.mxu1 %v874_v11 }
 0x3b8   : > { %v1739_v48 = vrot.slane %v1731_v39, 4  ;;  %v1297_v17 = vadd.f32 %v1296_v57, %v1273_v53  ;;  %v1253_v53 = vsel %vm504_vm1, %v1246_v42, %v1252_v3  ;;  %v1283_v12 = vadd.f32 %v1282_v56, %v1281_v62  ;;  %v1799_v57 = vld [vmem:[#allocation7 + $0x158] sm:$0xff]  ;;  %v1332_v62 = vld [vmem:[#allocation7 + $0xa8] sm:$0xff] }
 0x3b9   : > { %v1758_v49 = vadd.f32 %v1757_v33, %v1734_v16  ;;  %1824 = vmatpush.msra.mxu3 %v1799_v57  ;;  %v1295_v29 = vadd.f32 %v1294_v24, %v1293_v0  ;;  %v1713_v46 = vsel %vm502_vm0, %v1706_v6, %v1705_v55  ;;  %v872_v0 = vld [vmem:[#allocation7 + $0x48] sm:$0xff] }
 0x3ba   : > { %v1740_v7 = vadd.f32 %v1739_v48, %v1731_v39  ;;  %v1298_v34 = vrot.slane %v1297_v17, 2  ;;  %v1333_v39 = vld [vmem:[#allocation7 + $0xb0] sm:$0xff]  ;;  %v1254_v48 = vsel %vm3872_vm14, %v1247_v5, %v1253_v53  ;;  %vm3886_vm14 = vmmov %vm3878_vm5 }
 0x3bb   : > { %v1759_v26 = vrot.slane %v1758_v49, 2  ;;  %1368 = vmatpush.msrb.mxu2 %v1333_v39  ;;  %1825 = vmatpush.msra.mxu3 %v1798_v9 }
 0x3bc   : > { %v3506_v35 = vpop.permute.xlu1 %1233  ;;  %v1741_v22 = vrot.slane %v1740_v7, 2  ;;  %v1299_v59 = vadd.f32 %v1298_v34, %v1297_v17  ;;  %v1796_v17 = vld [vmem:[#allocation7 + $0x140] sm:$0xff]  ;;  %v1329_v34 = vld [vmem:[#allocation7 + $0x90] sm:$0xff] }
 0x3bd   : > { %v3509_v38 = vpop.permute.xlu0 %1688  ;;  %v3519_v10 = vpop.permute.xlu2 %1694  ;;  %v1274_v31 = vmul.f32 %v3530_v41, %v3506_v35  ;;  %v1760_v2 = vadd.f32 %v1759_v26, %v1758_v49  ;;  %v873_v49 = vld [vmem:[#allocation7 + $0x50] sm:$0xff]  ;;  %1369 = vmatpush.msrb.mxu2 %v1332_v62  ;;  %1826 = vmatpush.msra.mxu3 %v1797_v47  ;;  %v871_v26 = vld [vmem:[#allocation7 + $0x40] sm:$0xff] }
 0x3be   : > { %v1733_v58 = vmul.f32 %v3502_v13, %v3509_v38  ;;  %v1735_v44 = vmul.f32 %v3530_v41, %v3519_v10  ;;  %v1707_v8 = vperm.slane %v3509_v38, %v3871_v54  ;;  %v1742_v42 = vadd.f32 %v1741_v22, %v1740_v7  ;;  %900 = vmatpush.msrb.mxu1 %v873_v49 }
 0x3bf   : > { %v1302_v18 = vrot.slane %v1274_v31, 4  ;;  %v1248_v7 = vperm.slane %v3506_v35, %v3871_v54  ;;  %1827 = vmatpush.msra.mxu3 %v1796_v17 }
 0x3c0   : > { %v1751_v33 = vrot.slane %v1733_v58, 4  ;;  %v1763_v27 = vrot.slane %v1735_v44, 4  ;;  %v1714_v3 = vsel %vm504_vm1, %v1707_v8, %v1713_v46  ;;  %901 = vmatpush.msrb.mxu1 %v872_v0  ;;  %v1743_v39 = vrot.slane %v1742_v42, 1  ;;  %v1328_v8 = vld [vmem:[#allocation7 + $0x88] sm:$0xff]  ;;  %v870_v46 = vld [vmem:[#allocation7 + $0x38] sm:$0xff]  ;;  %v1794_v0 = vld [vmem:[#allocation7 + $0x130] sm:$0xff] }
 0x3c1   : > { %v1303_v37 = vadd.f32 %v1302_v18, %v1274_v31  ;;  %v1351_v31 = vsel %vm502_vm0, %v3527_v36, %v1283_v12  ;;  %v1761_v36 = vrot.slane %v1760_v2, 1  ;;  %v1300_v18 = vrot.slane %v1299_v59, 1 }
 0x3c2   : > { %v1752_v61 = vadd.f32 %v1751_v33, %v1733_v58  ;;  %v1764_v20 = vadd.f32 %v1763_v27, %v1735_v44  ;;  %v1795_v44 = vld [vmem:[#allocation7 + $0x138] sm:$0xff]  ;;  %v3589_v5 = vsel %vm504_vm1, %v1295_v29, %v1351_v31  ;;  %v1709_v12 = vperm.slane %v3519_v10, %v3871_v54  ;;  %902 = vmatpush.msrb.mxu1 %v871_v26 }
 0x3c3   : > { %v1304_v58 = vrot.slane %v1303_v37, 2  ;;  %v1715_v35 = vsel %vm3873_vm15, %v1708_v50, %v1714_v3  ;;  %1828 = vmatpush.msra.mxu3 %v1795_v44  ;;  %v3598_v62 = vadd.f32 %v1761_v36, %v1760_v2  ;;  %v1255_v10 = vsel %vm3874_vm8, %v1248_v7, %v1254_v48  ;;  %v868_v7 = vld [vmem:[#allocation7 + $0x28] sm:$0xff]  ;;  %v1792_v44 = vld [vmem:[#allocation7 + $0x120] sm:$0xff]  ;;  %vm3887_vm15 = vmmov %vm3874_vm8 }
 0x3c4   : > { %v1765_v22 = vrot.slane %v1764_v20, 2  ;;  %v3604_v9 = vadd.f32 %v1300_v18, %v1299_v59  ;;  %v1744_v2 = vadd.f32 %v1743_v39, %v1742_v42  ;;  %v1716_v48 = vsel %vm3875_vm9, %v1709_v12, %v1715_v35  ;;  %903 = vmatpush.msrb.mxu1 %v870_v46  ;;  %vm3888_vm8 = vmmov %vm3877_vm3 }
 0x3c5   : > { %v3521_v19 = vpop.permute.xlu1 %762  ;;  %1829 = vmatpush.msra.mxu3 %v1794_v0  ;;  %vm3889_vm9 = vmmov %vm3878_vm5 }
 0x3c6   : > { %v808_v1 = vmul.f32 %v3487_v15, %v3521_v19  ;;  %v1331_v15 = vld [vmem:[#allocation7 + $0xa0] sm:$0xff]  ;;  %v3611_v47 = vadd.f32 %v1765_v22, %v1764_v20  ;;  %v783_v59 = vperm.slane %v3521_v19, %v3871_v54  ;;  %v1793_v20 = vld [vmem:[#allocation7 + $0x128] sm:$0xff]  ;;  %v1791_v22 = vld [vmem:[#allocation7 + $0x118] sm:$0xff] }
 0x3c7   : > { %v3551_v16 = vpop.permute.xlu2 %1697  ;;  %1370 = vmatpush.msrb.mxu2 %v1331_v15  ;;  %v1327_v15 = vld [vmem:[#allocation7 + $0x80] sm:$0xff]  ;;  %1830 = vmatpush.msra.mxu3 %v1793_v20 }
 0x3c8   : > { %v3534_v52 = vpop.permute.xlu0 %1236  ;;  %v1736_v38 = vmul.f32 %v3554_v4, %v3551_v16  ;;  %v821_v56 = vrot.slane %v808_v1, 4  ;;  %v1767_v18 = vrot.slane %v3611_v47, 1  ;;  %v790_v39 = vsel %vm502_vm0, %v783_v59, %v782_v14 }
 0x3c9   : > { %v1275_v32 = vmul.f32 %v3554_v4, %v3534_v52  ;;  %1371 = vmatpush.msrb.mxu2 %v1330_v43  ;;  %v1249_v57 = vperm.slane %v3534_v52, %v3871_v54  ;;  %v3621_v43 = vld [vmem:[%s2616_s18 + $0x38] sm:$0xff]  ;;  %1831 = vmatpush.msra.mxu3 %v1792_v44  ;;  %s2048_s18 = sshll.u32 %s2612_s19, 3 }
 0x3ca   : > { %v1769_v53 = vrot.slane %v1736_v38, 4  ;;  %v822_v33 = vadd.f32 %v821_v56, %v808_v1  ;;  %s359_s13 = scalar_lea.vmem [#allocation8], %s2048_s18 }
 0x3cb   : > { %v1308_v51 = vrot.slane %v1275_v32, 4  ;;  %1372 = vmatpush.msrb.mxu2 %v1329_v34  ;;  %v867_v34 = vld [vmem:[#allocation7 + $0x20] sm:$0xff]  ;;  %1832 = vmatpush.msra.mxu3 %v1791_v22  ;;  %s1870_s10 = sshll.u32 %s359_s13, 4  ;;  %s1871_s10 = int_to_ptr.vmem [resolvable:$true] %s1870_s10 }
 0x3cc   : > { %v1770_v1 = vadd.f32 %v1769_v53, %v1736_v38  ;;  %v823_v31 = vrot.slane %v822_v33, 2  ;;  %v1256_v38 = vsel %vm3876_vm2, %v1249_v57, %v1255_v10  ;;  %v1710_v53 = vperm.slane %v3551_v16, %v3871_v54  ;;  %vm3890_vm2 = vmmov %vm3879_vm6 }
 0x3cd   : > { %v1309_v6 = vadd.f32 %v1308_v51, %v1275_v32  ;;  %v1753_v32 = vrot.slane %v1752_v61, 2  ;;  %v1305_v51 = vadd.f32 %v1304_v58, %v1303_v37  ;;  %1373 = vmatpush.msrb.mxu2 %v1328_v8  ;;  %v3626_v58 = vsel %vm502_vm0, %v3543_v60, %v1744_v2 }
 0x3ce   : > { %v1771_v56 = vrot.slane %v1770_v1, 2  ;;  %v3655_v14 = vsel %vm3880_vm7, %v1710_v53, %v1716_v48 }
 0x3cf   : > { %v3563_v21 = vpop.permute.xlu1 %765  ;;  %v1310_v50 = vrot.slane %v1309_v6, 2  ;;  %v1754_v49 = vadd.f32 %v1753_v32, %v1752_v61  ;;  %v1306_v17 = vrot.slane %v1305_v51, 1  ;;  %1374 = vmatpush.msrb.mxu2 %v1327_v15  ;;  %v1790_v15 = vld [vmem:[#allocation7 + $0x110] sm:$0xff] }
 0x3d0   : > { %v809_v52 = vmul.f32 %v3502_v13, %v3563_v21  ;;  %v3648_v57 = vadd.f32 %v1771_v56, %v1770_v1  ;;  %v784_v1 = vperm.slane %v3563_v21, %v3871_v54  ;;  %1833 = vmatpush.msra.mxu3 %v1790_v15 }
 0x3d1   : > { %v3594_v55 = vpop.permute.xlu2 %774  ;;  %v1311_v42 = vadd.f32 %v1310_v50, %v1309_v6 }
 0x3d2   : > { %v3575_v40 = vpop.permute.xlu0 %1239  ;;  %v827_v19 = vrot.slane %v809_v52, 4  ;;  %v812_v16 = vmul.f32 %v3554_v4, %v3594_v55 }
 0x3d3   : > { %v1276_v45 = vmul.f32 %v3582_v25, %v3575_v40  ;;  %v1250_v29 = vperm.slane %v3575_v40, %v3871_v54  ;;  %v869_v40 = vld [vmem:[#allocation7 + $0x30] sm:$0xff]  ;;  %v1312_v12 = vrot.slane %v1311_v42, 1 }
 0x3d4   : > { %904 = vmatpush.msrb.mxu1 %v869_v40  ;;  %v845_v48 = vrot.slane %v812_v16, 4  ;;  %v864_v40 = vld [vmem:[#allocation7 + $0x8] sm:$0xff] }
 0x3d5   : > { %v1314_v24 = vrot.slane %v1276_v45, 4 }
 0x3d6   : > { %905 = vmatpush.msrb.mxu1 %v868_v7  ;;  %v846_v7 = vadd.f32 %v845_v48, %v812_v16 }
 0x3d7   : > { %v1315_v27 = vadd.f32 %v1314_v24, %v1276_v45  ;;  %v1257_v45 = vsel %vm3877_vm3, %v1250_v29, %v1256_v38  ;;  %v3632_v24 = vadd.f32 %v823_v31, %v822_v33  ;;  %v1307_v33 = vadd.f32 %v1306_v17, %v1305_v51  ;;  %v1789_v38 = vld [vmem:[#allocation7 + $0x108] sm:$0xff]  ;;  %vm3891_vm3 = vmmov %vm3880_vm7 }
 0x3d8   : > { %v3601_v11 = vpop.permute.xlu1 %768  ;;  %906 = vmatpush.msrb.mxu1 %v867_v34  ;;  %1834 = vmatpush.msra.mxu3 %v1789_v38  ;;  %vm3894_vm7 = vmmov %vm3881_vm4 }
 0x3d9   : > { %v1316_v37 = vrot.slane %v1315_v27, 2  ;;  %v810_v61 = vmul.f32 %v3512_v30, %v3601_v11  ;;  %v1755_v30 = vrot.slane %v1754_v49, 1  ;;  %v825_v51 = vrot.slane %v3632_v24, 1 }
 0x3da   : > { %v3646_v35 = vpop.permute.xlu2 %780  ;;  %907 = vmatpush.msrb.mxu1 %v866_v23 }
 0x3db   : > { %v1317_v6 = vadd.f32 %v1316_v37, %v1315_v27  ;;  %v833_v32 = vrot.slane %v810_v61, 4  ;;  %v828_v27 = vadd.f32 %v827_v19, %v809_v52  ;;  %v3652_v50 = vadd.f32 %v1755_v30, %v1754_v49  ;;  %v865_v49 = vld [vmem:[#allocation7 + $0x10] sm:$0xff] }
 0x3dc   : > { %v1243_v13 = vpop.permute.xlu0 %1242  ;;  %v814_v52 = vmul.f32 %v3621_v43, %v3646_v35  ;;  %v1313_v37 = vadd.f32 %v1312_v12, %v1311_v42  ;;  %v1353_v42 = vsel %vm3881_vm4, %v3604_v9, %v3589_v5  ;;  %908 = vmatpush.msrb.mxu1 %v865_v49  ;;  %v785_v19 = vperm.slane %v3601_v11, %v3871_v54  ;;  %vm3895_vm4 = vmmov %vm3890_vm2 }
 0x3dd   : > { %v1251_v3 = vperm.slane %v1243_v13, %v3871_v54  ;;  %v1277_v36 = vmul.f32 %v3621_v43, %v1243_v13  ;;  %v1318_v4 = vrot.slane %v1317_v6, 1  ;;  %v834_v59 = vadd.f32 %v833_v32, %v810_v61  ;;  %v1788_v61 = vld [vmem:[#allocation7 + $0x100] sm:$0xff] }
 0x3de   : > { %v787_v13 = vperm.slane %v3594_v55, %v3871_v54  ;;  %v829_v46 = vrot.slane %v828_v27, 2  ;;  %v857_v56 = vrot.slane %v814_v52, 4  ;;  %909 = vmatpush.msrb.mxu1 %v864_v40  ;;  %1835 = vmatpush.msra.mxu3 %v1788_v61  ;;  %v791_v11 = vsel %vm504_vm1, %v784_v1, %v790_v39 }
 0x3df   : > { %v1258_v26 = vsel %vm3878_vm5, %v1251_v3, %v1257_v45  ;;  %v1320_v60 = vrot.slane %v1277_v36, 4  ;;  %v1319_v17 = vadd.f32 %v1318_v4, %v1317_v6  ;;  %v1354_v45 = vsel %vm3882_vm10, %v1307_v33, %v1353_v42  ;;  %vm3892_vm5 = vmmov %vm3888_vm8 }
 0x3e0   : > { %2049 = vst.msk [vmem:[%s3636_s25 + $0x8] sm:$0xff] %vm3879_vm6, %v1258_v26  ;;  %v835_v30 = vrot.slane %v834_v59, 2  ;;  %v1355_v26 = vsel %vm3883_vm11, %v1313_v37, %v1354_v45  ;;  %v826_v16 = vadd.f32 %v825_v51, %v3632_v24  ;;  %v858_v32 = vadd.f32 %v857_v56, %v814_v52  ;;  %vm3893_vm6 = vmmov %vm3889_vm9 }
 0x3e1   : > { %v1321_v8 = vadd.f32 %v1320_v60, %v1277_v36  ;;  %v863_v36 = vld [vmem:[#allocation7] sm:$0xff]  ;;  %v830_v60 = vadd.f32 %v829_v46, %v828_v27  ;;  %v1356_v12 = vsel %vm3884_vm12, %v1319_v17, %v1355_v26  ;;  %v792_v22 = vsel %vm3885_vm13, %v785_v19, %v791_v11  ;;  %vm3896_vm11 = vmmov %vm3891_vm3 }
 0x3e2   : > { %v3650_v10 = vpop.permute.xlu1 %771  ;;  %910 = vmatpush.msrb.mxu1 %v863_v36  ;;  %v847_v27 = vrot.slane %v846_v7, 2  ;;  %v789_v37 = vperm.slane %v3646_v35, %v3871_v54  ;;  %vm3897_vm12 = vmmov %vm3894_vm7 }
 0x3e3   : > { %v811_v29 = vmul.f32 %v3530_v41, %v3650_v10  ;;  %v1322_v2 = vrot.slane %v1321_v8, 2  ;;  %v1773_v41 = vrot.slane %v3648_v57, 1  ;;  %v786_v5 = vperm.slane %v3650_v10, %v3871_v54  ;;  %vm3898_vm13 = vmmov %vm3892_vm5 }
 0x3e4   : > { %v836_v10 = vadd.f32 %v835_v30, %v834_v59  ;;  %v831_v51 = vrot.slane %v830_v60, 1  ;;  %v859_v59 = vrot.slane %v858_v32, 2  ;;  %v848_v17 = vadd.f32 %v847_v27, %v846_v7 }
 0x3e5   : > { %v839_v31 = vrot.slane %v811_v29, 4  ;;  %v1323_v0 = vadd.f32 %v1322_v2, %v1321_v8  ;;  %v1701_v21 = vpop.permute.xlu0 %1700 }
 0x3e6   : > { %v1737_v20 = vmul.f32 %v3582_v25, %v1701_v21  ;;  %v1711_v44 = vperm.slane %v1701_v21, %v3871_v54  ;;  %v860_v42 = vadd.f32 %v859_v59, %v858_v32  ;;  %v849_v36 = vrot.slane %v848_v17, 1  ;;  %v2170_v32 = vld [vmem:[%s3776_s6] ss:$0 sm:$0xff] }
 0x3e7   : > { %v840_v3 = vadd.f32 %v839_v31, %v811_v29  ;;  %v1324_v55 = vrot.slane %v1323_v0, 1  ;;  %v793_v29 = vsel %vm3887_vm15, %v786_v5, %v792_v22  ;;  %v837_v31 = vrot.slane %v836_v10, 1  ;;  %vm3900_vm15 = vmmov %vm3893_vm6 }
 0x3e8   : > { %v1775_v6 = vrot.slane %v1737_v20, 4  ;;  %v1718_v24 = vsel %vm3888_vm8, %v1711_v44, %v3655_v14  ;;  %v1813_v14 = vsel %vm504_vm1, %v3652_v50, %v3626_v58  ;;  %v794_v46 = vsel %vm3891_vm3, %v787_v13, %v793_v29  ;;  %vm3903_vm8 = vmmov %vm3893_vm6 }
 0x3e9   : > { %v841_v9 = vrot.slane %v840_v3, 2  ;;  %v1325_v53 = vadd.f32 %v1324_v55, %v1323_v0  ;;  %v1768_v58 = vadd.f32 %v1767_v18, %v3611_v47  ;;  %v832_v50 = vadd.f32 %v831_v51, %v830_v60 }
 0x3ea   : > { %v1776_v34 = vadd.f32 %v1775_v6, %v1737_v20  ;;  %v820_v20 = vadd.f32 %v819_v28, %v3558_v63  ;;  %v838_v61 = vadd.f32 %v837_v31, %v836_v10  ;;  %v1774_v47 = vadd.f32 %v1773_v41, %v3648_v57 }
 0x3eb   : > { %v1357_v8 = vsel %vm3886_vm14, %v1325_v53, %v1356_v12  ;;  %v842_v15 = vadd.f32 %v841_v9, %v840_v3  ;;  %v861_v63 = vrot.slane %v860_v42, 1  ;;  %vm3899_vm14 = vmmov %vm3882_vm10  ;;  %v850_v11 = vadd.f32 %v849_v36, %v848_v17 }
 0x3ec   : > { %v1704_v33 = vpop.permute.xlu1 %1703  ;;  %v1777_v23 = vrot.slane %v1776_v34, 2  ;;  %1375 = vmatmul.f32.vlgmr.msrb.gmra.mxu2 %v1357_v8  ;;  %v887_v18 = vsel %vm502_vm0, %v826_v16, %v820_v20  ;;  %vm3901_vm0 = vmmov %vm3891_vm3 }
 0x3ed   : > { %v1712_v4 = vperm.slane %v1704_v33, %v3871_v54  ;;  %v1738_v39 = vmul.f32 %v3621_v43, %v1704_v33  ;;  %v843_v0 = vrot.slane %v842_v15, 1  ;;  %v888_v30 = vsel %vm504_vm1, %v832_v50, %v887_v18  ;;  %vm3902_vm1 = vmmov %vm3892_vm5 }
 0x3ee   : > { %v1778_v1 = vadd.f32 %v1777_v23, %v1776_v34  ;;  %v889_v5 = vsel %vm3897_vm12, %v838_v61, %v888_v30  ;;  %v862_v60 = vadd.f32 %v861_v63, %v860_v42 }
 0x3ef   : > { %v1719_v52 = vsel %vm3889_vm9, %v1712_v4, %v1718_v24  ;;  %v1781_v2 = vrot.slane %v1738_v39, 4  ;;  %v778_v49 = vpop.permute.xlu0 %777  ;;  %v844_v19 = vadd.f32 %v843_v0, %v842_v15 }
 0x3f0   : > { %2050 = vst.msk [vmem:[%s3636_s25 + $0x10] sm:$0xff] %vm3890_vm2, %v1719_v52  ;;  %v788_v43 = vperm.slane %v778_v49, %v3871_v54  ;;  %v813_v48 = vmul.f32 %v3582_v25, %v778_v49  ;;  %v1779_v21 = vrot.slane %v1778_v1, 1  ;;  %v1814_v25 = vsel %vm3894_vm7, %v3598_v62, %v1813_v14 }
 0x3f1   : > { %v1782_v38 = vadd.f32 %v1781_v2, %v1738_v39  ;;  %v1815_v62 = vsel %vm3882_vm10, %v1768_v58, %v1814_v25  ;;  %v890_v53 = vsel %vm3899_vm14, %v844_v19, %v889_v5 }
 0x3f2   : > { %v795_v35 = vsel %vm3892_vm5, %v788_v43, %v794_v46  ;;  %v851_v40 = vrot.slane %v813_v48, 4  ;;  %v1780_v45 = vadd.f32 %v1779_v21, %v1778_v1  ;;  %v1816_v26 = vsel %vm3896_vm11, %v1774_v47, %v1815_v62 }
 0x3f3   : > { %v1783_v3 = vrot.slane %v1782_v38, 2  ;;  %v796_v54 = vsel %vm3893_vm6, %v789_v37, %v795_v35  ;;  %v891_v34 = vsel %vm3901_vm0, %v850_v11, %v890_v53 }
 0x3f4   : > { %798 = vst.msk [vmem:[%s3636_s25] sm:$0xff] %vm3895_vm4, %v796_v54  ;;  %v852_v13 = vadd.f32 %v851_v40, %v813_v48  ;;  %v1817_v44 = vsel %vm3898_vm13, %v1780_v45, %v1816_v26 }
 0x3f5   : > { %v1784_v56 = vadd.f32 %v1783_v3, %v1782_v38 }
 0x3f6   : > { %v853_v55 = vrot.slane %v852_v13, 2 }
 0x3f7   : > { %v1785_v7 = vrot.slane %v1784_v56, 1 }
 0x3f8   : > { %v854_v6 = vadd.f32 %v853_v55, %v852_v13 }
 0x3f9   : > { %v1786_v28 = vadd.f32 %v1785_v7, %v1784_v56 }
 0x3fa   : > { %v855_v9 = vrot.slane %v854_v6, 1 }
 0x3fb   : > { %v1818_v57 = vsel %vm3900_vm15, %v1786_v28, %v1817_v44 }
 0x3fc   : > { %v856_v41 = vadd.f32 %v855_v9, %v854_v6  ;;  %1836 = vmatmul.f32.vlgmr.msra.gmra.mxu3 %v1818_v57 }
 0x3fe   : > { %v892_v12 = vsel %vm3902_vm1, %v856_v41, %v891_v34 }
 0x3ff   : > { %v893_v16 = vsel %vm3903_vm8, %v862_v60, %v892_v12 }
 0x400   : > { %911 = vmatmul.f32.vlgmr.msrb.gmra.mxu1 %v893_v16 }
 0x46f   : > { %v1376_v8 = vpop.f32.mrf.mxu2 }
 0x47d   : > { %v912_v22 = vpop.f32.mrf.mxu1 }
 0x47e   : > { %v918_v33 = vadd.f32 %v2170_v32, %v912_v22 }
 0x47f   : > { %v1837_v10 = vpop.f32.mrf.mxu3 }
 0x480   : > { %v1379_v23 = vadd.f32 %v1376_v8, %v918_v33 }
 0x482   : > { %v1840_v4 = vadd.f32 %v1837_v10, %v1379_v23 }
 0x484   : > { %1841 = vmax.xlane.f32.xlu1 %v1840_v4 }
 0x4f7   : > { %v1842_v39 = vpop.xlane.xlu1 %1841 }
 0x4f8   : > { %v1843_v27 = vsub.f32 %v1840_v4, %v1842_v39 }
 0x4fa   : > { %v1844_v29 = vmul.f32 1.442695, %v1843_v27 }
 0x4fc   : > { %2283 = vpow2.f32 %v1844_v29 }
 0x502   : > { %v2284_v15 = vpop.eup %2283 }
 0x503   : > { %1846 = vadd.xlane.f32.xlu0 %v2284_v15 }
 0x576   : > { %v1847_v24 = vpop.xlane.xlu0 %1846 }
 0x577   : > { %2285 = vlog2.f32 %v1847_v24 }
 0x57d   : > { %v2286_v51 = vpop.eup %2285 }
 0x57e   : > { %v1849_v1 = vmul.f32 0.6931472, %v2286_v51 }
 0x580   : > { %v1850_v52 = vadd.f32 %v1849_v1, %v1842_v39 }
 0x582   : > { %v1851_v2 = vsub.f32 %v1840_v4, %v1850_v52 }
 0x584   : > { %1852 = vst [vmem:[%s359_s13] sm:$0xff] %v1851_v2 }
 0x585   : > { %2412 = shalt.err (!%p2409_p10)
}
 0x586   : > { %2106 = dma.vmem_to_hbm [thread:$0]  (%p2579_p3), %s1871_s10, 128, %s1873_s20, %s1854_s21   ;;  %v1913_v49 = vld [vmem:[%s3636_s25] sm:$0xff] (%p2579_p3)  ;;  %v1915_v37 = vld [vmem:[%s3636_s25 + $0x8] sm:$0xff] (%p2579_p3)  ;;  %v1917_v43 = vld [vmem:[%s3636_s25 + $0x10] sm:$0xff] (%p2579_p3) }
 0x587   : > { %1878 = sbr.rel (!%p2579_p3) target bundleno = 1420 (0x58c), region = 68  ;;  %s1880_s23 = scalar_lea.vmem (%p2579_p3), %s3778_s8, %s2052_s11 }
 0x588   : > { %1914 = vst [vmem:[%s1880_s23] sm:$0xff] (%p2579_p3), %v1913_v49 }
 0x589   : > { %1916 = vst [vmem:[%s1880_s23 + $0x10] sm:$0xff] (%p2579_p3), %v1915_v37 }
 0x58a   : > { %1918 = vst [vmem:[%s1880_s23 + $0x20] sm:$0xff] (%p2579_p3), %v1917_v43 }
 0x58c PF: > { %s1930_s14 = sand.u32 1, %s2443_s27   ;;  %p3904_p3 = scmp.ge.s32.totalorder %s2455_s30, 2 }
 0x58d   : > { %s1931_s13 = scalar_lea.sflag [#allocation4], %s1930_s14 }
 0x58e   : > { %p2120_p12 = pnand %p3904_p3, %p2542_p6 }
 0x590   : > { %p2121_p13 = pneg %p2120_p12 }
 0x592   : > { %2438 = dma.done.wait (%p2121_p13), %s1931_s13, 128  }
 0x593   : > { %2440 = vsyncadd (%p2121_p13), %s1931_s13, 4294967168  ;;  %p23_p0 = scmp.ge.s32.totalorder %s2569_s26, 4   ;;  %s3905_s27 = smov %s2447_s28 }
 0x594   : > { %s3906_s28 = smov %s2451_s29  ;;  %s3907_s29 = smov %s2585_s15 }
 0x595   : > { %s3908_s30 = smov %s2569_s26  ;;  %25 = sbr.rel (!%p23_p0) target bundleno = 9 (0x9), region = 155 }
 0x59a   :  { %1944 = vsyncpa [#allocation3], 1 }
 0x59b   :  { %1946 = vsyncpa [#allocation3 + $0x1], 1 }
 0x59c   :  { %1947 = vsyncpa [#allocation6], 1 }
 0x59d   :  { %1948 = vsyncpa [#allocation4], 1 }
 0x59e   :  { %1950 = vsyncpa [#allocation4 + $0x1], 1 }

// kernel: tpu_custom_call.1
= control target key start
LH: loop header
LB: loop body
LE: loop exit
PB: predicated region body
PF: predicated region fallthrough
CT: control target
= control target key end

     0   :  { %s3770_s0 = inlined_call_operand.hbm [shape: f32[16,8,128], index: 0, kind: input, shape index: {}]   ;;  %s3771_s1 = inlined_call_operand.hbm [shape: f32[128,128], index: 1, kind: input, shape index: {}]   ;;  %s3772_s2 = inlined_call_operand.vmem [shape: f32[1,128], index: 2, kind: input, shape index: {}]   ;;  %s3773_s3 = inlined_call_operand.vmem [shape: f32[3,128], index: 3, kind: input, shape index: {}]   ;;  %s3774_s4 = inlined_call_operand.vmem [shape: f32[3,1], index: 4, kind: input, shape index: {}]   ;;  %s3775_s5 = inlined_call_operand.hbm [shape: f32[3,128,128], index: 5, kind: input, shape index: {}]   ;;  %s3776_s6 = inlined_call_operand.vmem [shape: f32[1,128], index: 6, kind: input, shape index: {}]   ;;  %s3777_s7 = inlined_call_operand.hbm [shape: f32[16,128], index: 7, kind: output, shape index: {0}]   ;;  %s3778_s8 = inlined_call_operand.vmem [shape: f32[3,16,8], index: 8, kind: output, shape index: {1}]  }
   0x1   :  { %3806 = sst [smem:[#allocation28_spill]] %s3771_s1 }
   0x2   :  { %3807 = sst [smem:[#allocation29_spill]] %s3775_s5 }
   0x3   :  { %14 = vsyncpa [#allocation3], 0 }
   0x4   :  { %16 = vsyncpa [#allocation3 + $0x1], 0 }
   0x5   :  { %17 = vsyncpa [#allocation6], 0 }
   0x6   :  { %18 = vsyncpa [#allocation4], 0 }
   0x7   :  { %20 = vsyncpa [#allocation4 + $0x1], 0  ;;  %s2507_s27 = smov 0   ;;  %s2509_s28 = smov 0  }
   0x8   :  { %s2511_s29 = smov 0   ;;  %s2513_s30 = smov 0  }
   0x9 LB: > { %s2528_s9 = sadd.s32 4294967295, %s2455_s30   ;;  %s2036_s10 = sadd.s32 4294967294, %s2455_s30   ;;  %s2455_s30 = sphi %s2513_s30, %s3908_s30   ;;  %s2451_s29 = sphi %s2511_s29, %s3907_s29   ;;  %s2447_s28 = sphi %s2509_s28, %s3906_s28   ;;  %s2443_s27 = sphi %s2507_s27, %s3905_s27  }
   0xa   : > { %p46_p0 = scmp.ne.s32.totalorder %s2447_s28, %s2443_s27  ;;  %p47_p1 = scmp.eq.s32.totalorder %s2528_s9, 0 }
   0xb   : > { %p196_p2 = scmp.eq.s32.totalorder %s2528_s9, 1  ;;  %p202_p3 = scmp.eq.s32.totalorder %s2036_s10, 1 }
   0xc   : > { %p2537_p4 = por %p47_p1, %p46_p0  ;;  %p2037_p5 = scmp.ge.s32.totalorder %s2455_s30, 1 }
   0xd   : > { %p2542_p6 = por %p202_p3, %p46_p0  ;;  %p235_p7 = scmp.lt.s32.totalorder %s2455_s30, 3 }
   0xe   : > { %s3810_s1 = sld [smem:[#allocation28_spill]]  ;;  %s2457_s17 = smov [#allocation5]  }
   0xf   : > { %p2550_p8 = pnand %p2037_p5, %p235_p7  ;;  %s248_s18 = sshll.u32 %s2457_s17, 4  ;;  %s249_s18 = int_to_ptr.vmem [resolvable:$true] %s248_s18 }
  0x10   : > { %s3812_s5 = sld [smem:[#allocation29_spill]]  ;;  %s3779_s22 = smov 128  }
  0x11   : > { %p2108_p9 = pneg %p2550_p8  ;;  %s3780_s23 = smov 8  }
  0x12   : > { %s2460_s24 = smov [#allocation7]   ;;  %s2569_s26 = sadd.s32 1, %s2455_s30  }
  0x13   : > { %p2109_p10 = pnand %p2108_p9, %p47_p1  ;;  %s271_s25 = sshll.u32 %s2460_s24, 4  ;;  %s272_s25 = int_to_ptr.vmem [resolvable:$true] %s271_s25 }
  0x14   : > { %s246_s15 = sshll.u32 %s3810_s1, 4  ;;  %s33_s10 = sadd.s32 1, %s2451_s29  ;;  %s247_s15 = int_to_ptr.hbm [resolvable:$true] %s246_s15 }
  0x15   : > { %2111 = dma.hbm_to_vmem [thread:$0]  (!%p2109_p10), %s247_s15, 2048, %s249_s18, [#allocation6], %s3779_s22, %s3779_s22, %s3780_s23  }
  0x16   : > { %s269_s21 = sshll.u32 %s3812_s5, 4  ;;  %s30_s13 = ssub.s32 %s2455_s30, %s2569_s26  ;;  %s270_s21 = int_to_ptr.hbm [resolvable:$true] %s269_s21 }
  0x17   : > { %2114 = dma.hbm_to_vmem [thread:$0]  (!%p2109_p10), %s270_s21, 6144, %s272_s25, [#allocation6], %s3779_s22, %s3779_s22, %s3780_s23  }
  0x18   : > { %p40_p12 = scmp.ne.s32.totalorder %s2451_s29, %s2447_s28  ;;  %p31_p13 = scmp.eq.s32.totalorder %s30_s13, 0 }
  0x19   : > { %p41_p0 = scmp.eq.s32.totalorder %s2455_s30, 0  ;;  %p2125_p5 = scmp.lt.s32.totalorder %s2455_s30, 2 }
  0x1a   : > { %p2579_p3 = por %p196_p2, %p40_p12  ;;  %s288_s17 = sand.u32 1, %s2451_s29  }
  0x1b   : > { %s2585_s15 = scalar_select %p31_p13, %s2451_s29, %s33_s10  }
  0x1c   : > { %p42_p7 = por %p41_p0, %p40_p12  ;;  %s2041_s18 = sshll.u32 %s288_s17, 6 }
  0x1d   : > { %s2056_s19 = sshll.u32 %s2455_s30, 6  ;;  %s292_s25 = scalar_lea.vmem [#allocation2], %s2041_s18 }
  0x1e   : > { %s297_s24 = scalar_lea.hbm %s3770_s0, %s2056_s19  ;;  %s300_s22 = sshll.u32 %s292_s25, 4  ;;  %s301_s22 = int_to_ptr.vmem [resolvable:$true] %s300_s22 }
  0x1f   : > { %s298_s13 = sshll.u32 %s297_s24, 4  ;;  %p2592_p2 = pnand %p2125_p5, %p42_p7  ;;  %s299_s13 = int_to_ptr.hbm [resolvable:$true] %s298_s13 }
  0x20   : > { %s289_s10 = scalar_lea.sflag [#allocation3], %s288_s17  ;;  %s2355_s1 = sshra.s32 %s299_s13, 4  ;;  %s2356_s1 = int_to_ptr.hbm [resolvable:$true] %s2355_s1 }
  0x21   : > { %s2357_s5 = scalar_lea.hbm %s2356_s1, 64  ;;  %p2359_p10 = pneg %p2592_p2 }
  0x22   : > { %p2358_p9 = scmp.ne.s32.totalorder %s2356_s1, %s2357_s5  ;;  %s2362_s20 = scalar_lea.hbm %s3770_s0, 128 }
  0x23   : > { %p2363_p0 = scmp.lt.s32.totalorder %s2356_s1, %s3770_s0  ;;  %p2364_p5 = scmp.lt.s32.totalorder %s2362_s20, %s2357_s5 }
  0x24   : > { %p2360_p12 = pnand %p2359_p10, %p2358_p9 }
  0x25   : > { %p2365_p7 = por %p2364_p5, %p2363_p0 }
  0x26   : > { %p2361_p13 = pneg %p2360_p12 }
  0x28   : > { %p2366_p11 = pnand %p2365_p7, %p2361_p13 }
  0x2a   : > { %2369 = shalt.err (!%p2366_p11)
}
  0x2b   : > { %s3815_s17 = smov 8   ;;  %s3816_s25 = smov 128  }
  0x2c   : > { %2118 = dma.hbm_to_vmem [thread:$0]  (!%p2592_p2), %s299_s13, 1024, %s301_s22, %s289_s10, %s3816_s25, %s3816_s25, %s3815_s17  }
  0x2d   : > { %312 = sbr.rel (%p2550_p8) target bundleno = 1420 (0x58c), region = 48 }
  0x32   : > { %s2612_s19 = sand.u32 1, %s2447_s28  }
  0x33   : > { %s2045_s1 = sshll.u32 %s2612_s19, 6  ;;  %s315_s5 = scalar_lea.sflag [#allocation3], %s2612_s19 }
  0x34   : > { %s2616_s18 = scalar_lea.vmem [#allocation2], %s2045_s1 }
  0x35   : > { %2430 = dma.done.wait (%p2537_p4), %s315_s5, 1024  }
  0x36   : > { %2432 = vsyncadd (%p2537_p4), %s315_s5, 4294966272 }
  0x37   : > { %2434 = dma.done.wait (%p47_p1), [#allocation6], 8192  }
  0x38   : > { %2436 = vsyncadd (%p47_p1), [#allocation6], 4294959104  ;;  %v390_v0 = vld [vmem:[#allocation5 + $0x78] sm:$0xff]  ;;  %v389_v1 = vld [vmem:[#allocation5 + $0x70] sm:$0xff]  ;;  %vm502_vm0 = vcmask 1041409   ;;  %vm504_vm1 = vcmask 1042434  }
  0x39   : > { %395 = vmatpush.msra.mxu0 %v390_v0  ;;  %2057 = vmatpush.msra.mxu1 %v390_v0  ;;  %v388_v2 = vld [vmem:[#allocation5 + $0x68] sm:$0xff]  ;;  %v387_v3 = vld [vmem:[#allocation5 + $0x60] sm:$0xff]  ;;  %v386_v4 = vld [vmem:[#allocation5 + $0x58] sm:$0xff]  ;;  %vm3801_vm2 = vcmask 1043459   ;;  %vm3797_vm3 = vcmask 1044484   ;;  %vm3789_vm4 = vcmask 1045509  }
  0x3a   : > { %2058 = vmatpush.msra.mxu2 %v390_v0  ;;  %v385_v5 = vld [vmem:[#allocation5 + $0x50] sm:$0xff]  ;;  %v384_v6 = vld [vmem:[#allocation5 + $0x48] sm:$0xff]  ;;  %v383_v7 = vld [vmem:[#allocation5 + $0x40] sm:$0xff]  ;;  %vm3787_vm5 = vcmask 1046534   ;;  %vm3786_vm6 = vcmask 1047559   ;;  %vm3784_vm7 = vcmask 64512  }
  0x3b   : > { %396 = vmatpush.msra.mxu0 %v389_v1  ;;  %2059 = vmatpush.msra.mxu1 %v389_v1  ;;  %v382_v8 = vld [vmem:[#allocation5 + $0x38] sm:$0xff]  ;;  %v381_v9 = vld [vmem:[#allocation5 + $0x30] sm:$0xff]  ;;  %v380_v10 = vld [vmem:[#allocation5 + $0x28] sm:$0xff]  ;;  %s2089_s17 = smul.u32 24, %s2612_s19  ;;  %s2052_s11 = sshll.u32 %s2528_s9, 3 }
  0x3c   : > { %2060 = vmatpush.msra.mxu2 %v389_v1  ;;  %v379_v11 = vld [vmem:[#allocation5 + $0x20] sm:$0xff]  ;;  %v378_v12 = vld [vmem:[#allocation5 + $0x18] sm:$0xff]  ;;  %v377_v13 = vld [vmem:[#allocation5 + $0x10] sm:$0xff]  ;;  %s1868_s23 = scalar_lea.hbm %s3777_s7, %s2052_s11  ;;  %s2405_s5 = scalar_lea.hbm %s3777_s7, 16 }
  0x3d   : > { %397 = vmatpush.msra.mxu0 %v388_v2  ;;  %2061 = vmatpush.msra.mxu1 %v388_v2  ;;  %v376_v14 = vld [vmem:[#allocation5 + $0x8] sm:$0xff]  ;;  %v375_v15 = vld [vmem:[#allocation5] sm:$0xff]  ;;  %v370_v17 = vld [vmem:[%s2616_s18 + $0x18] sm:$0xff]  ;;  %s3636_s25 = scalar_lea.vmem [#allocation9], %s2089_s17 }
  0x3e   : > { %2062 = vmatpush.msra.mxu2 %v388_v2  ;;  %v367_v16 = vld [vmem:[%s2616_s18] sm:$0xff]  ;;  %v374_v18 = vld [vmem:[%s2616_s18 + $0x38] sm:$0xff]  ;;  %v368_v19 = vld [vmem:[%s2616_s18 + $0x8] sm:$0xff] }
  0x3f   : > { %398 = vmatpush.msra.mxu0 %v387_v3  ;;  %2063 = vmatpush.msra.mxu1 %v387_v3  ;;  %v371_v20 = vld [vmem:[%s2616_s18 + $0x20] sm:$0xff]  ;;  %v369_v21 = vld [vmem:[%s2616_s18 + $0x10] sm:$0xff]  ;;  %v372_v22 = vld [vmem:[%s2616_s18 + $0x28] sm:$0xff] }
  0x40   : > { %2064 = vmatpush.msra.mxu2 %v387_v3  ;;  %v373_v23 = vld [vmem:[%s2616_s18 + $0x30] sm:$0xff]  ;;  %v2169_v24 = vld [vmem:[%s3772_s2] ss:$0 sm:$0xff] }
  0x41   : > { %399 = vmatpush.msra.mxu0 %v386_v4  ;;  %2065 = vmatpush.msra.mxu1 %v386_v4  ;;  %v444_v29 = vld [vmem:[%s3773_s3] sm:$0x7] }
  0x42   : > { %2066 = vmatpush.msra.mxu2 %v386_v4  ;;  %v2640_v30 = vperm.slane %v444_v29, 1  ;;  %v2642_v31 = vperm.slane %v444_v29, 2  ;;  %v2647_v42 = vperm.slane %v444_v29, 0  ;;  %v445_v63 = vld [vmem:[%s3774_s4] sm:$0x7] }
  0x43   : > { %400 = vmatpush.msra.mxu0 %v385_v5  ;;  %2067 = vmatpush.msra.mxu1 %v385_v5  ;;  %2090 = vpush %v445_v63  ;;  %v944_v1 = vrot.slane %v445_v63, 1  ;;  %v1405_v2 = vrot.slane %v445_v63, 2 }
  0x44   : > { %2068 = vmatpush.msra.mxu2 %v385_v5 }
  0x45   : > { %401 = vmatpush.msra.mxu0 %v384_v6  ;;  %2069 = vmatpush.msra.mxu1 %v384_v6  ;;  %2092 = vpush %v944_v1 }
  0x46   : > { %2070 = vmatpush.msra.mxu2 %v384_v6  ;;  %2094 = vpush %v1405_v2 }
  0x47   : > { %402 = vmatpush.msra.mxu0 %v383_v7  ;;  %2071 = vmatpush.msra.mxu1 %v383_v7 }
  0x48   : > { %2072 = vmatpush.msra.mxu2 %v383_v7 }
  0x49   : > { %403 = vmatpush.msra.mxu0 %v382_v8  ;;  %2073 = vmatpush.msra.mxu1 %v382_v8 }
  0x4a   : > { %2074 = vmatpush.msra.mxu2 %v382_v8 }
  0x4b   : > { %404 = vmatpush.msra.mxu0 %v381_v9  ;;  %2075 = vmatpush.msra.mxu1 %v381_v9 }
  0x4c   : > { %2076 = vmatpush.msra.mxu2 %v381_v9 }
  0x4d   : > { %405 = vmatpush.msra.mxu0 %v380_v10  ;;  %2077 = vmatpush.msra.mxu1 %v380_v10 }
  0x4e   : > { %2078 = vmatpush.msra.mxu2 %v380_v10 }
  0x4f   : > { %406 = vmatpush.msra.mxu0 %v379_v11  ;;  %2079 = vmatpush.msra.mxu1 %v379_v11 }
  0x50   : > { %2080 = vmatpush.msra.mxu2 %v379_v11 }
  0x51   : > { %407 = vmatpush.msra.mxu0 %v378_v12  ;;  %2081 = vmatpush.msra.mxu1 %v378_v12 }
  0x52   : > { %2082 = vmatpush.msra.mxu2 %v378_v12 }
  0x53   : > { %408 = vmatpush.msra.mxu0 %v377_v13  ;;  %2083 = vmatpush.msra.mxu1 %v377_v13 }
  0x54   : > { %2084 = vmatpush.msra.mxu2 %v377_v13 }
  0x55   : > { %409 = vmatpush.msra.mxu0 %v376_v14  ;;  %2085 = vmatpush.msra.mxu1 %v376_v14 }
  0x56   : > { %2086 = vmatpush.msra.mxu2 %v376_v14 }
  0x57   : > { %410 = vmatpush.msra.mxu0 %v375_v15  ;;  %2087 = vmatpush.msra.mxu1 %v375_v15 }
  0x58   : > { %411 = vmatmul.f32.vlgmr.msra.gmra.mxu0 %v367_v16  ;;  %420 = vmatmul.f32.vlgmr.msra.gmra.mxu1 %v370_v17 }
  0x59   : > { %2088 = vmatpush.msra.mxu2 %v375_v15 }
  0x5a   : > { %432 = vmatmul.f32.vlgmr.msra.gmra.mxu2 %v374_v18 }
  0x60   : > { %414 = vmatmul.f32.gmra.mxu0 %v368_v19  ;;  %423 = vmatmul.f32.gmra.mxu1 %v371_v20 }
  0x68   : > { %417 = vmatmul.f32.gmra.mxu0 %v369_v21  ;;  %426 = vmatmul.f32.gmra.mxu1 %v372_v22 }
  0x70   : > { %429 = vmatmul.f32.gmra.mxu1 %v373_v23 }
  0x74   : > { %s2675_s20 = spop %2090 }
  0x76   : > { %s2093_s21 = spop %2092 }
  0x77   : > { %v946_v29 = vstv %s2093_s21  ;;  %s2095_s24 = spop %2094  ;;  %s1854_s21 = scalar_lea.sflag [#allocation4], %s2612_s19 }
  0xd5   : > { %v412_v25 = vpop.f32.mrf.mxu0  ;;  %v421_v26 = vpop.f32.mrf.mxu1 }
  0xd6   : > { %v413_v27 = vadd.f32 %v2169_v24, %v412_v25  ;;  %v422_v28 = vadd.f32 %v2169_v24, %v421_v26 }
  0xd8   : > { %2171 = vtanh.f32 %v413_v27 }
  0xd9   : > { %2173 = vtanh.f32 %v422_v28  ;;  %v492_v28 = vlaneseq }
  0xdd   : > { %v415_v32 = vpop.f32.mrf.mxu0  ;;  %v433_v33 = vpop.f32.mrf.mxu2 }
  0xde   : > { %v2172_v34 = vpop.eup %2171  ;;  %v434_v35 = vadd.f32 %v2169_v24, %v433_v33  ;;  %v416_v40 = vadd.f32 %v2169_v24, %v415_v32  ;;  %v424_v41 = vpop.f32.mrf.mxu1 }
  0xdf   : > { %v2174_v36 = vpop.eup %2173  ;;  %v1381_v37 = vmul.f32 %v2172_v34, %v2642_v31  ;;  %v920_v38 = vmul.f32 %v2172_v34, %v2640_v30  ;;  %v448_v47 = vmul.f32 %v2172_v34, %v2647_v42  ;;  %v425_v49 = vadd.f32 %v2169_v24, %v424_v41 }
  0xe0   : > { %v923_v39 = vmul.f32 %v2174_v36, %v2640_v30  ;;  %2175 = vtanh.f32 %v434_v35  ;;  %v451_v46 = vmul.f32 %v2174_v36, %v2647_v42  ;;  %v1384_v55 = vmul.f32 %v2174_v36, %v2642_v31 }
  0xe1   : > { %1389 = vadd.xlane.f32.xlu2 %v1381_v37  ;;  %928 = vadd.xlane.f32.xlu0 %v920_v38  ;;  %2177 = vtanh.f32 %v416_v40 }
  0xe2   : > { %934 = vadd.xlane.f32.xlu1 %v923_v39 }
  0xe5   : > { %v418_v43 = vpop.f32.mrf.mxu0 }
  0xe6   : > { %v419_v44 = vadd.f32 %v2169_v24, %v418_v43  ;;  %v2176_v45 = vpop.eup %2175  ;;  %v427_v51 = vpop.f32.mrf.mxu1 }
  0xe7   : > { %v927_v48 = vmul.f32 %v2176_v45, %v2640_v30  ;;  %v2178_v50 = vpop.eup %2177  ;;  %v428_v56 = vadd.f32 %v2169_v24, %v427_v51  ;;  %v455_v9 = vmul.f32 %v2176_v45, %v2647_v42  ;;  %v1388_v13 = vmul.f32 %v2176_v45, %v2642_v31 }
  0xe8   : > { %2179 = vtanh.f32 %v419_v44  ;;  %v921_v54 = vmul.f32 %v2178_v50, %v2640_v30  ;;  %v1382_v60 = vmul.f32 %v2178_v50, %v2642_v31  ;;  %v449_v4 = vmul.f32 %v2178_v50, %v2647_v42 }
  0xe9   : > { %462 = vadd.xlane.f32.xlu0 %v451_v46  ;;  %456 = vadd.xlane.f32.xlu2 %v448_v47  ;;  %2181 = vtanh.f32 %v425_v49  ;;  %v1407_v45 = vstv %s2095_s24 }
  0xea   : > { %942 = vadd.xlane.f32.xlu1 %v927_v48  ;;  %2183 = vtanh.f32 %v428_v56 }
  0xee   : > { %v2180_v52 = vpop.eup %2179  ;;  %v430_v59 = vpop.f32.mrf.mxu1 }
  0xef   : > { %v922_v53 = vmul.f32 %v2180_v52, %v2640_v30  ;;  %v2182_v57 = vpop.eup %2181  ;;  %v1383_v61 = vmul.f32 %v2180_v52, %v2642_v31  ;;  %v431_v62 = vadd.f32 %v2169_v24, %v430_v59  ;;  %v450_v10 = vmul.f32 %v2180_v52, %v2647_v42 }
  0xf0   : > { %v924_v58 = vmul.f32 %v2182_v57, %v2640_v30  ;;  %v2184_v0 = vpop.eup %2183  ;;  %v1385_v5 = vmul.f32 %v2182_v57, %v2642_v31  ;;  %v452_v8 = vmul.f32 %v2182_v57, %v2647_v42 }
  0xf1   : > { %930 = vadd.xlane.f32.xlu0 %v921_v54  ;;  %1395 = vadd.xlane.f32.xlu2 %v1384_v55  ;;  %2185 = vtanh.f32 %v431_v62  ;;  %v925_v3 = vmul.f32 %v2184_v0, %v2640_v30  ;;  %v1386_v11 = vmul.f32 %v2184_v0, %v2642_v31  ;;  %v453_v14 = vmul.f32 %v2184_v0, %v2647_v42 }
  0xf2   : > { %932 = vadd.xlane.f32.xlu1 %v922_v53  ;;  %v474_v54 = vstv %s2675_s20  ;;  %s1872_s20 = sshll.u32 %s1868_s23, 4  ;;  %s1873_s20 = int_to_ptr.hbm [resolvable:$true] %s1872_s20 }
  0xf3   : > { %s2399_s24 = sshra.s32 %s1873_s20, 4  ;;  %s2400_s24 = int_to_ptr.hbm [resolvable:$true] %s2399_s24 }
  0xf4   : > { %s2401_s17 = scalar_lea.hbm %s2400_s24, 8  ;;  %p2406_p11 = scmp.lt.s32.totalorder %s2400_s24, %s3777_s7 }
  0xf5   : > { %p2402_p1 = scmp.ne.s32.totalorder %s2400_s24, %s2401_s17  ;;  %p2407_p2 = scmp.lt.s32.totalorder %s2405_s5, %s2401_s17 }
  0xf7   : > { %v2186_v6 = vpop.eup %2185  ;;  %p2403_p4 = pnand %p2402_p1, %p2579_p3  ;;  %p2408_p9 = por %p2407_p2, %p2406_p11 }
  0xf8   : > { %v926_v7 = vmul.f32 %v2186_v6, %v2640_v30  ;;  %v1387_v12 = vmul.f32 %v2186_v6, %v2642_v31  ;;  %v454_v15 = vmul.f32 %v2186_v6, %v2647_v42  ;;  %v2679_v31 = vand.u32 127, %v492_v28 }
  0xf9   : > { %936 = vadd.xlane.f32.xlu0 %v924_v58  ;;  %1391 = vadd.xlane.f32.xlu2 %v1382_v60  ;;  %p2404_p8 = pneg %p2403_p4 }
  0xfa   : > { %1393 = vadd.xlane.f32.xlu1 %v1383_v61  ;;  %3817 = vst [vmem:[#allocation13_spill] sm:$0xff] %v2679_v31 }
  0xfb   : > { %p2409_p10 = pnand %p2408_p9, %p2404_p8 }
 0x101   : > { %458 = vadd.xlane.f32.xlu0 %v449_v4  ;;  %1397 = vadd.xlane.f32.xlu2 %v1385_v5 }
 0x102   : > { %938 = vadd.xlane.f32.xlu1 %v925_v3 }
 0x109   : > { %464 = vadd.xlane.f32.xlu0 %v452_v8  ;;  %470 = vadd.xlane.f32.xlu2 %v455_v9 }
 0x10a   : > { %940 = vadd.xlane.f32.xlu1 %v926_v7 }
 0x111   : > { %460 = vadd.xlane.f32.xlu0 %v450_v10  ;;  %1399 = vadd.xlane.f32.xlu2 %v1386_v11 }
 0x112   : > { %1401 = vadd.xlane.f32.xlu1 %v1387_v12 }
 0x119   : > { %1403 = vadd.xlane.f32.xlu0 %v1388_v13  ;;  %466 = vadd.xlane.f32.xlu2 %v453_v14 }
 0x11a   : > { %468 = vadd.xlane.f32.xlu1 %v454_v15 }
 0x154   : > { %v1390_v16 = vpop.xlane.xlu2 %1389  ;;  %v929_v17 = vpop.xlane.xlu0 %928 }
 0x155   : > { %v935_v18 = vpop.xlane.xlu1 %934  ;;  %v2681_v32 = vadd.f32 %v946_v29, %v929_v17  ;;  %v2712_v56 = vadd.f32 %v1407_v45, %v1390_v16 }
 0x156   : > { %v2693_v41 = vadd.f32 %v946_v29, %v935_v18 }
 0x157   : > { %v964_v38 = vperm.slane %v2681_v32, %v2679_v31  ;;  %v1425_v2 = vperm.slane %v2712_v56, %v2679_v31 }
 0x158   : > { %v967_v50 = vperm.slane %v2693_v41, %v2679_v31 }
 0x15c   : > { %v2673_v19 = vpop.xlane.xlu0 %462  ;;  %v457_v20 = vpop.xlane.xlu2 %456 }
 0x15d   : > { %v943_v21 = vpop.xlane.xlu1 %942  ;;  %v2730_v3 = vadd.f32 %v474_v54, %v457_v20  ;;  %v2748_v16 = vadd.f32 %v474_v54, %v2673_v19 }
 0x15e   : > { %v2698_v44 = vadd.f32 %v946_v29, %v943_v21 }
 0x15f   : > { %v494_v17 = vperm.slane %v2730_v3, %v2679_v31 }
 0x160   : > { %v971_v57 = vperm.slane %v2698_v44, %v2679_v31 }
 0x164   : > { %v931_v22 = vpop.xlane.xlu0 %930  ;;  %v1396_v23 = vpop.xlane.xlu2 %1395 }
 0x165   : > { %v933_v24 = vpop.xlane.xlu1 %932  ;;  %v2677_v30 = vadd.f32 %v946_v29, %v931_v22  ;;  %v2733_v5 = vadd.f32 %v1407_v45, %v1396_v23 }
 0x166   : > { %v2683_v33 = vadd.f32 %v946_v29, %v933_v24 }
 0x167   : > { %v965_v36 = vperm.slane %v2677_v30, %v2679_v31  ;;  %v1428_v23 = vperm.slane %v2733_v5, %v2679_v31 }
 0x168   : > { %v966_v39 = vperm.slane %v2683_v33, %v2679_v31 }
 0x169   : > { %v972_v42 = vsel %vm502_vm0, %v965_v36, %v964_v38 }
 0x16a   : > { %v973_v46 = vsel %vm504_vm1, %v966_v39, %v972_v42 }
 0x16b   : > { %v974_v58 = vsel %vm3801_vm2, %v967_v50, %v973_v46 }
 0x16c   : > { %v937_v25 = vpop.xlane.xlu0 %936  ;;  %v1392_v26 = vpop.xlane.xlu2 %1391 }
 0x16d   : > { %v1394_v27 = vpop.xlane.xlu1 %1393  ;;  %v2691_v40 = vadd.f32 %v946_v29, %v937_v25  ;;  %v2705_v51 = vadd.f32 %v1407_v45, %v1392_v26 }
 0x16e   : > { %v2717_v59 = vadd.f32 %v1407_v45, %v1394_v27  ;;  %v497_v27 = vperm.slane %v2748_v16, %v2679_v31 }
 0x16f   : > { %v968_v47 = vperm.slane %v2691_v40, %v2679_v31  ;;  %v1426_v62 = vperm.slane %v2705_v51, %v2679_v31 }
 0x170   : > { %v1427_v6 = vperm.slane %v2717_v59, %v2679_v31 }
 0x171   : > { %v975_v60 = vsel %vm3797_vm3, %v968_v47, %v974_v58  ;;  %v1433_v11 = vsel %vm502_vm0, %v1426_v62, %v1425_v2  ;;  %v2461_v2 = vmov 0  }
 0x172   : > { %v1434_v20 = vsel %vm504_vm1, %v1427_v6, %v1433_v11  ;;  %2168 = vset.pattern.permute.xlu2 %v2461_v2  ;;  %2167 = vset.pattern.permute.xlu1 %v2461_v2 }
 0x173   : > { %v1435_v28 = vsel %vm3801_vm2, %v1428_v23, %v1434_v20  ;;  %2166 = vset.pattern.permute.xlu0 %v2461_v2 }
 0x174   : > { %v459_v34 = vpop.xlane.xlu0 %458  ;;  %v1398_v35 = vpop.xlane.xlu2 %1397 }
 0x175   : > { %v939_v37 = vpop.xlane.xlu1 %938  ;;  %v2724_v63 = vadd.f32 %v474_v54, %v459_v34  ;;  %v2737_v7 = vadd.f32 %v1407_v45, %v1398_v35 }
 0x176   : > { %v2696_v43 = vadd.f32 %v946_v29, %v939_v37 }
 0x177   : > { %v495_v12 = vperm.slane %v2724_v63, %v2679_v31  ;;  %v1429_v21 = vperm.slane %v2737_v7, %v2679_v31 }
 0x178   : > { %v969_v52 = vperm.slane %v2696_v43, %v2679_v31 }
 0x179   : > { %v503_v24 = vsel %vm502_vm0, %v495_v12, %v494_v17 }
 0x17a   : > { %v976_v0 = vsel %vm3789_vm4, %v969_v52, %v975_v60 }
 0x17c   : > { %v465_v48 = vpop.xlane.xlu0 %464  ;;  %v471_v49 = vpop.xlane.xlu2 %470 }
 0x17d   : > { %v941_v53 = vpop.xlane.xlu1 %940  ;;  %v2764_v25 = vadd.f32 %v474_v54, %v465_v48  ;;  %v2771_v34 = vadd.f32 %v474_v54, %v471_v49 }
 0x17e   : > { %v2710_v55 = vadd.f32 %v946_v29, %v941_v53  ;;  %v1436_v29 = vsel %vm3797_vm3, %v1429_v21, %v1435_v28 }
 0x17f   : > { %v498_v48 = vperm.slane %v2764_v25, %v2679_v31  ;;  %v501_v58 = vperm.slane %v2771_v34, %v2679_v31 }
 0x180   : > { %v970_v61 = vperm.slane %v2710_v55, %v2679_v31 }
 0x182   : > { %v977_v1 = vsel %vm3787_vm5, %v970_v61, %v976_v0 }
 0x183   : > { %v978_v4 = vsel %vm3786_vm6, %v971_v57, %v977_v1 }
 0x184   : > { %v980_v8 = vsel %vm3784_vm7, %v978_v4, -inf  ;;  %v461_v9 = vpop.xlane.xlu0 %460  ;;  %v1400_v10 = vpop.xlane.xlu2 %1399 }
 0x185   : > { %v1402_v13 = vpop.xlane.xlu1 %1401  ;;  %981 = vmax.xlane.f32.xlu0 %v980_v8  ;;  %v2743_v14 = vadd.f32 %v474_v54, %v461_v9  ;;  %v2745_v15 = vadd.f32 %v1407_v45, %v1400_v10 }
 0x186   : > { %v2757_v22 = vadd.f32 %v1407_v45, %v1402_v13 }
 0x187   : > { %v496_v18 = vperm.slane %v2743_v14, %v2679_v31  ;;  %v1430_v19 = vperm.slane %v2745_v15, %v2679_v31 }
 0x188   : > { %v1431_v35 = vperm.slane %v2757_v22, %v2679_v31 }
 0x189   : > { %v505_v26 = vsel %vm504_vm1, %v496_v18, %v503_v24  ;;  %v1437_v47 = vsel %vm3789_vm4, %v1430_v19, %v1436_v29 }
 0x18a   : > { %v507_v38 = vsel %vm3801_vm2, %v497_v27, %v505_v26 }
 0x18b   : > { %v509_v57 = vsel %vm3797_vm3, %v498_v48, %v507_v38 }
 0x18c   : > { %v1404_v36 = vpop.xlane.xlu0 %1403  ;;  %v467_v37 = vpop.xlane.xlu2 %466 }
 0x18d   : > { %v469_v39 = vpop.xlane.xlu1 %468  ;;  %v2776_v42 = vadd.f32 %v1407_v45, %v1404_v36  ;;  %v2778_v46 = vadd.f32 %v474_v54, %v467_v37  ;;  %v1438_v45 = vsel %vm3787_vm5, %v1431_v35, %v1437_v47 }
 0x18e   : > { %v2783_v50 = vadd.f32 %v474_v54, %v469_v39 }
 0x18f   : > { %v1432_v49 = vperm.slane %v2776_v42, %v2679_v31  ;;  %v499_v52 = vperm.slane %v2778_v46, %v2679_v31 }
 0x190   : > { %v500_v53 = vperm.slane %v2783_v50, %v2679_v31 }
 0x191   : > { %v1439_v60 = vsel %vm3786_vm6, %v1432_v49, %v1438_v45  ;;  %v511_v54 = vsel %vm3789_vm4, %v499_v52, %v509_v57 }
 0x192   : > { %v1441_v61 = vsel %vm3784_vm7, %v1439_v60, -inf  ;;  %v513_v62 = vsel %vm3787_vm5, %v500_v53, %v511_v54 }
 0x193   : > { %1442 = vmax.xlane.f32.xlu1 %v1441_v61  ;;  %v515_v0 = vsel %vm3786_vm6, %v501_v58, %v513_v62 }
 0x194   : > { %v518_v1 = vsel %vm3784_vm7, %v515_v0, -inf }
 0x195   : > { %519 = vmax.xlane.f32.xlu2 %v518_v1 }
 0x1f8   : > { %v2801_v4 = vpop.xlane.xlu0 %981 }
 0x1f9   : > { %v984_v6 = vperm.slane %v2801_v4, 0  ;;  %v985_v8 = vperm.slane %v2801_v4, 1  ;;  %v987_v11 = vperm.slane %v2801_v4, 3  ;;  %v986_v12 = vperm.slane %v2801_v4, 2 }
 0x1fa   : > { %v988_v29 = vperm.slane %v2801_v4, 4  ;;  %v989_v53 = vperm.slane %v2801_v4, 5  ;;  %v990_v1 = vperm.slane %v2801_v4, 6 }
 0x1fb   : > { %v1000_v9 = vsub.f32 %v2681_v32, %v984_v6  ;;  %v1001_v10 = vsub.f32 %v2677_v30, %v985_v8  ;;  %v1003_v18 = vsub.f32 %v2693_v41, %v987_v11  ;;  %v1002_v20 = vsub.f32 %v2683_v33, %v986_v12 }
 0x1fd   : > { %v1008_v13 = vmul.f32 1.442695, %v1000_v9  ;;  %v1010_v17 = vmul.f32 1.442695, %v1001_v10  ;;  %v1014_v21 = vmul.f32 1.442695, %v1003_v18 }
 0x1fe   : > { %v1012_v23 = vmul.f32 1.442695, %v1002_v20 }
 0x1ff   : > { %2187 = vpow2.f32 %v1008_v13 }
 0x200   : > { %2189 = vpow2.f32 %v1010_v17  ;;  %v991_v17 = vperm.slane %v2801_v4, 7 }
 0x201   : > { %2191 = vpow2.f32 %v1014_v21 }
 0x202   : > { %2193 = vpow2.f32 %v1012_v23 }
 0x205   : > { %v2811_v24 = vpop.eup %2187 }
 0x206   : > { %v2813_v19 = vpop.eup %2189  ;;  %1033 = vperm.xlu1 %2167, %v2811_v24   ;;  %v2816_v30 = vpop.xlane.xlu1 %1442 }
 0x207   : > { %1036 = vperm.xlu2 %2168, %v2813_v19   ;;  %v1446_v32 = vperm.slane %v2816_v30, 1  ;;  %v1445_v41 = vperm.slane %v2816_v30, 0  ;;  %v1447_v39 = vperm.slane %v2816_v30, 2  ;;  %v2830_v47 = vpop.eup %2191  ;;  %v1449_v10 = vperm.slane %v2816_v30, 4 }
 0x208   : > { %v2821_v26 = vpop.xlane.xlu2 %519  ;;  %v2832_v49 = vpop.eup %2193 }
 0x209   : > { %v1462_v33 = vsub.f32 %v2705_v51, %v1446_v32  ;;  %v1461_v27 = vsub.f32 %v2712_v56, %v1445_v41  ;;  %v522_v28 = vperm.slane %v2821_v26, 0  ;;  %v523_v38 = vperm.slane %v2821_v26, 1 }
 0x20a   : > { %v1004_v51 = vsub.f32 %v2691_v40, %v988_v29  ;;  %v524_v58 = vperm.slane %v2821_v26, 2  ;;  %v1448_v40 = vperm.slane %v2816_v30, 3  ;;  %v525_v6 = vperm.slane %v2821_v26, 3 }
 0x20b   : > { %v1471_v35 = vmul.f32 1.442695, %v1462_v33  ;;  %v1469_v36 = vmul.f32 1.442695, %v1461_v27  ;;  %v538_v37 = vsub.f32 %v2730_v3, %v522_v28  ;;  %v539_v56 = vsub.f32 %v2724_v63, %v523_v38 }
 0x20c   : > { %v1463_v3 = vsub.f32 %v2717_v59, %v1447_v39  ;;  %v1016_v52 = vmul.f32 1.442695, %v1004_v51  ;;  %v1005_v59 = vsub.f32 %v2696_v43, %v989_v53  ;;  %v540_v63 = vsub.f32 %v2743_v14, %v524_v58 }
 0x20d   : > { %2195 = vpow2.f32 %v1471_v35  ;;  %v546_v48 = vmul.f32 1.442695, %v538_v37  ;;  %v548_v57 = vmul.f32 1.442695, %v539_v56  ;;  %v1464_v62 = vsub.f32 %v2733_v5, %v1448_v40 }
 0x20e   : > { %1042 = vperm.xlu1 %2167, %v2830_v47   ;;  %2197 = vpow2.f32 %v1469_v36  ;;  %v1473_v54 = vmul.f32 1.442695, %v1463_v3  ;;  %v1018_v0 = vmul.f32 1.442695, %v1005_v59  ;;  %v550_v2 = vmul.f32 1.442695, %v540_v63 }
 0x20f   : > { %1039 = vperm.xlu2 %2168, %v2832_v49   ;;  %2199 = vpow2.f32 %v546_v48  ;;  %v1475_v9 = vmul.f32 1.442695, %v1464_v62  ;;  %v1006_v5 = vsub.f32 %v2710_v55, %v990_v1  ;;  %v541_v14 = vsub.f32 %v2748_v16, %v525_v6 }
 0x210   : > { %2201 = vpow2.f32 %v1016_v52  ;;  %v1465_v12 = vsub.f32 %v2737_v7, %v1449_v10  ;;  %v526_v20 = vperm.slane %v2821_v26, 4  ;;  %v1450_v32 = vperm.slane %v2816_v30, 5 }
 0x211   : > { %2203 = vpow2.f32 %v548_v57  ;;  %v1020_v13 = vmul.f32 1.442695, %v1006_v5  ;;  %v552_v18 = vmul.f32 1.442695, %v541_v14  ;;  %v1007_v7 = vsub.f32 %v2698_v44, %v991_v17 }
 0x212   : > { %2205 = vpow2.f32 %v1473_v54  ;;  %v1477_v23 = vmul.f32 1.442695, %v1465_v12  ;;  %v542_v16 = vsub.f32 %v2764_v25, %v526_v20  ;;  %v1466_v4 = vsub.f32 %v2745_v15, %v1450_v32 }
 0x213   : > { %v2840_v45 = vpop.eup %2195  ;;  %2207 = vpow2.f32 %v1018_v0  ;;  %v1022_v33 = vmul.f32 1.442695, %v1007_v7  ;;  %v1452_v27 = vperm.slane %v2816_v30, 7  ;;  %v1451_v29 = vperm.slane %v2816_v30, 6 }
 0x214   : > { %v2843_v60 = vpop.eup %2197  ;;  %2209 = vpow2.f32 %v550_v2  ;;  %v554_v28 = vmul.f32 1.442695, %v542_v16  ;;  %v1479_v36 = vmul.f32 1.442695, %v1466_v4  ;;  %v527_v37 = vperm.slane %v2821_v26, 5 }
 0x215   : > { %v2846_v61 = vpop.eup %2199  ;;  %2211 = vpow2.f32 %v1475_v9  ;;  %v1468_v15 = vsub.f32 %v2776_v42, %v1452_v27  ;;  %v1467_v25 = vsub.f32 %v2757_v22, %v1451_v29  ;;  %v528_v51 = vperm.slane %v2821_v26, 6 }
 0x216   : > { %1497 = vperm.xlu1 %2167, %v2840_v45   ;;  %571 = vperm.xlu0 %2166, %v2846_v61   ;;  %v2856_v8 = vpop.eup %2201  ;;  %2213 = vpow2.f32 %v1020_v13  ;;  %v543_v30 = vsub.f32 %v2778_v46, %v527_v37  ;;  %v529_v52 = vperm.slane %v2821_v26, 7 }
 0x217   : > { %1494 = vperm.xlu2 %2168, %v2843_v60   ;;  %v2859_v43 = vpop.eup %2203  ;;  %2215 = vpow2.f32 %v552_v18  ;;  %v1483_v39 = vmul.f32 1.442695, %v1468_v15  ;;  %v1481_v48 = vmul.f32 1.442695, %v1467_v25  ;;  %v544_v22 = vsub.f32 %v2783_v50, %v528_v51 }
 0x218   : > { %v2861_v11 = vpop.eup %2205  ;;  %2217 = vpow2.f32 %v1477_v23  ;;  %v556_v3 = vmul.f32 1.442695, %v543_v30  ;;  %v545_v46 = vsub.f32 %v2771_v34, %v529_v52 }
 0x219   : > { %v2871_v21 = vpop.eup %2207  ;;  %2219 = vpow2.f32 %v1022_v33  ;;  %v558_v57 = vmul.f32 1.442695, %v544_v22 }
 0x21a   : > { %v2874_v55 = vpop.eup %2209  ;;  %2221 = vpow2.f32 %v554_v28  ;;  %v560_v26 = vmul.f32 1.442695, %v545_v46 }
 0x21b   : > { %v2876_v41 = vpop.eup %2211  ;;  %2223 = vpow2.f32 %v1479_v36 }
 0x21c   : > { %v2886_v35 = vpop.eup %2213  ;;  %2225 = vpow2.f32 %v1483_v39 }
 0x21d   : > { %v2889_v44 = vpop.eup %2215  ;;  %2227 = vpow2.f32 %v1481_v48 }
 0x21e   : > { %574 = vperm.xlu1 %2167, %v2859_v43   ;;  %1045 = vperm.xlu0 %2166, %v2856_v8   ;;  %3818 = vst [vmem:[#allocation14_spill] sm:$0xff] %v2889_v44  ;;  %v2891_v38 = vpop.eup %2217  ;;  %2229 = vpow2.f32 %v556_v3 }
 0x21f   : > { %1500 = vperm.xlu2 %2168, %v2861_v11   ;;  %3819 = vst [vmem:[#allocation15_spill] sm:$0xff] %v2891_v38  ;;  %v2900_v56 = vpop.eup %2219  ;;  %2231 = vpow2.f32 %v558_v57 }
 0x220   : > { %3820 = vst [vmem:[#allocation16_spill] sm:$0xff] %v2900_v56  ;;  %v2903_v53 = vpop.eup %2221  ;;  %2233 = vpow2.f32 %v560_v26 }
 0x221   : > { %3821 = vst [vmem:[#allocation17_spill] sm:$0xff] %v2903_v53  ;;  %v2905_v42 = vpop.eup %2223 }
 0x222   : > { %3822 = vst [vmem:[#allocation18_spill] sm:$0xff] %v2905_v42  ;;  %v2912_v58 = vpop.eup %2225 }
 0x223   : > { %3823 = vst [vmem:[#allocation19_spill] sm:$0xff] %v2912_v58  ;;  %v2914_v54 = vpop.eup %2227 }
 0x224   : > { %3824 = vst [vmem:[#allocation20_spill] sm:$0xff] %v2914_v54  ;;  %v2916_v40 = vpop.eup %2229 }
 0x225   : > { %3825 = vst [vmem:[#allocation21_spill] sm:$0xff] %v2916_v40  ;;  %v2921_v50 = vpop.eup %2231 }
 0x226   : > { %577 = vperm.xlu1 %2167, %v2874_v55   ;;  %1048 = vperm.xlu0 %2166, %v2871_v21   ;;  %3826 = vst [vmem:[#allocation22_spill] sm:$0xff] %v2921_v50  ;;  %v2923_v59 = vpop.eup %2233 }
 0x227   : > { %1503 = vperm.xlu2 %2168, %v2876_v41   ;;  %3827 = vst [vmem:[#allocation23_spill] sm:$0xff] %v2923_v59 }
 0x22e   : > { %580 = vperm.xlu1 %2167, %v2889_v44   ;;  %1051 = vperm.xlu0 %2166, %v2886_v35  }
 0x22f   : > { %1506 = vperm.xlu2 %2168, %v2891_v38  }
 0x236   : > { %583 = vperm.xlu1 %2167, %v2903_v53   ;;  %1054 = vperm.xlu0 %2166, %v2900_v56  }
 0x237   : > { %1509 = vperm.xlu2 %2168, %v2905_v42  }
 0x23e   : > { %1515 = vperm.xlu1 %2167, %v2912_v58   ;;  %1512 = vperm.xlu0 %2166, %v2914_v54  }
 0x23f   : > { %586 = vperm.xlu2 %2168, %v2916_v40  }
 0x246   : > { %589 = vperm.xlu0 %2166, %v2921_v50  }
 0x247   : > { %592 = vperm.xlu2 %2168, %v2923_v59  }
 0x261   : > { %v1037_v34 = vpop.permute.xlu2 %1036 }
 0x262   : > { %v1057_v32 = vperm.slane %v1037_v34, %v2679_v31 }
 0x269   : > { %v1040_v63 = vpop.permute.xlu2 %1039 }
 0x26a   : > { %v1058_v33 = vperm.slane %v1040_v63, %v2679_v31 }
 0x271   : > { %v1495_v0 = vpop.permute.xlu2 %1494 }
 0x272   : > { %v1517_v36 = vperm.slane %v1495_v0, %v2679_v31 }
 0x278   : > { %v1034_v62 = vpop.permute.xlu1 %1033 }
 0x279   : > { %v1501_v2 = vpop.permute.xlu2 %1500  ;;  %v1056_v18 = vperm.slane %v1034_v62, %v2679_v31 }
 0x27a   : > { %v1519_v3 = vperm.slane %v1501_v2, %v2679_v31 }
 0x27b   : > { %v1064_v7 = vsel %vm502_vm0, %v1057_v32, %v1056_v18 }
 0x27c   : > { %v1065_v37 = vsel %vm504_vm1, %v1058_v33, %v1064_v7 }
 0x280   : > { %v1043_v1 = vpop.permute.xlu1 %1042 }
 0x281   : > { %v1504_v10 = vpop.permute.xlu2 %1503  ;;  %v1059_v16 = vperm.slane %v1043_v1, %v2679_v31 }
 0x282   : > { %v1520_v34 = vperm.slane %v1504_v10, %v2679_v31 }
 0x283   : > { %v1066_v25 = vsel %vm3801_vm2, %v1059_v16, %v1065_v37 }
 0x288   : > { %v1498_v6 = vpop.permute.xlu1 %1497  ;;  %v572_v9 = vpop.permute.xlu0 %571 }
 0x289   : > { %v1507_v17 = vpop.permute.xlu2 %1506  ;;  %v1518_v27 = vperm.slane %v1498_v6, %v2679_v31  ;;  %v594_v32 = vperm.slane %v572_v9, %v2679_v31 }
 0x28a   : > { %v1521_v2 = vperm.slane %v1507_v17, %v2679_v31 }
 0x28b   : > { %v1525_v30 = vsel %vm502_vm0, %v1518_v27, %v1517_v36 }
 0x28c   : > { %v1526_v57 = vsel %vm504_vm1, %v1519_v3, %v1525_v30 }
 0x28d   : > { %v1527_v0 = vsel %vm3801_vm2, %v1520_v34, %v1526_v57 }
 0x28e   : > { %v1528_v18 = vsel %vm3797_vm3, %v1521_v2, %v1527_v0 }
 0x290   : > { %v575_v5 = vpop.permute.xlu1 %574  ;;  %v1046_v14 = vpop.permute.xlu0 %1045 }
 0x291   : > { %v1510_v4 = vpop.permute.xlu2 %1509  ;;  %v1060_v28 = vperm.slane %v1046_v14, %v2679_v31  ;;  %v595_v6 = vperm.slane %v575_v5, %v2679_v31 }
 0x292   : > { %v1522_v1 = vperm.slane %v1510_v4, %v2679_v31 }
 0x293   : > { %v1067_v39 = vsel %vm3797_vm3, %v1060_v28, %v1066_v25  ;;  %v602_v33 = vsel %vm502_vm0, %v595_v6, %v594_v32 }
 0x294   : > { %v1529_v7 = vsel %vm3789_vm4, %v1522_v1, %v1528_v18 }
 0x298   : > { %v578_v12 = vpop.permute.xlu1 %577  ;;  %v1049_v13 = vpop.permute.xlu0 %1048 }
 0x299   : > { %v1061_v29 = vperm.slane %v1049_v13, %v2679_v31  ;;  %v587_v62 = vpop.permute.xlu2 %586 }
 0x29a   : > { %v599_v36 = vperm.slane %v587_v62, %v2679_v31 }
 0x29b   : > { %v1068_v52 = vsel %vm3789_vm4, %v1061_v29, %v1067_v39 }
 0x2a0   : > { %v581_v20 = vpop.permute.xlu1 %580  ;;  %v1052_v23 = vpop.permute.xlu0 %1051 }
 0x2a1   : > { %v1062_v15 = vperm.slane %v1052_v23, %v2679_v31  ;;  %v596_v23 = vperm.slane %v578_v12, %v2679_v31  ;;  %v597_v16 = vperm.slane %v581_v20, %v2679_v31  ;;  %v593_v29 = vpop.permute.xlu2 %592 }
 0x2a2   : > { %v601_v25 = vperm.slane %v593_v29, %v2679_v31 }
 0x2a3   : > { %v1069_v46 = vsel %vm3787_vm5, %v1062_v15, %v1068_v52  ;;  %v603_v12 = vsel %vm504_vm1, %v596_v23, %v602_v33 }
 0x2a4   : > { %v604_v9 = vsel %vm3801_vm2, %v597_v16, %v603_v12 }
 0x2a8   : > { %v584_v48 = vpop.permute.xlu1 %583  ;;  %v1055_v51 = vpop.permute.xlu0 %1054 }
 0x2a9   : > { %v1063_v22 = vperm.slane %v1055_v51, %v2679_v31  ;;  %v598_v17 = vperm.slane %v584_v48, %v2679_v31 }
 0x2ab   : > { %v1070_v26 = vsel %vm3786_vm6, %v1063_v22, %v1069_v46  ;;  %v605_v20 = vsel %vm3797_vm3, %v598_v17, %v604_v9 }
 0x2ac   : > { %v1072_v63 = vsel %vm3784_vm7, %v1070_v26, 0.0  ;;  %v606_v30 = vsel %vm3789_vm4, %v599_v36, %v605_v20 }
 0x2ad   : > { %1073 = vadd.xlane.f32.xlu1 %v1072_v63 }
 0x2b0   : > { %v1516_v14 = vpop.permute.xlu1 %1515  ;;  %v1513_v13 = vpop.permute.xlu0 %1512 }
 0x2b1   : > { %v1523_v10 = vperm.slane %v1513_v13, %v2679_v31  ;;  %v1524_v4 = vperm.slane %v1516_v14, %v2679_v31 }
 0x2b3   : > { %v1530_v5 = vsel %vm3787_vm5, %v1523_v10, %v1529_v7 }
 0x2b4   : > { %v1531_v27 = vsel %vm3786_vm6, %v1524_v4, %v1530_v5 }
 0x2b5   : > { %v1533_v28 = vsel %vm3784_vm7, %v1531_v27, 0.0 }
 0x2b6   : > { %1534 = vadd.xlane.f32.xlu0 %v1533_v28 }
 0x2b8   : > { %v590_v37 = vpop.permute.xlu0 %589 }
 0x2b9   : > { %v600_v15 = vperm.slane %v590_v37, %v2679_v31 }
 0x2bb   : > { %v607_v39 = vsel %vm3787_vm5, %v600_v15, %v606_v30 }
 0x2bc   : > { %v608_v48 = vsel %vm3786_vm6, %v601_v25, %v607_v39 }
 0x2bd   : > { %v610_v51 = vsel %vm3784_vm7, %v608_v48, 0.0 }
 0x2be   : > { %611 = vadd.xlane.f32.xlu2 %v610_v51 }
 0x320   : > { %v1074_v3 = vpop.xlane.xlu1 %1073 }
 0x321   : > { %v2975_v52 = vperm.slane %v1074_v3, 0  ;;  %v2977_v22 = vperm.slane %v1074_v3, 1  ;;  %v2979_v46 = vperm.slane %v1074_v3, 2  ;;  %v2981_v57 = vperm.slane %v1074_v3, 3 }
 0x322   : > { %v2984_v26 = vperm.slane %v1074_v3, 4  ;;  %v2988_v63 = vperm.slane %v1074_v3, 5  ;;  %v2992_v0 = vperm.slane %v1074_v3, 6  ;;  %v2995_v1 = vperm.slane %v1074_v3, 7 }
 0x323   : > { %2235 = vrcp.f32 %v2975_v52  ;;  %v1103_v34 = vand.u32 2147483648, %v2975_v52  ;;  %v1133_v62 = vand.u32 2147483648, %v2979_v46  ;;  %v1118_v2 = vand.u32 2147483648, %v2977_v22 }
 0x324   : > { %2237 = vrcp.f32 %v2977_v22  ;;  %v1101_v6 = vand.u32 2147483647, %v2975_v52  ;;  %v1131_v13 = vand.u32 2147483647, %v2979_v46  ;;  %v1116_v32 = vand.u32 2147483647, %v2977_v22 }
 0x325   : > { %2239 = vrcp.f32 %v2979_v46  ;;  %v3000_v14 = vor.u32 1.1754944e-38, %v1103_v34  ;;  %v3006_v10 = vor.u32 1.1754944e-38, %v1133_v62  ;;  %v1146_v7 = vand.u32 2147483647, %v2981_v57 }
 0x326   : > { %2241 = vrcp.f32 %v2981_v57  ;;  %vm1097_vm8 = vweird.f32 %v2975_v52  ;;  %v3025_v12 = vor.u32 1.1754944e-38, %v1118_v2  ;;  %v1148_v28 = vand.u32 2147483648, %v2981_v57 }
 0x327   : > { %2243 = vrcp.f32 %v2984_v26  ;;  %vm1127_vm9 = vweird.f32 %v2979_v46  ;;  %vm1112_vm10 = vweird.f32 %v2977_v22  ;;  %vm3050_vm11 = vcmp.eq.f32.partialorder %v1101_v6, 8.507059e+37 }
 0x328   : > { %2245 = vrcp.f32 %v2988_v63  ;;  %vm3061_vm12 = vcmp.eq.f32.partialorder %v1131_v13, 8.507059e+37  ;;  %vm3065_vm13 = vcmp.eq.f32.partialorder %v1116_v32, 8.507059e+37  ;;  %vm1142_vm7 = vweird.f32 %v2981_v57 }
 0x329   : > { %v3003_v18 = vpop.eup %2235  ;;  %v1535_v23 = vpop.xlane.xlu0 %1534  ;;  %2247 = vrcp.f32 %v2992_v0  ;;  %vm3095_vm4 = vcmp.eq.f32.partialorder %v1146_v7, 8.507059e+37  ;;  %v1149_v40 = vor.u32 1.1754944e-38, %v1148_v28 }
 0x32a   : > { %v3010_v16 = vpop.eup %2237  ;;  %v3013_v4 = vperm.slane %v1535_v23, 0  ;;  %v3015_v17 = vperm.slane %v1535_v23, 1  ;;  %v3017_v5 = vperm.slane %v1535_v23, 2  ;;  %2249 = vrcp.f32 %v2995_v1 }
 0x32b   : > { %v3019_v33 = vpop.eup %2239  ;;  %v3022_v27 = vperm.slane %v1535_v23, 3  ;;  %v3030_v29 = vperm.slane %v1535_v23, 4  ;;  %v1093_v20 = vmul.f32 %v3003_v18, %v2975_v52  ;;  %v3037_v37 = vperm.slane %v1535_v23, 5 }
 0x32c   : > { %v3028_v9 = vpop.eup %2241  ;;  %2251 = vrcp.f32 %v3013_v4  ;;  %v1123_v15 = vmul.f32 %v3019_v33, %v2979_v46  ;;  %v1108_v25 = vmul.f32 %v3010_v16, %v2977_v22  ;;  %v3047_v39 = vperm.slane %v1535_v23, 6 }
 0x32d   : > { %3828 = vst [vmem:[#allocation24_spill] sm:$0xff] %v3037_v37  ;;  %2253 = vrcp.f32 %v3015_v17  ;;  %v3045_v30 = vpop.eup %2243  ;;  %v1094_v48 = vsub.f32 1.0, %v1093_v20  ;;  %v1138_v3 = vmul.f32 %v3028_v9, %v2981_v57  ;;  %v3058_v62 = vperm.slane %v1535_v23, 7 }
 0x32e   : > { %3829 = vst [vmem:[#allocation25_spill] sm:$0xff] %v3047_v39  ;;  %2255 = vrcp.f32 %v3017_v5  ;;  %v3056_v34 = vpop.eup %2245  ;;  %v1124_v2 = vsub.f32 1.0, %v1123_v15  ;;  %v1109_v31 = vsub.f32 1.0, %v1108_v25  ;;  %vm1098_vm14 = vweird.f32 %v3003_v18 }
 0x32f   : > { %3832 = vst [vmem:[#allocation26_spill] sm:$0xff] %v3058_v62  ;;  %2257 = vrcp.f32 %v3022_v27  ;;  %v3069_v20 = vpop.eup %2247  ;;  %v1095_v59 = vmul.f32 %v3003_v18, %v1094_v48  ;;  %vm1128_vm15 = vweird.f32 %v3019_v33  ;;  %v1139_v25 = vsub.f32 1.0, %v1138_v3  ;;  %vm3112_vm3 = vmor %vm1097_vm8, %vm1098_vm14 }
 0x330   : > { %2259 = vrcp.f32 %v3030_v29  ;;  %v3075_v23 = vpop.eup %2249  ;;  %v1125_v32 = vmul.f32 %v3019_v33, %v1124_v2  ;;  %v1110_v15 = vmul.f32 %v3010_v16, %v1109_v31  ;;  %vm1113_vm6 = vweird.f32 %v3010_v16  ;;  %vm3125_vm2 = vmor %vm1127_vm9, %vm1128_vm15 }
 0x331   : > { %3837 = vst [vmem:[#allocation27_spill] sm:$0xff] %v3075_v23  ;;  %2261 = vrcp.f32 %v3037_v37  ;;  %v612_v13 = vpop.xlane.xlu2 %611  ;;  %vm1143_vm5 = vweird.f32 %v3028_v9  ;;  %v1096_v56 = vadd.f32 %v3003_v18, %v1095_v59  ;;  %v1140_v37 = vmul.f32 %v3028_v9, %v1139_v25  ;;  %vm1114_vm8 = vmor %vm1112_vm10, %vm1113_vm6 }
 0x332   : > { %v3081_v50 = vpop.eup %2251  ;;  %2263 = vrcp.f32 %v3047_v39  ;;  %v3084_v48 = vperm.slane %v612_v13, 0  ;;  %v3091_v2 = vperm.slane %v612_v13, 1  ;;  %v3093_v31 = vperm.slane %v612_v13, 2 }
 0x333   : > { %v3088_v58 = vpop.eup %2253  ;;  %2265 = vrcp.f32 %v3058_v62  ;;  %v3101_v53 = vperm.slane %v612_v13, 3  ;;  %v3103_v42 = vperm.slane %v612_v13, 4  ;;  %v3105_v39 = vperm.slane %v612_v13, 5 }
 0x334   : > { %v3099_v54 = vpop.eup %2255  ;;  %v3118_v28 = vperm.slane %v612_v13, 6  ;;  %v1126_v44 = vadd.f32 %v3019_v33, %v1125_v32  ;;  %v1111_v52 = vadd.f32 %v3010_v16, %v1110_v15  ;;  %v3133_v23 = vperm.slane %v612_v13, 7 }
 0x335   : > { %v3116_v62 = vpop.eup %2257  ;;  %2267 = vrcp.f32 %v3084_v48  ;;  %v1100_v32 = vsel %vm3112_vm3, %v3003_v18, %v1096_v56  ;;  %v1554_v46 = vmul.f32 %v3081_v50, %v3013_v4  ;;  %vm1558_vm9 = vweird.f32 %v3013_v4 }
 0x336   : > { %v3131_v38 = vpop.eup %2259  ;;  %2269 = vrcp.f32 %v3091_v2  ;;  %v1105_v13 = vsel %vm3050_vm11, %v3000_v14, %v1100_v32  ;;  %v1130_v56 = vsel %vm3125_vm2, %v3019_v33, %v1126_v44  ;;  %v1115_v22 = vsel %vm1114_vm8, %v3010_v16, %v1111_v52  ;;  %vm1144_vm2 = vmor %vm1142_vm7, %vm1143_vm5 }
 0x337   : > { %v3146_v15 = vpop.eup %2261  ;;  %2271 = vrcp.f32 %v3093_v31  ;;  %v1106_v25 = vmul.f32 %v2811_v24, %v1105_v13  ;;  %v1135_v7 = vsel %vm3061_vm12, %v3006_v10, %v1130_v56  ;;  %v1120_v14 = vsel %vm3065_vm13, %v3025_v12, %v1115_v22 }
 0x338   : > { %v3156_v18 = vpop.eup %2263  ;;  %2273 = vrcp.f32 %v3101_v53  ;;  %v1136_v44 = vmul.f32 %v2832_v49, %v1135_v7  ;;  %v1121_v16 = vmul.f32 %v2813_v19, %v1120_v14  ;;  %v1141_v33 = vadd.f32 %v3028_v9, %v1140_v37 }
 0x339   : > { %v3166_v51 = vpop.eup %2265  ;;  %2275 = vrcp.f32 %v3103_v42  ;;  %1221 = vperm.xlu1 %2167, %v1106_v25   ;;  %v1555_v24 = vsub.f32 1.0, %v1554_v46  ;;  %v1562_v10 = vand.u32 2147483647, %v3013_v4  ;;  %v1564_v12 = vand.u32 2147483648, %v3013_v4 }
 0x33a   : > { %2277 = vrcp.f32 %v3105_v39  ;;  %1227 = vperm.xlu0 %2166, %v1136_v44   ;;  %1224 = vperm.xlu2 %2168, %v1121_v16   ;;  %v1145_v19 = vsel %vm1144_vm2, %v3028_v9, %v1141_v33  ;;  %vm1559_vm3 = vweird.f32 %v3081_v50  ;;  %v1569_v49 = vmul.f32 %v3088_v58, %v3015_v17 }
 0x33b   : > { %v3184_v36 = vpop.eup %2267  ;;  %2279 = vrcp.f32 %v3118_v28  ;;  %v1150_v57 = vsel %vm3095_vm4, %v1149_v40, %v1145_v19  ;;  %v1556_v37 = vmul.f32 %v3081_v50, %v1555_v24  ;;  %vm1573_vm5 = vweird.f32 %v3015_v17  ;;  %vm1560_vm4 = vmor %vm1558_vm9, %vm1559_vm3 }
 0x33c   : > { %vm1157_vm6 = vweird.f32 %v2984_v26  ;;  %v3192_v6 = vpop.eup %2269  ;;  %vm3194_vm7 = vcmp.eq.f32.partialorder %v1562_v10, 8.507059e+37  ;;  %v1565_v59 = vor.u32 1.1754944e-38, %v1564_v12  ;;  %v1570_v52 = vsub.f32 1.0, %v1569_v49 }
 0x33d   : > { %v1577_v32 = vand.u32 2147483647, %v3015_v17  ;;  %v3199_v46 = vpop.eup %2271  ;;  %v1151_v40 = vmul.f32 %v2830_v47, %v1150_v57  ;;  %v1557_v3 = vadd.f32 %v3081_v50, %v1556_v37  ;;  %v1579_v13 = vand.u32 2147483648, %v3015_v17 }
 0x33e   : > { %v1153_v56 = vmul.f32 %v3045_v30, %v2984_v26  ;;  %v3206_v22 = vpop.eup %2273  ;;  %v1571_v25 = vmul.f32 %v3088_v58, %v1570_v52  ;;  %vm1574_vm10 = vweird.f32 %v3088_v58  ;;  %vm1158_vm11 = vweird.f32 %v3045_v30 }
 0x33f   : > { %v1163_v47 = vand.u32 2147483648, %v2984_v26  ;;  %v3216_v7 = vpop.eup %2275  ;;  %v1561_v14 = vsel %vm1560_vm4, %v3081_v50, %v1557_v3  ;;  %vm3219_vm12 = vcmp.eq.f32.partialorder %v1577_v32, 8.507059e+37  ;;  %v1584_v4 = vmul.f32 %v3099_v54, %v3017_v5  ;;  %vm1575_vm14 = vmor %vm1573_vm5, %vm1574_vm10 }
 0x340   : > { %v1154_v16 = vsub.f32 1.0, %v1153_v56  ;;  %v3225_v33 = vpop.eup %2277  ;;  %v1566_v24 = vsel %vm3194_vm7, %v1565_v59, %v1561_v14  ;;  %v1572_v10 = vadd.f32 %v3088_v58, %v1571_v25  ;;  %v1580_v12 = vor.u32 1.1754944e-38, %v1579_v13  ;;  %vm1159_vm8 = vmor %vm1157_vm6, %vm1158_vm11 }
 0x341   : > { %v3848_v19 = vand.u32 2147483647, %v2984_v26  ;;  %v3236_v49 = vpop.eup %2279  ;;  %1230 = vperm.xlu1 %2167, %v1151_v40   ;;  %v1567_v57 = vmul.f32 %v2843_v60, %v1566_v24  ;;  %v1164_v9 = vor.u32 1.1754944e-38, %v1163_v47  ;;  %v1585_v59 = vsub.f32 1.0, %v1584_v4 }
 0x342   : > { %v1155_v37 = vmul.f32 %v3045_v30, %v1154_v16  ;;  %v1576_v52 = vsel %vm1575_vm14, %v3088_v58, %v1572_v10  ;;  %vm1589_vm15 = vweird.f32 %v3099_v54  ;;  %v1594_v32 = vand.u32 2147483648, %v3017_v5 }
 0x343   : > { %vm3232_vm13 = vcmp.eq.f32.partialorder %v3848_v19, 8.507059e+37  ;;  %v631_v40 = vmul.f32 %v3184_v36, %v3084_v48  ;;  %1682 = vperm.xlu0 %2166, %v1567_v57   ;;  %v1581_v60 = vsel %vm3219_vm12, %v1580_v12, %v1576_v52  ;;  %v1586_v3 = vmul.f32 %v3099_v54, %v1585_v59 }
 0x344   : > { %v1156_v17 = vadd.f32 %v3045_v30, %v1155_v37  ;;  %v1592_v13 = vand.u32 2147483647, %v3017_v5  ;;  %v1582_v56 = vmul.f32 %v2840_v45, %v1581_v60  ;;  %vm1588_vm9 = vweird.f32 %v3017_v5 }
 0x345   : > { %v1595_v58 = vor.u32 1.1754944e-38, %v1594_v32  ;;  %v632_v25 = vsub.f32 1.0, %v631_v40  ;;  %v1587_v14 = vadd.f32 %v3099_v54, %v1586_v3  ;;  %vm636_vm2 = vweird.f32 %v3184_v36  ;;  %vm1590_vm3 = vmor %vm1588_vm9, %vm1589_vm15 }
 0x346   : > { %v1160_v47 = vsel %vm1159_vm8, %v3045_v30, %v1156_v17  ;;  %v639_v44 = vand.u32 2147483647, %v3084_v48  ;;  %1685 = vperm.xlu2 %2168, %v1582_v56   ;;  %v641_v5 = vand.u32 2147483648, %v3084_v48  ;;  %v646_v30 = vmul.f32 %v3192_v6, %v3091_v2 }
 0x347   : > { %v1165_v45 = vsel %vm3232_vm13, %v1164_v9, %v1160_v47  ;;  %v633_v26 = vmul.f32 %v3184_v36, %v632_v25  ;;  %v1591_v4 = vsel %vm1590_vm3, %v3099_v54, %v1587_v14  ;;  %vm1593_vm5 = vcmp.eq.f32.partialorder %v1592_v13, 8.507059e+37 }
 0x348   : > { %v1166_v16 = vmul.f32 %v2856_v8, %v1165_v45  ;;  %vm635_vm6 = vweird.f32 %v3084_v48  ;;  %v1596_v24 = vsel %vm1593_vm5, %v1595_v58, %v1591_v4  ;;  %vm640_vm7 = vcmp.eq.f32.partialorder %v639_v44, 8.507059e+37 }
 0x349   : > { %v634_v10 = vadd.f32 %v3184_v36, %v633_v26  ;;  %v647_v12 = vsub.f32 1.0, %v646_v30  ;;  %v1597_v19 = vmul.f32 %v2861_v11, %v1596_v24  ;;  %vm637_vm4 = vmor %vm635_vm6, %vm636_vm2  ;;  %v642_v50 = vor.u32 1.1754944e-38, %v641_v5 }
 0x34a   : > { %1233 = vperm.xlu1 %2167, %v1166_v16   ;;  %v654_v57 = vand.u32 2147483647, %v3091_v2  ;;  %v656_v8 = vand.u32 2147483648, %v3091_v2  ;;  %vm651_vm10 = vweird.f32 %v3192_v6  ;;  %v1168_v37 = vmul.f32 %v3056_v34, %v2988_v63 }
 0x34b   : > { %v638_v54 = vsel %vm637_vm4, %v3184_v36, %v634_v10  ;;  %v648_v48 = vmul.f32 %v3192_v6, %v647_v12  ;;  %2281 = vrcp.f32 %v3133_v23  ;;  %1688 = vperm.xlu0 %2166, %v1597_v19   ;;  %vm650_vm11 = vweird.f32 %v3091_v2 }
 0x34c   : > { %v643_v11 = vsel %vm640_vm7, %v642_v50, %v638_v54  ;;  %vm1172_vm12 = vweird.f32 %v2988_v63  ;;  %vm655_vm13 = vcmp.eq.f32.partialorder %v654_v57, 8.507059e+37  ;;  %v1169_v36 = vsub.f32 1.0, %v1168_v37  ;;  %vm652_vm14 = vmor %vm650_vm11, %vm651_vm10 }
 0x34d   : > { %v644_v9 = vmul.f32 %v2846_v61, %v643_v11  ;;  %v649_v59 = vadd.f32 %v3192_v6, %v648_v48  ;;  %v657_v52 = vor.u32 1.1754944e-38, %v656_v8  ;;  %v1176_v32 = vand.u32 2147483647, %v2988_v63 }
 0x34e   : > { %v1178_v40 = vand.u32 2147483648, %v2988_v63  ;;  %v1599_v60 = vmul.f32 %v3116_v62, %v3022_v27  ;;  %v1170_v17 = vmul.f32 %v3056_v34, %v1169_v36  ;;  %vm1173_vm15 = vweird.f32 %v3056_v34 }
 0x34f   : > { %759 = vperm.xlu2 %2168, %v644_v9   ;;  %v653_v2 = vsel %vm652_vm14, %v3192_v6, %v649_v59  ;;  %v1607_v61 = vand.u32 2147483647, %v3022_v27  ;;  %vm1603_vm8 = vweird.f32 %v3022_v27  ;;  %v1609_v56 = vand.u32 2147483648, %v3022_v27  ;;  %vm1174_vm2 = vmor %vm1172_vm12, %vm1173_vm15 }
 0x350   : > { %v658_v3 = vsel %vm655_vm13, %v657_v52, %v653_v2  ;;  %v1600_v13 = vsub.f32 1.0, %v1599_v60  ;;  %v1171_v25 = vadd.f32 %v3056_v34, %v1170_v17  ;;  %vm1604_vm9 = vweird.f32 %v3116_v62 }
 0x351   : > { %v659_v58 = vmul.f32 %v2859_v43, %v658_v3  ;;  %v661_v6 = vmul.f32 %v3199_v46, %v3093_v31  ;;  %v3306_v47 = vpop.eup %2281  ;;  %vm1177_vm3 = vcmp.eq.f32.partialorder %v1176_v32, 8.507059e+37  ;;  %v1179_v14 = vor.u32 1.1754944e-38, %v1178_v40  ;;  %vm1605_vm7 = vmor %vm1603_vm8, %vm1604_vm9  ;;  %v3853_v3 = vld [vmem:[#allocation27_spill] sm:$0xff] }
 0x352   : > { %v1601_v44 = vmul.f32 %v3116_v62, %v1600_v13  ;;  %vm3311_vm5 = vcmp.eq.f32.partialorder %v1607_v61, 8.507059e+37  ;;  %v1175_v43 = vsel %vm1174_vm2, %v3056_v34, %v1171_v25  ;;  %v1610_v26 = vor.u32 1.1754944e-38, %v1609_v56 }
 0x353   : > { %762 = vperm.xlu1 %2167, %v659_v58   ;;  %v662_v5 = vsub.f32 1.0, %v661_v6  ;;  %v671_v30 = vand.u32 2147483648, %v3093_v31  ;;  %v1180_v16 = vsel %vm1177_vm3, %v1179_v14, %v1175_v43  ;;  %vm665_vm6 = vweird.f32 %v3093_v31  ;;  %v3854_v6 = vld [vmem:[#allocation15_spill] sm:$0xff]  ;;  %v3855_v43 = vld [vmem:[#allocation24_spill] sm:$0xff] }
 0x354   : > { %v1602_v4 = vadd.f32 %v3116_v62, %v1601_v44  ;;  %v1183_v63 = vmul.f32 %v3069_v20, %v2992_v0  ;;  %v1181_v24 = vmul.f32 %v2871_v21, %v1180_v16  ;;  %vm666_vm4 = vweird.f32 %v3199_v46 }
 0x355   : > { %v663_v34 = vmul.f32 %v3199_v46, %v662_v5  ;;  %v669_v10 = vand.u32 2147483647, %v3093_v31  ;;  %v672_v19 = vor.u32 1.1754944e-38, %v671_v30  ;;  %vm1187_vm10 = vweird.f32 %v2992_v0  ;;  %vm667_vm11 = vmor %vm665_vm6, %vm666_vm4 }
 0x356   : > { %v1606_v12 = vsel %vm1605_vm7, %v3116_v62, %v1602_v4  ;;  %v1184_v50 = vsub.f32 1.0, %v1183_v63  ;;  %1236 = vperm.xlu0 %2166, %v1181_v24   ;;  %v1193_v27 = vand.u32 2147483648, %v2992_v0  ;;  %v1614_v8 = vmul.f32 %v3131_v38, %v3030_v29 }
 0x357   : > { %v1611_v21 = vsel %vm3311_vm5, %v1610_v26, %v1606_v12  ;;  %v664_v57 = vadd.f32 %v3199_v46, %v663_v34  ;;  %vm1188_vm12 = vweird.f32 %v3069_v20  ;;  %v1191_v48 = vand.u32 2147483647, %v2992_v0 }
 0x358   : > { %v1612_v54 = vmul.f32 %v2876_v41, %v1611_v21  ;;  %v1185_v62 = vmul.f32 %v3069_v20, %v1184_v50  ;;  %vm670_vm13 = vcmp.eq.f32.partialorder %v669_v10, 8.507059e+37  ;;  %v1194_v11 = vor.u32 1.1754944e-38, %v1193_v27  ;;  %vm1189_vm15 = vmor %vm1187_vm10, %vm1188_vm12  ;;  %v3858_v10 = vld [vmem:[#allocation14_spill] sm:$0xff] }
 0x359   : > { %v668_v37 = vsel %vm667_vm11, %v3199_v46, %v664_v57  ;;  %v1615_v9 = vsub.f32 1.0, %v1614_v8  ;;  %vm1619_vm14 = vweird.f32 %v3131_v38  ;;  %v1624_v41 = vand.u32 2147483648, %v3030_v29 }
 0x35a   : > { %1691 = vperm.xlu2 %2168, %v1612_v54   ;;  %v673_v59 = vsel %vm670_vm13, %v672_v19, %v668_v37  ;;  %v1186_v36 = vadd.f32 %v3069_v20, %v1185_v62  ;;  %v1622_v46 = vand.u32 2147483647, %v3030_v29  ;;  %v676_v32 = vmul.f32 %v3206_v22, %v3101_v53  ;;  %v3859_v62 = vld [vmem:[#allocation16_spill] sm:$0xff] }
 0x35b   : > { %v674_v31 = vmul.f32 %v2874_v55, %v673_v59  ;;  %v1616_v52 = vmul.f32 %v3131_v38, %v1615_v9  ;;  %vm1192_vm8 = vcmp.eq.f32.partialorder %v1191_v48, 8.507059e+37  ;;  %vm1618_vm9 = vweird.f32 %v3030_v29  ;;  %v3860_v9 = vld [vmem:[#allocation25_spill] sm:$0xff] }
 0x35c   : > { %v1190_v40 = vsel %vm1189_vm15, %v3069_v20, %v1186_v36  ;;  %vm680_vm2 = vweird.f32 %v3101_v53  ;;  %v1625_v0 = vor.u32 1.1754944e-38, %v1624_v41  ;;  %v677_v2 = vsub.f32 1.0, %v676_v32  ;;  %vm1620_vm3 = vmor %vm1618_vm9, %vm1619_vm14  ;;  %v3861_v32 = vld [vmem:[#allocation18_spill] sm:$0xff] }
 0x35d   : > { %765 = vperm.xlu1 %2167, %v674_v31   ;;  %v1195_v60 = vsel %vm1192_vm8, %v1194_v11, %v1190_v40  ;;  %v1617_v55 = vadd.f32 %v3131_v38, %v1616_v52  ;;  %v684_v61 = vand.u32 2147483647, %v3101_v53  ;;  %v686_v20 = vand.u32 2147483648, %v3101_v53 }
 0x35e   : > { %v1196_v17 = vmul.f32 %v2886_v35, %v1195_v60  ;;  %v1198_v29 = vmul.f32 %v3853_v3, %v2995_v1  ;;  %vm1623_vm5 = vcmp.eq.f32.partialorder %v1622_v46, 8.507059e+37  ;;  %v678_v56 = vmul.f32 %v3206_v22, %v677_v2 }
 0x35f   : > { %v1621_v13 = vsel %vm1620_vm3, %v3131_v38, %v1617_v55  ;;  %vm681_vm6 = vweird.f32 %v3206_v22  ;;  %vm1202_vm7 = vweird.f32 %v2995_v1  ;;  %v1206_v25 = vand.u32 2147483647, %v2995_v1 }
 0x360   : > { %1239 = vperm.xlu0 %2166, %v1196_v17   ;;  %v1626_v58 = vsel %vm1623_vm5, %v1625_v0, %v1621_v13  ;;  %v1199_v35 = vsub.f32 1.0, %v1198_v29  ;;  %v679_v44 = vadd.f32 %v3206_v22, %v678_v56  ;;  %v1208_v45 = vand.u32 2147483648, %v2995_v1  ;;  %vm682_vm4 = vmor %vm680_vm2, %vm681_vm6  ;;  %v3863_v56 = vld [vmem:[#allocation26_spill] sm:$0xff] }
 0x361   : > { %v1627_v14 = vmul.f32 %v3854_v6, %v1626_v58  ;;  %v1629_v38 = vmul.f32 %v3146_v15, %v3855_v43  ;;  %vm685_vm10 = vcmp.eq.f32.partialorder %v684_v61, 8.507059e+37  ;;  %v687_v26 = vor.u32 1.1754944e-38, %v686_v20  ;;  %v3862_v20 = vld [vmem:[#allocation17_spill] sm:$0xff] }
 0x362   : > { %v1200_v5 = vmul.f32 %v3853_v3, %v1199_v35  ;;  %vm1203_vm11 = vweird.f32 %v3853_v3  ;;  %v683_v30 = vsel %vm682_vm4, %v3206_v22, %v679_v44  ;;  %vm3380_vm12 = vcmp.eq.f32.partialorder %v1206_v25, 8.507059e+37 }
 0x363   : > { %1694 = vperm.xlu2 %2168, %v1627_v14   ;;  %v1630_v4 = vsub.f32 1.0, %v1629_v38  ;;  %vm1634_vm13 = vweird.f32 %v3146_v15  ;;  %v688_v63 = vsel %vm685_vm10, %v687_v26, %v683_v30  ;;  %v1639_v24 = vand.u32 2147483648, %v3855_v43  ;;  %vm1204_vm14 = vmor %vm1202_vm7, %vm1203_vm11  ;;  %v3866_v26 = vld [vmem:[#allocation20_spill] sm:$0xff] }
 0x364   : > { %v1201_v53 = vadd.f32 %v3853_v3, %v1200_v5  ;;  %v691_v34 = vmul.f32 %v3216_v7, %v3103_v42  ;;  %v689_v12 = vmul.f32 %v3858_v10, %v688_v63  ;;  %v1209_v22 = vor.u32 1.1754944e-38, %v1208_v45 }
 0x365   : > { %v1631_v19 = vmul.f32 %v3146_v15, %v1630_v4  ;;  %v1637_v50 = vand.u32 2147483647, %v3855_v43  ;;  %vm1633_vm15 = vweird.f32 %v3855_v43  ;;  %v1640_v57 = vor.u32 1.1754944e-38, %v1639_v24 }
 0x366   : > { %v1205_v21 = vsel %vm1204_vm14, %v3853_v3, %v1201_v53  ;;  %v692_v27 = vsub.f32 1.0, %v691_v34  ;;  %768 = vperm.xlu1 %2167, %v689_v12   ;;  %vm696_vm8 = vweird.f32 %v3216_v7  ;;  %v701_v1 = vand.u32 2147483648, %v3103_v42  ;;  %vm1635_vm9 = vmor %vm1633_vm15, %vm1634_vm13  ;;  %v3867_v12 = vld [vmem:[#allocation21_spill] sm:$0xff] }
 0x367   : > { %v1210_v8 = vsel %vm3380_vm12, %v1209_v22, %v1205_v21  ;;  %v1632_v54 = vadd.f32 %v3146_v15, %v1631_v19  ;;  %v699_v11 = vand.u32 2147483647, %v3103_v42  ;;  %v1644_v59 = vmul.f32 %v3156_v18, %v3860_v9 }
 0x368   : > { %v1211_v48 = vmul.f32 %v3859_v62, %v1210_v8  ;;  %v693_v37 = vmul.f32 %v3216_v7, %v692_v27  ;;  %vm1638_vm2 = vcmp.eq.f32.partialorder %v1637_v50, 8.507059e+37  ;;  %vm695_vm3 = vweird.f32 %v3103_v42  ;;  %v3868_v8 = vld [vmem:[#allocation19_spill] sm:$0xff] }
 0x369   : > { %v1636_v36 = vsel %vm1635_vm9, %v3146_v15, %v1632_v54  ;;  %vm1648_vm5 = vweird.f32 %v3860_v9  ;;  %v702_v52 = vor.u32 1.1754944e-38, %v701_v1  ;;  %v1645_v46 = vsub.f32 1.0, %v1644_v59  ;;  %vm697_vm6 = vmor %vm695_vm3, %vm696_vm8 }
 0x36a   : > { %1242 = vperm.xlu0 %2166, %v1211_v48   ;;  %v1641_v41 = vsel %vm1638_vm2, %v1640_v57, %v1636_v36  ;;  %v694_v31 = vadd.f32 %v3216_v7, %v693_v37  ;;  %v1652_v60 = vand.u32 2147483647, %v3860_v9  ;;  %v1654_v15 = vand.u32 2147483648, %v3860_v9  ;;  %v3869_v9 = vld [vmem:[#allocation22_spill] sm:$0xff] }
 0x36b   : > { %v1642_v40 = vmul.f32 %v3861_v32, %v1641_v41  ;;  %v706_v42 = vmul.f32 %v3225_v33, %v3105_v39  ;;  %vm700_vm7 = vcmp.eq.f32.partialorder %v699_v11, 8.507059e+37  ;;  %v1646_v0 = vmul.f32 %v3156_v18, %v1645_v46 }
 0x36c   : > { %v698_v55 = vsel %vm697_vm6, %v3216_v7, %v694_v31  ;;  %vm1649_vm4 = vweird.f32 %v3156_v18  ;;  %vm710_vm10 = vweird.f32 %v3105_v39  ;;  %v714_v61 = vand.u32 2147483647, %v3105_v39  ;;  %v3870_v31 = vld [vmem:[#allocation23_spill] sm:$0xff] }
 0x36d   : > { %1697 = vperm.xlu2 %2168, %v1642_v40   ;;  %v703_v2 = vsel %vm700_vm7, %v702_v52, %v698_v55  ;;  %v707_v17 = vsub.f32 1.0, %v706_v42  ;;  %v1647_v29 = vadd.f32 %v3156_v18, %v1646_v0  ;;  %v716_v13 = vand.u32 2147483648, %v3105_v39  ;;  %vm1650_vm11 = vmor %vm1648_vm5, %vm1649_vm4 }
 0x36e   : > { %v704_v3 = vmul.f32 %v3862_v20, %v703_v2  ;;  %v1659_v7 = vmul.f32 %v3166_v51, %v3863_v56  ;;  %vm1653_vm12 = vcmp.eq.f32.partialorder %v1652_v60, 8.507059e+37  ;;  %v1655_v58 = vor.u32 1.1754944e-38, %v1654_v15  ;;  %v3487_v15 = vld [vmem:[%s2616_s18 + $0x8] sm:$0xff] }
 0x36f   : > { %v708_v35 = vmul.f32 %v3225_v33, %v707_v17  ;;  %vm711_vm13 = vweird.f32 %v3225_v33  ;;  %v1651_v25 = vsel %vm1650_vm11, %v3156_v18, %v1647_v29  ;;  %vm3434_vm14 = vcmp.eq.f32.partialorder %v714_v61, 8.507059e+37  ;;  %v2288_v17 = vld [vmem:[%s2616_s18] sm:$0xff] }
 0x370   : > { %771 = vperm.xlu1 %2167, %v704_v3   ;;  %v1660_v14 = vsub.f32 1.0, %v1659_v7  ;;  %vm1664_vm15 = vweird.f32 %v3166_v51  ;;  %v1656_v44 = vsel %vm1653_vm12, %v1655_v58, %v1651_v25  ;;  %v1669_v43 = vand.u32 2147483648, %v3863_v56  ;;  %vm712_vm8 = vmor %vm710_vm10, %vm711_vm13 }
 0x371   : > { %v709_v45 = vadd.f32 %v3225_v33, %v708_v35  ;;  %v721_v38 = vmul.f32 %v3236_v49, %v3118_v28  ;;  %v1657_v5 = vmul.f32 %v3866_v26, %v1656_v44  ;;  %v717_v18 = vor.u32 1.1754944e-38, %v716_v13  ;;  %v3502_v13 = vld [vmem:[%s2616_s18 + $0x10] sm:$0xff]  ;;  %v1342_v44 = vld [vmem:[#allocation7 + $0xf8] sm:$0xff] }
 0x372   : > { %v1661_v30 = vmul.f32 %v3166_v51, %v1660_v14  ;;  %v1667_v16 = vand.u32 2147483647, %v3863_v56  ;;  %vm1663_vm9 = vweird.f32 %v3863_v56  ;;  %v1670_v63 = vor.u32 1.1754944e-38, %v1669_v43  ;;  %1359 = vmatpush.msrb.mxu2 %v1342_v44 }
 0x373   : > { %v713_v4 = vsel %vm712_vm8, %v3225_v33, %v709_v45  ;;  %v722_v53 = vsub.f32 1.0, %v721_v38  ;;  %1700 = vperm.xlu0 %2166, %v1657_v5   ;;  %v729_v39 = vand.u32 2147483647, %v3118_v28  ;;  %v731_v10 = vand.u32 2147483648, %v3118_v28  ;;  %vm1665_vm2 = vmor %vm1663_vm9, %vm1664_vm15  ;;  %v1341_v45 = vld [vmem:[#allocation7 + $0xf0] sm:$0xff]  ;;  %v1340_v5 = vld [vmem:[#allocation7 + $0xe8] sm:$0xff] }
 0x374   : > { %v718_v24 = vsel %vm3434_vm14, %v717_v18, %v713_v4  ;;  %v1662_v34 = vadd.f32 %v3166_v51, %v1661_v30  ;;  %vm726_vm3 = vweird.f32 %v3236_v49  ;;  %v736_v19 = vmul.f32 %v3306_v47, %v3133_v23  ;;  %v3512_v30 = vld [vmem:[%s2616_s18 + $0x18] sm:$0xff]  ;;  %1360 = vmatpush.msrb.mxu2 %v1341_v45 }
 0x375   : > { %v719_v22 = vmul.f32 %v3867_v12, %v718_v24  ;;  %v723_v33 = vmul.f32 %v3236_v49, %v722_v53  ;;  %vm1668_vm5 = vcmp.eq.f32.partialorder %v1667_v16, 8.507059e+37  ;;  %vm725_vm6 = vweird.f32 %v3118_v28  ;;  %v1339_v24 = vld [vmem:[#allocation7 + $0xe0] sm:$0xff]  ;;  %v1334_v45 = vld [vmem:[#allocation7 + $0xb8] sm:$0xff] }
 0x376   : > { %v1666_v50 = vsel %vm1665_vm2, %v3166_v51, %v1662_v34  ;;  %v737_v27 = vsub.f32 1.0, %v736_v19  ;;  %vm727_vm7 = vmor %vm725_vm6, %vm726_vm3  ;;  %vm730_vm4 = vcmp.eq.f32.partialorder %v729_v39, 8.507059e+37  ;;  %v732_v1 = vor.u32 1.1754944e-38, %v731_v10  ;;  %1361 = vmatpush.msrb.mxu2 %v1340_v5 }
 0x377   : > { %774 = vperm.xlu2 %2168, %v719_v22   ;;  %v1671_v21 = vsel %vm1668_vm5, %v1670_v63, %v1666_v50  ;;  %v724_v57 = vadd.f32 %v3236_v49, %v723_v33  ;;  %v746_v62 = vand.u32 2147483648, %v3133_v23  ;;  %vm741_vm10 = vweird.f32 %v3306_v47 }
 0x378   : > { %v1672_v54 = vmul.f32 %v3868_v8, %v1671_v21  ;;  %v738_v37 = vmul.f32 %v3306_v47, %v737_v27  ;;  %v744_v51 = vand.u32 2147483647, %v3133_v23  ;;  %vm740_vm11 = vweird.f32 %v3133_v23  ;;  %1362 = vmatpush.msrb.mxu2 %v1339_v24  ;;  %v1338_v27 = vld [vmem:[#allocation7 + $0xd8] sm:$0xff]  ;;  %v1337_v8 = vld [vmem:[#allocation7 + $0xd0] sm:$0xff] }
 0x379   : > { %v728_v48 = vsel %vm727_vm7, %v3236_v49, %v724_v57  ;;  %vm742_vm12 = vmor %vm740_vm11, %vm741_vm10  ;;  %v747_v36 = vor.u32 1.1754944e-38, %v746_v62  ;;  %vm3872_vm14 = vcmask 1043459   ;;  %vm3874_vm8 = vcmask 1044484  }
 0x37a   : > { %1703 = vperm.xlu1 %2167, %v1672_v54   ;;  %v733_v11 = vsel %vm730_vm4, %v732_v1, %v728_v48  ;;  %v739_v59 = vadd.f32 %v3306_v47, %v738_v37  ;;  %vm745_vm13 = vcmp.eq.f32.partialorder %v744_v51, 8.507059e+37  ;;  %v3871_v54 = vld [vmem:[#allocation13_spill] sm:$0xff]  ;;  %1363 = vmatpush.msrb.mxu2 %v1338_v27  ;;  %v1803_v37 = vld [vmem:[#allocation7 + $0x178] sm:$0xff]  ;;  %vm3873_vm15 = vmmov %vm3872_vm14  ;;  %vm3876_vm2 = vcmask 1045509  }
 0x37b   : > { %v734_v28 = vmul.f32 %v3869_v9, %v733_v11  ;;  %v1336_v9 = vld [vmem:[#allocation7 + $0xc8] sm:$0xff]  ;;  %1820 = vmatpush.msra.mxu3 %v1803_v37  ;;  %vm3875_vm9 = vmmov %vm3874_vm8  ;;  %vm3877_vm3 = vcmask 1046534   ;;  %vm3878_vm5 = vcmask 1047559   ;;  %vm3879_vm6 = vcmask 64512  }
 0x37c   : > { %v743_v49 = vsel %vm742_vm12, %v3306_v47, %v739_v59  ;;  %v1802_v59 = vld [vmem:[#allocation7 + $0x170] sm:$0xff]  ;;  %1364 = vmatpush.msrb.mxu2 %v1337_v8  ;;  %vm3880_vm7 = vmmov %vm3876_vm2 }
 0x37d   : > { %777 = vperm.xlu0 %2166, %v734_v28   ;;  %v748_v41 = vsel %vm745_vm13, %v747_v36, %v743_v49  ;;  %v878_v28 = vld [vmem:[#allocation7 + $0x78] sm:$0xff]  ;;  %1821 = vmatpush.msra.mxu3 %v1802_v59  ;;  %vm3881_vm4 = vmmov %vm3872_vm14 }
 0x37e   : > { %v749_v52 = vmul.f32 %v3870_v31, %v748_v41  ;;  %v3530_v41 = vld [vmem:[%s2616_s18 + $0x20] sm:$0xff]  ;;  %895 = vmatpush.msrb.mxu1 %v878_v28  ;;  %1365 = vmatpush.msrb.mxu2 %v1336_v9  ;;  %v1798_v9 = vld [vmem:[#allocation7 + $0x150] sm:$0xff]  ;;  %vm3882_vm10 = vmmov %vm3874_vm8 }
 0x37f   : > { %vm3883_vm11 = vmmov %vm3876_vm2 }
 0x380   : > { %780 = vperm.xlu2 %2168, %v749_v52   ;;  %vm3884_vm12 = vmmov %vm3877_vm3 }
 0x381   : > { %vm3885_vm13 = vmmov %vm3881_vm4 }
 0x394   : > { %v3476_v46 = vpop.permute.xlu2 %1224 }
 0x395   : > { %v1271_v47 = vmul.f32 %v3487_v15, %v3476_v46  ;;  %v1245_v51 = vperm.slane %v3476_v46, %v3871_v54 }
 0x397   : > { %v1284_v0 = vrot.slane %v1271_v47, 4 }
 0x399   : > { %v1285_v3 = vadd.f32 %v1284_v0, %v1271_v47  ;;  %v1801_v47 = vld [vmem:[#allocation7 + $0x168] sm:$0xff] }
 0x39a   : > { %1822 = vmatpush.msra.mxu3 %v1801_v47  ;;  %v1797_v47 = vld [vmem:[#allocation7 + $0x148] sm:$0xff] }
 0x39b   : > { %v1286_v25 = vrot.slane %v1285_v3, 2 }
 0x39d   : > { %v1287_v18 = vadd.f32 %v1286_v25, %v1285_v3  ;;  %v1800_v25 = vld [vmem:[#allocation7 + $0x160] sm:$0xff] }
 0x39e   : > { %1823 = vmatpush.msra.mxu3 %v1800_v25  ;;  %v3582_v25 = vld [vmem:[%s2616_s18 + $0x30] sm:$0xff] }
 0x39f   : > { %v1288_v22 = vrot.slane %v1287_v18, 1 }
 0x3a0   : > { %v3478_v32 = vpop.permute.xlu2 %1685 }
 0x3a1   : > { %v1732_v42 = vmul.f32 %v3487_v15, %v3478_v32  ;;  %v3527_v36 = vadd.f32 %v1288_v22, %v1287_v18 }
 0x3a3   : > { %v1745_v20 = vrot.slane %v1732_v42, 4 }
 0x3a5   : > { %v1746_v58 = vadd.f32 %v1745_v20, %v1732_v42  ;;  %v876_v20 = vld [vmem:[#allocation7 + $0x68] sm:$0xff] }
 0x3a7   : > { %v1747_v26 = vrot.slane %v1746_v58, 2 }
 0x3a9   : > { %v3484_v23 = vpop.permute.xlu2 %759  ;;  %v1748_v12 = vadd.f32 %v1747_v26, %v1746_v58 }
 0x3aa   : > { %v807_v6 = vmul.f32 %v2288_v17, %v3484_v23 }
 0x3ab   : > { %v3480_v40 = vpop.permute.xlu1 %1221  ;;  %v1749_v11 = vrot.slane %v1748_v12, 1 }
 0x3ac   : > { %v3482_v60 = vpop.permute.xlu0 %1227  ;;  %v1270_v61 = vmul.f32 %v2288_v17, %v3480_v40  ;;  %v815_v4 = vrot.slane %v807_v6, 4  ;;  %v1244_v1 = vperm.slane %v3480_v40, %v3871_v54  ;;  %v877_v40 = vld [vmem:[#allocation7 + $0x70] sm:$0xff] }
 0x3ad   : > { %v1272_v56 = vmul.f32 %v3502_v13, %v3482_v60  ;;  %v1246_v42 = vperm.slane %v3482_v60, %v3871_v54  ;;  %896 = vmatpush.msrb.mxu1 %v877_v40  ;;  %v3543_v60 = vadd.f32 %v1749_v11, %v1748_v12  ;;  %v874_v11 = vld [vmem:[#allocation7 + $0x58] sm:$0xff] }
 0x3ae   : > { %v1278_v7 = vrot.slane %v1270_v61, 4  ;;  %v816_v50 = vadd.f32 %v815_v4, %v807_v6  ;;  %v1252_v3 = vsel %vm502_vm0, %v1245_v51, %v1244_v1  ;;  %v1706_v6 = vperm.slane %v3478_v32, %v3871_v54  ;;  %v3554_v4 = vld [vmem:[%s2616_s18 + $0x28] sm:$0xff] }
 0x3af   : > { %v1290_v14 = vrot.slane %v1272_v56, 4  ;;  %897 = vmatpush.msrb.mxu1 %v876_v20 }
 0x3b0   : > { %v1279_v43 = vadd.f32 %v1278_v7, %v1270_v61  ;;  %v817_v46 = vrot.slane %v816_v50, 2  ;;  %v1335_v61 = vld [vmem:[#allocation7 + $0xc0] sm:$0xff] }
 0x3b1   : > { %v1291_v63 = vadd.f32 %v1290_v14, %v1272_v56  ;;  %v782_v14 = vperm.slane %v3484_v23, %v3871_v54  ;;  %1366 = vmatpush.msrb.mxu2 %v1335_v61  ;;  %v866_v23 = vld [vmem:[#allocation7 + $0x18] sm:$0xff] }
 0x3b2   : > { %v1280_v34 = vrot.slane %v1279_v43, 2 }
 0x3b3   : > { %v3493_v55 = vpop.permute.xlu1 %1230  ;;  %v1292_v21 = vrot.slane %v1291_v63, 2  ;;  %1367 = vmatpush.msrb.mxu2 %v1334_v45 }
 0x3b4   : > { %v3499_v29 = vpop.permute.xlu2 %1691  ;;  %v1273_v53 = vmul.f32 %v3512_v30, %v3493_v55  ;;  %v1281_v62 = vadd.f32 %v1280_v34, %v1279_v43  ;;  %v875_v43 = vld [vmem:[#allocation7 + $0x60] sm:$0xff]  ;;  %v1247_v5 = vperm.slane %v3493_v55, %v3871_v54 }
 0x3b5   : > { %v3495_v2 = vpop.permute.xlu0 %1682  ;;  %v1734_v16 = vmul.f32 %v3512_v30, %v3499_v29  ;;  %v1293_v0 = vadd.f32 %v1292_v21, %v1291_v63  ;;  %v3558_v63 = vadd.f32 %v817_v46, %v816_v50  ;;  %898 = vmatpush.msrb.mxu1 %v875_v43  ;;  %v1708_v50 = vperm.slane %v3499_v29, %v3871_v54  ;;  %v1330_v43 = vld [vmem:[#allocation7 + $0x98] sm:$0xff] }
 0x3b6   : > { %v1731_v39 = vmul.f32 %v2288_v17, %v3495_v2  ;;  %v1296_v57 = vrot.slane %v1273_v53, 4  ;;  %v1282_v56 = vrot.slane %v1281_v62, 1  ;;  %v1705_v55 = vperm.slane %v3495_v2, %v3871_v54 }
 0x3b7   : > { %v1757_v33 = vrot.slane %v1734_v16, 4  ;;  %v1294_v24 = vrot.slane %v1293_v0, 1  ;;  %v819_v28 = vrot.slane %v3558_v63, 1  ;;  %899 = vmatpush.msrb.mxu1 %v874_v11 }
 0x3b8   : > { %v1739_v48 = vrot.slane %v1731_v39, 4  ;;  %v1297_v17 = vadd.f32 %v1296_v57, %v1273_v53  ;;  %v1253_v53 = vsel %vm504_vm1, %v1246_v42, %v1252_v3  ;;  %v1283_v12 = vadd.f32 %v1282_v56, %v1281_v62  ;;  %v1799_v57 = vld [vmem:[#allocation7 + $0x158] sm:$0xff]  ;;  %v1332_v62 = vld [vmem:[#allocation7 + $0xa8] sm:$0xff] }
 0x3b9   : > { %v1758_v49 = vadd.f32 %v1757_v33, %v1734_v16  ;;  %1824 = vmatpush.msra.mxu3 %v1799_v57  ;;  %v1295_v29 = vadd.f32 %v1294_v24, %v1293_v0  ;;  %v1713_v46 = vsel %vm502_vm0, %v1706_v6, %v1705_v55  ;;  %v872_v0 = vld [vmem:[#allocation7 + $0x48] sm:$0xff] }
 0x3ba   : > { %v1740_v7 = vadd.f32 %v1739_v48, %v1731_v39  ;;  %v1298_v34 = vrot.slane %v1297_v17, 2  ;;  %v1333_v39 = vld [vmem:[#allocation7 + $0xb0] sm:$0xff]  ;;  %v1254_v48 = vsel %vm3872_vm14, %v1247_v5, %v1253_v53  ;;  %vm3886_vm14 = vmmov %vm3878_vm5 }
 0x3bb   : > { %v1759_v26 = vrot.slane %v1758_v49, 2  ;;  %1368 = vmatpush.msrb.mxu2 %v1333_v39  ;;  %1825 = vmatpush.msra.mxu3 %v1798_v9 }
 0x3bc   : > { %v3506_v35 = vpop.permute.xlu1 %1233  ;;  %v1741_v22 = vrot.slane %v1740_v7, 2  ;;  %v1299_v59 = vadd.f32 %v1298_v34, %v1297_v17  ;;  %v1796_v17 = vld [vmem:[#allocation7 + $0x140] sm:$0xff]  ;;  %v1329_v34 = vld [vmem:[#allocation7 + $0x90] sm:$0xff] }
 0x3bd   : > { %v3509_v38 = vpop.permute.xlu0 %1688  ;;  %v3519_v10 = vpop.permute.xlu2 %1694  ;;  %v1274_v31 = vmul.f32 %v3530_v41, %v3506_v35  ;;  %v1760_v2 = vadd.f32 %v1759_v26, %v1758_v49  ;;  %v873_v49 = vld [vmem:[#allocation7 + $0x50] sm:$0xff]  ;;  %1369 = vmatpush.msrb.mxu2 %v1332_v62  ;;  %1826 = vmatpush.msra.mxu3 %v1797_v47  ;;  %v871_v26 = vld [vmem:[#allocation7 + $0x40] sm:$0xff] }
 0x3be   : > { %v1733_v58 = vmul.f32 %v3502_v13, %v3509_v38  ;;  %v1735_v44 = vmul.f32 %v3530_v41, %v3519_v10  ;;  %v1707_v8 = vperm.slane %v3509_v38, %v3871_v54  ;;  %v1742_v42 = vadd.f32 %v1741_v22, %v1740_v7  ;;  %900 = vmatpush.msrb.mxu1 %v873_v49 }
 0x3bf   : > { %v1302_v18 = vrot.slane %v1274_v31, 4  ;;  %v1248_v7 = vperm.slane %v3506_v35, %v3871_v54  ;;  %1827 = vmatpush.msra.mxu3 %v1796_v17 }
 0x3c0   : > { %v1751_v33 = vrot.slane %v1733_v58, 4  ;;  %v1763_v27 = vrot.slane %v1735_v44, 4  ;;  %v1714_v3 = vsel %vm504_vm1, %v1707_v8, %v1713_v46  ;;  %901 = vmatpush.msrb.mxu1 %v872_v0  ;;  %v1743_v39 = vrot.slane %v1742_v42, 1  ;;  %v1328_v8 = vld [vmem:[#allocation7 + $0x88] sm:$0xff]  ;;  %v870_v46 = vld [vmem:[#allocation7 + $0x38] sm:$0xff]  ;;  %v1794_v0 = vld [vmem:[#allocation7 + $0x130] sm:$0xff] }
 0x3c1   : > { %v1303_v37 = vadd.f32 %v1302_v18, %v1274_v31  ;;  %v1351_v31 = vsel %vm502_vm0, %v3527_v36, %v1283_v12  ;;  %v1761_v36 = vrot.slane %v1760_v2, 1  ;;  %v1300_v18 = vrot.slane %v1299_v59, 1 }
 0x3c2   : > { %v1752_v61 = vadd.f32 %v1751_v33, %v1733_v58  ;;  %v1764_v20 = vadd.f32 %v1763_v27, %v1735_v44  ;;  %v1795_v44 = vld [vmem:[#allocation7 + $0x138] sm:$0xff]  ;;  %v3589_v5 = vsel %vm504_vm1, %v1295_v29, %v1351_v31  ;;  %v1709_v12 = vperm.slane %v3519_v10, %v3871_v54  ;;  %902 = vmatpush.msrb.mxu1 %v871_v26 }
 0x3c3   : > { %v1304_v58 = vrot.slane %v1303_v37, 2  ;;  %v1715_v35 = vsel %vm3873_vm15, %v1708_v50, %v1714_v3  ;;  %1828 = vmatpush.msra.mxu3 %v1795_v44  ;;  %v3598_v62 = vadd.f32 %v1761_v36, %v1760_v2  ;;  %v1255_v10 = vsel %vm3874_vm8, %v1248_v7, %v1254_v48  ;;  %v868_v7 = vld [vmem:[#allocation7 + $0x28] sm:$0xff]  ;;  %v1792_v44 = vld [vmem:[#allocation7 + $0x120] sm:$0xff]  ;;  %vm3887_vm15 = vmmov %vm3874_vm8 }
 0x3c4   : > { %v1765_v22 = vrot.slane %v1764_v20, 2  ;;  %v3604_v9 = vadd.f32 %v1300_v18, %v1299_v59  ;;  %v1744_v2 = vadd.f32 %v1743_v39, %v1742_v42  ;;  %v1716_v48 = vsel %vm3875_vm9, %v1709_v12, %v1715_v35  ;;  %903 = vmatpush.msrb.mxu1 %v870_v46  ;;  %vm3888_vm8 = vmmov %vm3877_vm3 }
 0x3c5   : > { %v3521_v19 = vpop.permute.xlu1 %762  ;;  %1829 = vmatpush.msra.mxu3 %v1794_v0  ;;  %vm3889_vm9 = vmmov %vm3878_vm5 }
 0x3c6   : > { %v808_v1 = vmul.f32 %v3487_v15, %v3521_v19  ;;  %v1331_v15 = vld [vmem:[#allocation7 + $0xa0] sm:$0xff]  ;;  %v3611_v47 = vadd.f32 %v1765_v22, %v1764_v20  ;;  %v783_v59 = vperm.slane %v3521_v19, %v3871_v54  ;;  %v1793_v20 = vld [vmem:[#allocation7 + $0x128] sm:$0xff]  ;;  %v1791_v22 = vld [vmem:[#allocation7 + $0x118] sm:$0xff] }
 0x3c7   : > { %v3551_v16 = vpop.permute.xlu2 %1697  ;;  %1370 = vmatpush.msrb.mxu2 %v1331_v15  ;;  %v1327_v15 = vld [vmem:[#allocation7 + $0x80] sm:$0xff]  ;;  %1830 = vmatpush.msra.mxu3 %v1793_v20 }
 0x3c8   : > { %v3534_v52 = vpop.permute.xlu0 %1236  ;;  %v1736_v38 = vmul.f32 %v3554_v4, %v3551_v16  ;;  %v821_v56 = vrot.slane %v808_v1, 4  ;;  %v1767_v18 = vrot.slane %v3611_v47, 1  ;;  %v790_v39 = vsel %vm502_vm0, %v783_v59, %v782_v14 }
 0x3c9   : > { %v1275_v32 = vmul.f32 %v3554_v4, %v3534_v52  ;;  %1371 = vmatpush.msrb.mxu2 %v1330_v43  ;;  %v1249_v57 = vperm.slane %v3534_v52, %v3871_v54  ;;  %v3621_v43 = vld [vmem:[%s2616_s18 + $0x38] sm:$0xff]  ;;  %1831 = vmatpush.msra.mxu3 %v1792_v44  ;;  %s2048_s18 = sshll.u32 %s2612_s19, 3 }
 0x3ca   : > { %v1769_v53 = vrot.slane %v1736_v38, 4  ;;  %v822_v33 = vadd.f32 %v821_v56, %v808_v1  ;;  %s359_s13 = scalar_lea.vmem [#allocation8], %s2048_s18 }
 0x3cb   : > { %v1308_v51 = vrot.slane %v1275_v32, 4  ;;  %1372 = vmatpush.msrb.mxu2 %v1329_v34  ;;  %v867_v34 = vld [vmem:[#allocation7 + $0x20] sm:$0xff]  ;;  %1832 = vmatpush.msra.mxu3 %v1791_v22  ;;  %s1870_s10 = sshll.u32 %s359_s13, 4  ;;  %s1871_s10 = int_to_ptr.vmem [resolvable:$true] %s1870_s10 }
 0x3cc   : > { %v1770_v1 = vadd.f32 %v1769_v53, %v1736_v38  ;;  %v823_v31 = vrot.slane %v822_v33, 2  ;;  %v1256_v38 = vsel %vm3876_vm2, %v1249_v57, %v1255_v10  ;;  %v1710_v53 = vperm.slane %v3551_v16, %v3871_v54  ;;  %vm3890_vm2 = vmmov %vm3879_vm6 }
 0x3cd   : > { %v1309_v6 = vadd.f32 %v1308_v51, %v1275_v32  ;;  %v1753_v32 = vrot.slane %v1752_v61, 2  ;;  %v1305_v51 = vadd.f32 %v1304_v58, %v1303_v37  ;;  %1373 = vmatpush.msrb.mxu2 %v1328_v8  ;;  %v3626_v58 = vsel %vm502_vm0, %v3543_v60, %v1744_v2 }
 0x3ce   : > { %v1771_v56 = vrot.slane %v1770_v1, 2  ;;  %v3655_v14 = vsel %vm3880_vm7, %v1710_v53, %v1716_v48 }
 0x3cf   : > { %v3563_v21 = vpop.permute.xlu1 %765  ;;  %v1310_v50 = vrot.slane %v1309_v6, 2  ;;  %v1754_v49 = vadd.f32 %v1753_v32, %v1752_v61  ;;  %v1306_v17 = vrot.slane %v1305_v51, 1  ;;  %1374 = vmatpush.msrb.mxu2 %v1327_v15  ;;  %v1790_v15 = vld [vmem:[#allocation7 + $0x110] sm:$0xff] }
 0x3d0   : > { %v809_v52 = vmul.f32 %v3502_v13, %v3563_v21  ;;  %v3648_v57 = vadd.f32 %v1771_v56, %v1770_v1  ;;  %v784_v1 = vperm.slane %v3563_v21, %v3871_v54  ;;  %1833 = vmatpush.msra.mxu3 %v1790_v15 }
 0x3d1   : > { %v3594_v55 = vpop.permute.xlu2 %774  ;;  %v1311_v42 = vadd.f32 %v1310_v50, %v1309_v6 }
 0x3d2   : > { %v3575_v40 = vpop.permute.xlu0 %1239  ;;  %v827_v19 = vrot.slane %v809_v52, 4  ;;  %v812_v16 = vmul.f32 %v3554_v4, %v3594_v55 }
 0x3d3   : > { %v1276_v45 = vmul.f32 %v3582_v25, %v3575_v40  ;;  %v1250_v29 = vperm.slane %v3575_v40, %v3871_v54  ;;  %v869_v40 = vld [vmem:[#allocation7 + $0x30] sm:$0xff]  ;;  %v1312_v12 = vrot.slane %v1311_v42, 1 }
 0x3d4   : > { %904 = vmatpush.msrb.mxu1 %v869_v40  ;;  %v845_v48 = vrot.slane %v812_v16, 4  ;;  %v864_v40 = vld [vmem:[#allocation7 + $0x8] sm:$0xff] }
 0x3d5   : > { %v1314_v24 = vrot.slane %v1276_v45, 4 }
 0x3d6   : > { %905 = vmatpush.msrb.mxu1 %v868_v7  ;;  %v846_v7 = vadd.f32 %v845_v48, %v812_v16 }
 0x3d7   : > { %v1315_v27 = vadd.f32 %v1314_v24, %v1276_v45  ;;  %v1257_v45 = vsel %vm3877_vm3, %v1250_v29, %v1256_v38  ;;  %v3632_v24 = vadd.f32 %v823_v31, %v822_v33  ;;  %v1307_v33 = vadd.f32 %v1306_v17, %v1305_v51  ;;  %v1789_v38 = vld [vmem:[#allocation7 + $0x108] sm:$0xff]  ;;  %vm3891_vm3 = vmmov %vm3880_vm7 }
 0x3d8   : > { %v3601_v11 = vpop.permute.xlu1 %768  ;;  %906 = vmatpush.msrb.mxu1 %v867_v34  ;;  %1834 = vmatpush.msra.mxu3 %v1789_v38  ;;  %vm3894_vm7 = vmmov %vm3881_vm4 }
 0x3d9   : > { %v1316_v37 = vrot.slane %v1315_v27, 2  ;;  %v810_v61 = vmul.f32 %v3512_v30, %v3601_v11  ;;  %v1755_v30 = vrot.slane %v1754_v49, 1  ;;  %v825_v51 = vrot.slane %v3632_v24, 1 }
 0x3da   : > { %v3646_v35 = vpop.permute.xlu2 %780  ;;  %907 = vmatpush.msrb.mxu1 %v866_v23 }
 0x3db   : > { %v1317_v6 = vadd.f32 %v1316_v37, %v1315_v27  ;;  %v833_v32 = vrot.slane %v810_v61, 4  ;;  %v828_v27 = vadd.f32 %v827_v19, %v809_v52  ;;  %v3652_v50 = vadd.f32 %v1755_v30, %v1754_v49  ;;  %v865_v49 = vld [vmem:[#allocation7 + $0x10] sm:$0xff] }
 0x3dc   : > { %v1243_v13 = vpop.permute.xlu0 %1242  ;;  %v814_v52 = vmul.f32 %v3621_v43, %v3646_v35  ;;  %v1313_v37 = vadd.f32 %v1312_v12, %v1311_v42  ;;  %v1353_v42 = vsel %vm3881_vm4, %v3604_v9, %v3589_v5  ;;  %908 = vmatpush.msrb.mxu1 %v865_v49  ;;  %v785_v19 = vperm.slane %v3601_v11, %v3871_v54  ;;  %vm3895_vm4 = vmmov %vm3890_vm2 }
 0x3dd   : > { %v1251_v3 = vperm.slane %v1243_v13, %v3871_v54  ;;  %v1277_v36 = vmul.f32 %v3621_v43, %v1243_v13  ;;  %v1318_v4 = vrot.slane %v1317_v6, 1  ;;  %v834_v59 = vadd.f32 %v833_v32, %v810_v61  ;;  %v1788_v61 = vld [vmem:[#allocation7 + $0x100] sm:$0xff] }
 0x3de   : > { %v787_v13 = vperm.slane %v3594_v55, %v3871_v54  ;;  %v829_v46 = vrot.slane %v828_v27, 2  ;;  %v857_v56 = vrot.slane %v814_v52, 4  ;;  %909 = vmatpush.msrb.mxu1 %v864_v40  ;;  %1835 = vmatpush.msra.mxu3 %v1788_v61  ;;  %v791_v11 = vsel %vm504_vm1, %v784_v1, %v790_v39 }
 0x3df   : > { %v1258_v26 = vsel %vm3878_vm5, %v1251_v3, %v1257_v45  ;;  %v1320_v60 = vrot.slane %v1277_v36, 4  ;;  %v1319_v17 = vadd.f32 %v1318_v4, %v1317_v6  ;;  %v1354_v45 = vsel %vm3882_vm10, %v1307_v33, %v1353_v42  ;;  %vm3892_vm5 = vmmov %vm3888_vm8 }
 0x3e0   : > { %2049 = vst.msk [vmem:[%s3636_s25 + $0x8] sm:$0xff] %vm3879_vm6, %v1258_v26  ;;  %v835_v30 = vrot.slane %v834_v59, 2  ;;  %v1355_v26 = vsel %vm3883_vm11, %v1313_v37, %v1354_v45  ;;  %v826_v16 = vadd.f32 %v825_v51, %v3632_v24  ;;  %v858_v32 = vadd.f32 %v857_v56, %v814_v52  ;;  %vm3893_vm6 = vmmov %vm3889_vm9 }
 0x3e1   : > { %v1321_v8 = vadd.f32 %v1320_v60, %v1277_v36  ;;  %v863_v36 = vld [vmem:[#allocation7] sm:$0xff]  ;;  %v830_v60 = vadd.f32 %v829_v46, %v828_v27  ;;  %v1356_v12 = vsel %vm3884_vm12, %v1319_v17, %v1355_v26  ;;  %v792_v22 = vsel %vm3885_vm13, %v785_v19, %v791_v11  ;;  %vm3896_vm11 = vmmov %vm3891_vm3 }
 0x3e2   : > { %v3650_v10 = vpop.permute.xlu1 %771  ;;  %910 = vmatpush.msrb.mxu1 %v863_v36  ;;  %v847_v27 = vrot.slane %v846_v7, 2  ;;  %v789_v37 = vperm.slane %v3646_v35, %v3871_v54  ;;  %vm3897_vm12 = vmmov %vm3894_vm7 }
 0x3e3   : > { %v811_v29 = vmul.f32 %v3530_v41, %v3650_v10  ;;  %v1322_v2 = vrot.slane %v1321_v8, 2  ;;  %v1773_v41 = vrot.slane %v3648_v57, 1  ;;  %v786_v5 = vperm.slane %v3650_v10, %v3871_v54  ;;  %vm3898_vm13 = vmmov %vm3892_vm5 }
 0x3e4   : > { %v836_v10 = vadd.f32 %v835_v30, %v834_v59  ;;  %v831_v51 = vrot.slane %v830_v60, 1  ;;  %v859_v59 = vrot.slane %v858_v32, 2  ;;  %v848_v17 = vadd.f32 %v847_v27, %v846_v7 }
 0x3e5   : > { %v839_v31 = vrot.slane %v811_v29, 4  ;;  %v1323_v0 = vadd.f32 %v1322_v2, %v1321_v8  ;;  %v1701_v21 = vpop.permute.xlu0 %1700 }
 0x3e6   : > { %v1737_v20 = vmul.f32 %v3582_v25, %v1701_v21  ;;  %v1711_v44 = vperm.slane %v1701_v21, %v3871_v54  ;;  %v860_v42 = vadd.f32 %v859_v59, %v858_v32  ;;  %v849_v36 = vrot.slane %v848_v17, 1  ;;  %v2170_v32 = vld [vmem:[%s3776_s6] ss:$0 sm:$0xff] }
 0x3e7   : > { %v840_v3 = vadd.f32 %v839_v31, %v811_v29  ;;  %v1324_v55 = vrot.slane %v1323_v0, 1  ;;  %v793_v29 = vsel %vm3887_vm15, %v786_v5, %v792_v22  ;;  %v837_v31 = vrot.slane %v836_v10, 1  ;;  %vm3900_vm15 = vmmov %vm3893_vm6 }
 0x3e8   : > { %v1775_v6 = vrot.slane %v1737_v20, 4  ;;  %v1718_v24 = vsel %vm3888_vm8, %v1711_v44, %v3655_v14  ;;  %v1813_v14 = vsel %vm504_vm1, %v3652_v50, %v3626_v58  ;;  %v794_v46 = vsel %vm3891_vm3, %v787_v13, %v793_v29  ;;  %vm3903_vm8 = vmmov %vm3893_vm6 }
 0x3e9   : > { %v841_v9 = vrot.slane %v840_v3, 2  ;;  %v1325_v53 = vadd.f32 %v1324_v55, %v1323_v0  ;;  %v1768_v58 = vadd.f32 %v1767_v18, %v3611_v47  ;;  %v832_v50 = vadd.f32 %v831_v51, %v830_v60 }
 0x3ea   : > { %v1776_v34 = vadd.f32 %v1775_v6, %v1737_v20  ;;  %v820_v20 = vadd.f32 %v819_v28, %v3558_v63  ;;  %v838_v61 = vadd.f32 %v837_v31, %v836_v10  ;;  %v1774_v47 = vadd.f32 %v1773_v41, %v3648_v57 }
 0x3eb   : > { %v1357_v8 = vsel %vm3886_vm14, %v1325_v53, %v1356_v12  ;;  %v842_v15 = vadd.f32 %v841_v9, %v840_v3  ;;  %v861_v63 = vrot.slane %v860_v42, 1  ;;  %vm3899_vm14 = vmmov %vm3882_vm10  ;;  %v850_v11 = vadd.f32 %v849_v36, %v848_v17 }
 0x3ec   : > { %v1704_v33 = vpop.permute.xlu1 %1703  ;;  %v1777_v23 = vrot.slane %v1776_v34, 2  ;;  %1375 = vmatmul.f32.vlgmr.msrb.gmra.mxu2 %v1357_v8  ;;  %v887_v18 = vsel %vm502_vm0, %v826_v16, %v820_v20  ;;  %vm3901_vm0 = vmmov %vm3891_vm3 }
 0x3ed   : > { %v1712_v4 = vperm.slane %v1704_v33, %v3871_v54  ;;  %v1738_v39 = vmul.f32 %v3621_v43, %v1704_v33  ;;  %v843_v0 = vrot.slane %v842_v15, 1  ;;  %v888_v30 = vsel %vm504_vm1, %v832_v50, %v887_v18  ;;  %vm3902_vm1 = vmmov %vm3892_vm5 }
 0x3ee   : > { %v1778_v1 = vadd.f32 %v1777_v23, %v1776_v34  ;;  %v889_v5 = vsel %vm3897_vm12, %v838_v61, %v888_v30  ;;  %v862_v60 = vadd.f32 %v861_v63, %v860_v42 }
 0x3ef   : > { %v1719_v52 = vsel %vm3889_vm9, %v1712_v4, %v1718_v24  ;;  %v1781_v2 = vrot.slane %v1738_v39, 4  ;;  %v778_v49 = vpop.permute.xlu0 %777  ;;  %v844_v19 = vadd.f32 %v843_v0, %v842_v15 }
 0x3f0   : > { %2050 = vst.msk [vmem:[%s3636_s25 + $0x10] sm:$0xff] %vm3890_vm2, %v1719_v52  ;;  %v788_v43 = vperm.slane %v778_v49, %v3871_v54  ;;  %v813_v48 = vmul.f32 %v3582_v25, %v778_v49  ;;  %v1779_v21 = vrot.slane %v1778_v1, 1  ;;  %v1814_v25 = vsel %vm3894_vm7, %v3598_v62, %v1813_v14 }
 0x3f1   : > { %v1782_v38 = vadd.f32 %v1781_v2, %v1738_v39  ;;  %v1815_v62 = vsel %vm3882_vm10, %v1768_v58, %v1814_v25  ;;  %v890_v53 = vsel %vm3899_vm14, %v844_v19, %v889_v5 }
 0x3f2   : > { %v795_v35 = vsel %vm3892_vm5, %v788_v43, %v794_v46  ;;  %v851_v40 = vrot.slane %v813_v48, 4  ;;  %v1780_v45 = vadd.f32 %v1779_v21, %v1778_v1  ;;  %v1816_v26 = vsel %vm3896_vm11, %v1774_v47, %v1815_v62 }
 0x3f3   : > { %v1783_v3 = vrot.slane %v1782_v38, 2  ;;  %v796_v54 = vsel %vm3893_vm6, %v789_v37, %v795_v35  ;;  %v891_v34 = vsel %vm3901_vm0, %v850_v11, %v890_v53 }
 0x3f4   : > { %798 = vst.msk [vmem:[%s3636_s25] sm:$0xff] %vm3895_vm4, %v796_v54  ;;  %v852_v13 = vadd.f32 %v851_v40, %v813_v48  ;;  %v1817_v44 = vsel %vm3898_vm13, %v1780_v45, %v1816_v26 }
 0x3f5   : > { %v1784_v56 = vadd.f32 %v1783_v3, %v1782_v38 }
 0x3f6   : > { %v853_v55 = vrot.slane %v852_v13, 2 }
 0x3f7   : > { %v1785_v7 = vrot.slane %v1784_v56, 1 }
 0x3f8   : > { %v854_v6 = vadd.f32 %v853_v55, %v852_v13 }
 0x3f9   : > { %v1786_v28 = vadd.f32 %v1785_v7, %v1784_v56 }
 0x3fa   : > { %v855_v9 = vrot.slane %v854_v6, 1 }
 0x3fb   : > { %v1818_v57 = vsel %vm3900_vm15, %v1786_v28, %v1817_v44 }
 0x3fc   : > { %v856_v41 = vadd.f32 %v855_v9, %v854_v6  ;;  %1836 = vmatmul.f32.vlgmr.msra.gmra.mxu3 %v1818_v57 }
 0x3fe   : > { %v892_v12 = vsel %vm3902_vm1, %v856_v41, %v891_v34 }
 0x3ff   : > { %v893_v16 = vsel %vm3903_vm8, %v862_v60, %v892_v12 }
 0x400   : > { %911 = vmatmul.f32.vlgmr.msrb.gmra.mxu1 %v893_v16 }
 0x46f   : > { %v1376_v8 = vpop.f32.mrf.mxu2 }
 0x47d   : > { %v912_v22 = vpop.f32.mrf.mxu1 }
 0x47e   : > { %v918_v33 = vadd.f32 %v2170_v32, %v912_v22 }
 0x47f   : > { %v1837_v10 = vpop.f32.mrf.mxu3 }
 0x480   : > { %v1379_v23 = vadd.f32 %v1376_v8, %v918_v33 }
 0x482   : > { %v1840_v4 = vadd.f32 %v1837_v10, %v1379_v23 }
 0x484   : > { %1841 = vmax.xlane.f32.xlu1 %v1840_v4 }
 0x4f7   : > { %v1842_v39 = vpop.xlane.xlu1 %1841 }
 0x4f8   : > { %v1843_v27 = vsub.f32 %v1840_v4, %v1842_v39 }
 0x4fa   : > { %v1844_v29 = vmul.f32 1.442695, %v1843_v27 }
 0x4fc   : > { %2283 = vpow2.f32 %v1844_v29 }
 0x502   : > { %v2284_v15 = vpop.eup %2283 }
 0x503   : > { %1846 = vadd.xlane.f32.xlu0 %v2284_v15 }
 0x576   : > { %v1847_v24 = vpop.xlane.xlu0 %1846 }
 0x577   : > { %2285 = vlog2.f32 %v1847_v24 }
 0x57d   : > { %v2286_v51 = vpop.eup %2285 }
 0x57e   : > { %v1849_v1 = vmul.f32 0.6931472, %v2286_v51 }
 0x580   : > { %v1850_v52 = vadd.f32 %v1849_v1, %v1842_v39 }
 0x582   : > { %v1851_v2 = vsub.f32 %v1840_v4, %v1850_v52 }
 0x584   : > { %1852 = vst [vmem:[%s359_s13] sm:$0xff] %v1851_v2 }
 0x585   : > { %2412 = shalt.err (!%p2409_p10)
}
 0x586   : > { %2106 = dma.vmem_to_hbm [thread:$0]  (%p2579_p3), %s1871_s10, 128, %s1873_s20, %s1854_s21   ;;  %v1913_v49 = vld [vmem:[%s3636_s25] sm:$0xff] (%p2579_p3)  ;;  %v1915_v37 = vld [vmem:[%s3636_s25 + $0x8] sm:$0xff] (%p2579_p3)  ;;  %v1917_v43 = vld [vmem:[%s3636_s25 + $0x10] sm:$0xff] (%p2579_p3) }
 0x587   : > { %1878 = sbr.rel (!%p2579_p3) target bundleno = 1420 (0x58c), region = 68  ;;  %s1880_s23 = scalar_lea.vmem (%p2579_p3), %s3778_s8, %s2052_s11 }
 0x588   : > { %1914 = vst [vmem:[%s1880_s23] sm:$0xff] (%p2579_p3), %v1913_v49 }
 0x589   : > { %1916 = vst [vmem:[%s1880_s23 + $0x10] sm:$0xff] (%p2579_p3), %v1915_v37 }
 0x58a   : > { %1918 = vst [vmem:[%s1880_s23 + $0x20] sm:$0xff] (%p2579_p3), %v1917_v43 }
 0x58c PF: > { %s1930_s14 = sand.u32 1, %s2443_s27   ;;  %p3904_p3 = scmp.ge.s32.totalorder %s2455_s30, 2 }
 0x58d   : > { %s1931_s13 = scalar_lea.sflag [#allocation4], %s1930_s14 }
 0x58e   : > { %p2120_p12 = pnand %p3904_p3, %p2542_p6 }
 0x590   : > { %p2121_p13 = pneg %p2120_p12 }
 0x592   : > { %2438 = dma.done.wait (%p2121_p13), %s1931_s13, 128  }
 0x593   : > { %2440 = vsyncadd (%p2121_p13), %s1931_s13, 4294967168  ;;  %p23_p0 = scmp.ge.s32.totalorder %s2569_s26, 4   ;;  %s3905_s27 = smov %s2447_s28 }
 0x594   : > { %s3906_s28 = smov %s2451_s29  ;;  %s3907_s29 = smov %s2585_s15 }
 0x595   : > { %s3908_s30 = smov %s2569_s26  ;;  %25 = sbr.rel (!%p23_p0) target bundleno = 9 (0x9), region = 155 }
 0x59a   :  { %1944 = vsyncpa [#allocation3], 1 }
 0x59b   :  { %1946 = vsyncpa [#allocation3 + $0x1], 1 }
 0x59c   :  { %1947 = vsyncpa [#allocation6], 1 }
 0x59d   :  { %1948 = vsyncpa [#allocation4], 1 }
 0x59e   :  { %1950 = vsyncpa [#allocation4 + $0x1], 1 }

</bundles_post_ra>
